<compile_context>
chip_gen: v6e
topology: v6e:2x2x1
jax: 0.10.0
libtpu: 0.0.40
codegen_flags: <defaults>
</compile_context>

<pallas_src>
import functools
import math

import jax
import jax.numpy as jnp
from jax import lax
from jax.experimental import pallas as pl
from jax.experimental.pallas import tpu as pltpu

MM_DTYPE = jnp.bfloat16     # MXU operand dtype (f32 accumulation everywhere)
LANE = 128                  # lane width; classifier output padded to this


# --------------------------- in-kernel helpers ---------------------------

def _layernorm(h, gamma, beta, eps):
    mu = jnp.mean(h, axis=-1, keepdims=True)
    var = jnp.mean((h - mu) ** 2, axis=-1, keepdims=True)
    return (h - mu) * lax.rsqrt(var + eps) * gamma + beta


def _mm(a, w):
    """MXU matmul: cast activation to the (bf16) weight dtype, accumulate in f32."""
    return jnp.dot(a.astype(w.dtype), w, preferred_element_type=jnp.float32)


# --------------------------- fused whole-forward kernel ---------------------------

def _fused_forward_kernel(x_ref, mask_ref,
                          embg_ref, embb_ref,
                          wqkv_ref, bqkv_ref, wo_ref, bo_ref,
                          ln1g_ref, ln1b_ref,
                          wi_ref, bi_ref, wf_ref, bf_ref,
                          ln2g_ref, ln2b_ref,
                          wp_ref, bp_ref, wc_ref, bc_ref,
                          logits_ref, *, n_layers, n_heads, d_head, eps):
    Bb, _, S = mask_ref.shape          # batch elements in this block, seq len
    rows, hidden = x_ref.shape         # rows == Bb * S

    # ---- embedding LayerNorm (no residual, no zeros tensor streamed) ----
    h = _layernorm(x_ref[...], embg_ref[...], embb_ref[...], eps)   # (rows, hidden) f32

    m_all = mask_ref[...]              # (Bb, 1, S) additive mask (0 / -1e9), f32

    # ---- encoder layers (weights fully VMEM-resident; unrolled: tiny L) ----
    # TODO(synk): for real BERT sizes use lax.fori_loop over layers and K-tiled
    # FFN weights so live ranges stay bounded and VMEM fits (esp. v7x 64 MiB).
    for l in range(n_layers):
        # Fused Q|K|V projection: one MXU matmul (scale folded into Q slice).
        qkv = _mm(h, wqkv_ref[l]) + bqkv_ref[l]          # (rows, 3*hidden) f32
        q = qkv[:, :hidden]
        k = qkv[:, hidden:2 * hidden]
        v = qkv[:, 2 * hidden:]

        # All (batch, head) score tiles stacked along sublanes -> ONE batched softmax.
        sc_tiles = []
        for bi in range(Bb):
            m_b = m_all[bi]                              # (1, S)
            r0 = bi * S
            for hh in range(n_heads):
                c0 = hh * d_head
                qh = q[r0:r0 + S, c0:c0 + d_head].astype(MM_DTYPE)
                kh = k[r0:r0 + S, c0:c0 + d_head].astype(MM_DTYPE)
                # contract dim 1 of both operands: q @ k^T without an explicit .T
                s = lax.dot_general(qh, kh, (((1,), (1,)), ((), ())),
                                    preferred_element_type=jnp.float32)
                sc_tiles.append(s + m_b)                 # (S, S) f32
        sc = jnp.concatenate(sc_tiles, axis=0) if len(sc_tiles) > 1 else sc_tiles[0]
        sc = sc - jnp.max(sc, axis=-1, keepdims=True)
        p = jnp.exp(sc)
        # approx reciprocal -> EUP slot; switch to approx=False for bit-exact softmax
        p = p * pl.reciprocal(jnp.sum(p, axis=-1, keepdims=True), approx=True)

        # Per-(batch, head) PV matmuls; context stays in registers and is merged
        # with concatenates (no VMEM scratch, no masked partial stores).
        ctx_rows = []
        for bi in range(Bb):
            cols = []
            r0 = bi * S
            for hh in range(n_heads):
                pr0 = (bi * n_heads + hh) * S
                c0 = hh * d_head
                ph = p[pr0:pr0 + S, :].astype(MM_DTYPE)
                vh = v[r0:r0 + S, c0:c0 + d_head].astype(MM_DTYPE)
                cols.append(jnp.dot(ph, vh, preferred_element_type=jnp.float32))
            ctx_rows.append(jnp.concatenate(cols, axis=-1) if len(cols) > 1 else cols[0])
        ctx = jnp.concatenate(ctx_rows, axis=0) if len(ctx_rows) > 1 else ctx_rows[0]

        # Attention output projection + residual + LayerNorm (fused).
        h = _layernorm(_mm(ctx, wo_ref[l]) + bo_ref[l] + h,
                       ln1g_ref[l], ln1b_ref[l], eps)

        # FFN (+GELU) + residual + LayerNorm (fused); (rows, inter) stays on-chip.
        ffn = _mm(h, wi_ref[l]) + bi_ref[l]
        # tanh-approx GELU (HF "gelu_new"); exact erf-GELU differs by ~1e-3.
        ffn = jax.nn.gelu(ffn, approximate=True)
        h = _layernorm(_mm(ffn, wf_ref[l]) + bf_ref[l] + h,
                       ln2g_ref[l], ln2b_ref[l], eps)

    # ---- BERT pooler (tanh on [CLS]) + dropout(eval)=identity + classifier ----
    cls_rows = [h[bi * S:bi * S + 1, :] for bi in range(Bb)]
    cls = jnp.concatenate(cls_rows, axis=0) if Bb > 1 else cls_rows[0]   # (Bb, hidden)
    pooled = jnp.tanh(_mm(cls, wp_ref[...]) + bp_ref[...])
    logits = _mm(pooled, wc_ref[...]) + bc_ref[...]                      # (Bb, LANE) f32
    logits_ref[...] = logits.reshape(logits_ref.shape)                   # lane-dense store


# --------------------------- wrapper ---------------------------

def _batch_grid_blocks(B):
    """grid=(B,) + 'parallel' only pays off when one JAX device has >1 TensorCore
    sharing the grid (v4/v5p megacore, v7x).  On single-TC chips (v5e, v6e) the
    batch grid is just a serial loop, so fold the whole batch into one block."""
    try:
        kind = jax.devices()[0].device_kind.lower()
    except Exception:
        return 1
    if any(tag in kind for tag in ("v4", "v5p", "v7", "7x")):
        return B
    return 1


def fused_forward(x2, addmask, params, *, n_heads, n_layers, eps=1e-12,
                  batch_blocks=None):
    """x2: [B*S, hidden] pre-LN embedding sum; addmask: [B, 1, S] additive mask."""
    B, _, S = addmask.shape
    hidden = x2.shape[1]
    d_head = hidden // n_heads
    nb = batch_blocks if batch_blocks is not None else _batch_grid_blocks(B)
    nb = max(1, min(nb, B))
    assert B % nb == 0
    Bb = B // nb
    ncp = params["cls_w"].shape[1]          # lane-padded classifier width

    def full(arr):
        nd = arr.ndim
        return pl.BlockSpec(arr.shape, lambda b, _n=nd: (0,) * _n)

    kernel = functools.partial(_fused_forward_kernel,
                               n_layers=n_layers, n_heads=n_heads,
                               d_head=d_head, eps=eps)

    weights = (params["emb_ln_g"], params["emb_ln_b"],
               params["wqkv"], params["bqkv"], params["wo"], params["bo"],
               params["ln1_g"], params["ln1_b"],
               params["wi"], params["bi"], params["wf"], params["bf"],
               params["ln2_g"], params["ln2_b"],
               params["pool_w"], params["pool_b"],
               params["cls_w"], params["cls_b"])

    out = pl.pallas_call(
        kernel,
        out_shape=jax.ShapeDtypeStruct((B, 1, ncp), jnp.float32),
        grid=(nb,),
        in_specs=[pl.BlockSpec((Bb * S, hidden), lambda b: (b, 0)),   # residual stream rows
                  pl.BlockSpec((Bb, 1, S), lambda b: (b, 0, 0))]      # additive mask
                 + [full(w) for w in weights],
        out_specs=pl.BlockSpec((Bb, 1, ncp), lambda b: (b, 0, 0)),
        compiler_params=pltpu.CompilerParams(dimension_semantics=("parallel",)),
    )(x2, addmask, *weights)
    return out.reshape(B, ncp)


# --------------------------- model (glue + kernel) ---------------------------

def init_params(key, *, vocab, hidden, n_layers, n_heads, inter, max_pos, num_classes):
    scale = 0.02
    d_head = hidden // n_heads
    q_scale = 1.0 / math.sqrt(d_head)
    keys = iter(jax.random.split(key, 8 + 8 * n_layers))

    def w(shape):
        return (scale * jax.random.normal(next(keys), shape)).astype(jnp.float32)

    zeros = lambda s: jnp.zeros(s, jnp.float32)
    ones = lambda s: jnp.ones(s, jnp.float32)

    ncp = max(LANE, num_classes)                       # lane-pad classifier output
    cls_w = jnp.zeros((hidden, ncp), jnp.float32).at[:, :num_classes].set(
        w((hidden, num_classes)))

    layers = {k: [] for k in ("wqkv", "bqkv", "wo", "bo", "ln1_g", "ln1_b",
                              "wi", "bi", "wf", "bf", "ln2_g", "ln2_b")}
    for _ in range(n_layers):
        wq, wk, wv = w((hidden, hidden)), w((hidden, hidden)), w((hidden, hidden))
        # Fuse Q|K|V into one [hidden, 3*hidden] weight (single matmul per layer)
        # and fold the 1/sqrt(d_head) attention scale into the Q slice.
        layers["wqkv"].append(jnp.concatenate([wq * q_scale, wk, wv], axis=1))
        layers["bqkv"].append(zeros((1, 3 * hidden)))
        layers["wo"].append(w((hidden, hidden)));  layers["bo"].append(zeros((1, hidden)))
        layers["ln1_g"].append(ones((1, hidden))); layers["ln1_b"].append(zeros((1, hidden)))
        layers["wi"].append(w((hidden, inter)));   layers["bi"].append(zeros((1, inter)))
        layers["wf"].append(w((inter, hidden)));   layers["bf"].append(zeros((1, hidden)))
        layers["ln2_g"].append(ones((1, hidden))); layers["ln2_b"].append(zeros((1, hidden)))

    params = {
        "num_heads": n_heads, "n_layers": n_layers,
        "word_emb": w((vocab, hidden)),
        "pos_emb": w((max_pos, hidden)),
        "type_emb": w((2, hidden)),
        "emb_ln_g": ones((1, hidden)), "emb_ln_b": zeros((1, hidden)),
        "pool_w": w((hidden, hidden)).astype(MM_DTYPE), "pool_b": zeros((1, hidden)),
        "cls_w": cls_w.astype(MM_DTYPE), "cls_b": zeros((1, ncp)),
    }
    for name, lst in layers.items():
        stacked = jnp.stack(lst, axis=0)
        if name in ("wqkv", "wo", "wi", "wf"):
            stacked = stacked.astype(MM_DTYPE)      # MXU operands; f32 accumulate in-kernel
        params[name] = stacked
    return params


def model_for_sc_forward(params, input_ids, mask, num_classes):
    B, S = input_ids.shape
    hidden = params["word_emb"].shape[1]

    # --- embeddings (gather = glue); token_type_ids implicitly all zero ---
    x = (params["word_emb"][input_ids]
         + params["pos_emb"][None, :S, :]
         + params["type_emb"][0][None, None, :])                 # (B, S, hidden) f32
    x2 = x.reshape(B * S, hidden)

    # additive attention mask [B, 1, S]: 0 where attended, -1e9 where masked (f32)
    addmask = ((1.0 - mask.astype(jnp.float32)) * -1e9).reshape(B, 1, S)

    logits_pad = fused_forward(x2, addmask, params,
                               n_heads=params["num_heads"],
                               n_layers=params["n_layers"])
    logits = logits_pad[:, :num_classes]
    if num_classes == 1:
        logits = jax.nn.sigmoid(logits).squeeze(1)
    return {"logits": logits}


# --------------------------- main ---------------------------

if __name__ == "__main__":
    # small BERT-ish config
    VOCAB, HIDDEN, N_LAYERS, N_HEADS, INTER, MAX_POS = 64, 32, 2, 4, 64, 16
    NUM_CLASSES = 2
    B, S = 2, 8

    root = jax.random.PRNGKey(0)
    k_params, k_ids = jax.random.split(root)

    params = init_params(k_params, vocab=VOCAB, hidden=HIDDEN, n_layers=N_LAYERS,
                         n_heads=N_HEADS, inter=INTER, max_pos=MAX_POS,
                         num_classes=NUM_CLASSES)

    input_ids = jax.random.randint(k_ids, (B, S), 0, VOCAB, dtype=jnp.int32)
    mask = jnp.array([[1, 1, 1, 1, 1, 1, 1, 1],
                      [1, 1, 1, 1, 1, 1, 0, 0]], dtype=jnp.int32)

    out = model_for_sc_forward(params, input_ids, mask, NUM_CLASSES)
    logits = jax.block_until_ready(out["logits"])
    assert logits.shape == (B, NUM_CLASSES)
    assert bool(jnp.all(jnp.isfinite(logits)))
    print("KERNEL_OK")
</pallas_src>

<mosaic_0001>
module attributes {stable_mosaic.version = 11 : i64} {
  func.func @_fused_forward_kernel(%arg0: i32, %arg1: memref<16x32xf32, #tpu.memory_space<vmem>>, %arg2: memref<2x1x8xf32, #tpu.memory_space<vmem>>, %arg3: memref<1x32xf32, #tpu.memory_space<vmem>>, %arg4: memref<1x32xf32, #tpu.memory_space<vmem>>, %arg5: memref<2x32x96xbf16, #tpu.memory_space<vmem>>, %arg6: memref<2x1x96xf32, #tpu.memory_space<vmem>>, %arg7: memref<2x32x32xbf16, #tpu.memory_space<vmem>>, %arg8: memref<2x1x32xf32, #tpu.memory_space<vmem>>, %arg9: memref<2x1x32xf32, #tpu.memory_space<vmem>>, %arg10: memref<2x1x32xf32, #tpu.memory_space<vmem>>, %arg11: memref<2x32x64xbf16, #tpu.memory_space<vmem>>, %arg12: memref<2x1x64xf32, #tpu.memory_space<vmem>>, %arg13: memref<2x64x32xbf16, #tpu.memory_space<vmem>>, %arg14: memref<2x1x32xf32, #tpu.memory_space<vmem>>, %arg15: memref<2x1x32xf32, #tpu.memory_space<vmem>>, %arg16: memref<2x1x32xf32, #tpu.memory_space<vmem>>, %arg17: memref<32x32xbf16, #tpu.memory_space<vmem>>, %arg18: memref<1x32xf32, #tpu.memory_space<vmem>>, %arg19: memref<32x128xbf16, #tpu.memory_space<vmem>>, %arg20: memref<1x128xf32, #tpu.memory_space<vmem>>, %arg21: memref<2x1x128xf32, #tpu.memory_space<vmem>>) attributes {dimension_semantics = [#tpu.dimension_semantics<parallel>], iteration_bounds = array<i64: 1>, scalar_prefetch = 0 : i64, scratch_operands = 0 : i64, tpu.core_type = #tpu.core_type<tc>, window_params = [{transform_indices = @transform_0, window_bounds = array<i64: 16, 32>}, {transform_indices = @transform_1, window_bounds = array<i64: 2, 1, 8>}, {pipeline_mode = #tpu.pipeline_mode<synchronous>, transform_indices = @transform_2, window_bounds = array<i64: 1, 32>}, {pipeline_mode = #tpu.pipeline_mode<synchronous>, transform_indices = @transform_3, window_bounds = array<i64: 1, 32>}, {pipeline_mode = #tpu.pipeline_mode<synchronous>, transform_indices = @transform_4, window_bounds = array<i64: 2, 32, 96>}, {pipeline_mode = #tpu.pipeline_mode<synchronous>, transform_indices = @transform_5, window_bounds = array<i64: 2, 1, 96>}, {pipeline_mode = #tpu.pipeline_mode<synchronous>, transform_indices = @transform_6, window_bounds = array<i64: 2, 32, 32>}, {pipeline_mode = #tpu.pipeline_mode<synchronous>, transform_indices = @transform_7, window_bounds = array<i64: 2, 1, 32>}, {pipeline_mode = #tpu.pipeline_mode<synchronous>, transform_indices = @transform_8, window_bounds = array<i64: 2, 1, 32>}, {pipeline_mode = #tpu.pipeline_mode<synchronous>, transform_indices = @transform_9, window_bounds = array<i64: 2, 1, 32>}, {pipeline_mode = #tpu.pipeline_mode<synchronous>, transform_indices = @transform_10, window_bounds = array<i64: 2, 32, 64>}, {pipeline_mode = #tpu.pipeline_mode<synchronous>, transform_indices = @transform_11, window_bounds = array<i64: 2, 1, 64>}, {pipeline_mode = #tpu.pipeline_mode<synchronous>, transform_indices = @transform_12, window_bounds = array<i64: 2, 64, 32>}, {pipeline_mode = #tpu.pipeline_mode<synchronous>, transform_indices = @transform_13, window_bounds = array<i64: 2, 1, 32>}, {pipeline_mode = #tpu.pipeline_mode<synchronous>, transform_indices = @transform_14, window_bounds = array<i64: 2, 1, 32>}, {pipeline_mode = #tpu.pipeline_mode<synchronous>, transform_indices = @transform_15, window_bounds = array<i64: 2, 1, 32>}, {pipeline_mode = #tpu.pipeline_mode<synchronous>, transform_indices = @transform_16, window_bounds = array<i64: 32, 32>}, {pipeline_mode = #tpu.pipeline_mode<synchronous>, transform_indices = @transform_17, window_bounds = array<i64: 1, 32>}, {pipeline_mode = #tpu.pipeline_mode<synchronous>, transform_indices = @transform_18, window_bounds = array<i64: 32, 128>}, {pipeline_mode = #tpu.pipeline_mode<synchronous>, transform_indices = @transform_19, window_bounds = array<i64: 1, 128>}, {transform_indices = @transform_20, window_bounds = array<i64: 2, 1, 128>}]} {
    %c0 = arith.constant 0 : index
    %c0_0 = arith.constant 0 : index
    %0 = vector.load %arg1[%c0, %c0_0] : memref<16x32xf32, #tpu.memory_space<vmem>>, vector<16x32xf32>
    %c0_1 = arith.constant 0 : index
    %c0_2 = arith.constant 0 : index
    %1 = vector.load %arg3[%c0_1, %c0_2] : memref<1x32xf32, #tpu.memory_space<vmem>>, vector<1x32xf32>
    %c0_3 = arith.constant 0 : index
    %c0_4 = arith.constant 0 : index
    %2 = vector.load %arg4[%c0_3, %c0_4] : memref<1x32xf32, #tpu.memory_space<vmem>>, vector<1x32xf32>
    %cst = arith.constant dense<0.000000e+00> : vector<16xf32>
    %3 = vector.multi_reduction <add>, %0, %cst [1] : vector<16x32xf32> to vector<16xf32>
    %4 = vector.shape_cast %3 : vector<16xf32> to vector<16x1xf32>
    %cst_5 = arith.constant 3.200000e+01 : f32
    %5 = vector.broadcast %cst_5 : f32 to vector<16x1xf32>
    %6 = arith.divf %4, %5 : vector<16x1xf32>
    %7 = vector.broadcast %6 : vector<16x1xf32> to vector<16x32xf32>
    %8 = arith.subf %0, %7 : vector<16x32xf32>
    %9 = arith.mulf %8, %8 : vector<16x32xf32>
    %cst_6 = arith.constant dense<0.000000e+00> : vector<16xf32>
    %10 = vector.multi_reduction <add>, %9, %cst_6 [1] : vector<16x32xf32> to vector<16xf32>
    %11 = vector.shape_cast %10 : vector<16xf32> to vector<16x1xf32>
    %cst_7 = arith.constant 3.200000e+01 : f32
    %12 = vector.broadcast %cst_7 : f32 to vector<16x1xf32>
    %13 = arith.divf %11, %12 : vector<16x1xf32>
    %14 = vector.broadcast %6 : vector<16x1xf32> to vector<16x32xf32>
    %15 = arith.subf %0, %14 : vector<16x32xf32>
    %cst_8 = arith.constant 9.99999996E-13 : f32
    %16 = vector.broadcast %cst_8 : f32 to vector<16x1xf32>
    %17 = arith.addf %13, %16 : vector<16x1xf32>
    %18 = math.rsqrt %17 : vector<16x1xf32>
    %19 = vector.broadcast %18 : vector<16x1xf32> to vector<16x32xf32>
    %20 = arith.mulf %15, %19 : vector<16x32xf32>
    %21 = vector.broadcast %1 : vector<1x32xf32> to vector<16x32xf32>
    %22 = arith.mulf %20, %21 : vector<16x32xf32>
    %23 = vector.broadcast %2 : vector<1x32xf32> to vector<16x32xf32>
    %24 = arith.addf %22, %23 : vector<16x32xf32>
    %c0_9 = arith.constant 0 : index
    %c0_10 = arith.constant 0 : index
    %c0_11 = arith.constant 0 : index
    %25 = vector.load %arg2[%c0_9, %c0_10, %c0_11] : memref<2x1x8xf32, #tpu.memory_space<vmem>>, vector<2x1x8xf32>
    %c0_12 = arith.constant 0 : index
    %c0_13 = arith.constant 0 : index
    %c0_14 = arith.constant 0 : index
    %26 = vector.load %arg5[%c0_12, %c0_13, %c0_14] : memref<2x32x96xbf16, #tpu.memory_space<vmem>>, vector<1x32x96xbf16>
    %27 = vector.shape_cast %26 : vector<1x32x96xbf16> to vector<32x96xbf16>
    %28 = arith.truncf %24 : vector<16x32xf32> to vector<16x32xbf16>
    %cst_15 = arith.constant dense<0.000000e+00> : vector<16x96xf32>
    %29 = tpu.matmul %28, %27, %cst_15 {dimension_numbers = #tpu.dot_dimension_numbers<[1], [0], [0], [1], [0, 0, 1, 1], [], []>} : vector<16x32xbf16>, vector<32x96xbf16>, vector<16x96xf32> -> vector<16x96xf32>
    %c0_16 = arith.constant 0 : index
    %c0_17 = arith.constant 0 : index
    %c0_18 = arith.constant 0 : index
    %30 = vector.load %arg6[%c0_16, %c0_17, %c0_18] : memref<2x1x96xf32, #tpu.memory_space<vmem>>, vector<1x1x96xf32>
    %31 = vector.shape_cast %30 : vector<1x1x96xf32> to vector<1x96xf32>
    %32 = vector.broadcast %31 : vector<1x96xf32> to vector<16x96xf32>
    %33 = arith.addf %29, %32 : vector<16x96xf32>
    %34 = vector.extract_strided_slice %33 {offsets = [0, 0], sizes = [16, 32], strides = [1, 1]} : vector<16x96xf32> to vector<16x32xf32>
    %35 = vector.extract_strided_slice %33 {offsets = [0, 32], sizes = [16, 32], strides = [1, 1]} : vector<16x96xf32> to vector<16x32xf32>
    %36 = vector.extract_strided_slice %33 {offsets = [0, 64], sizes = [16, 32], strides = [1, 1]} : vector<16x96xf32> to vector<16x32xf32>
    %37 = vector.extract_strided_slice %25 {offsets = [0, 0, 0], sizes = [1, 1, 8], strides = [1, 1, 1]} : vector<2x1x8xf32> to vector<1x1x8xf32>
    %38 = vector.shape_cast %37 : vector<1x1x8xf32> to vector<1x8xf32>
    %39 = vector.extract_strided_slice %34 {offsets = [0, 0], sizes = [8, 8], strides = [1, 1]} : vector<16x32xf32> to vector<8x8xf32>
    %40 = arith.truncf %39 : vector<8x8xf32> to vector<8x8xbf16>
    %41 = vector.extract_strided_slice %35 {offsets = [0, 0], sizes = [8, 8], strides = [1, 1]} : vector<16x32xf32> to vector<8x8xf32>
    %42 = arith.truncf %41 : vector<8x8xf32> to vector<8x8xbf16>
    %cst_19 = arith.constant dense<0.000000e+00> : vector<8x8xf32>
    %43 = tpu.matmul %40, %42, %cst_19 {dimension_numbers = #tpu.dot_dimension_numbers<[1], [1], [0], [0], [0, 0, 1, 0], [], []>} : vector<8x8xbf16>, vector<8x8xbf16>, vector<8x8xf32> -> vector<8x8xf32>
    %44 = vector.broadcast %38 : vector<1x8xf32> to vector<8x8xf32>
    %45 = arith.addf %43, %44 : vector<8x8xf32>
    %46 = vector.extract_strided_slice %34 {offsets = [0, 8], sizes = [8, 8], strides = [1, 1]} : vector<16x32xf32> to vector<8x8xf32>
    %47 = arith.truncf %46 : vector<8x8xf32> to vector<8x8xbf16>
    %48 = vector.extract_strided_slice %35 {offsets = [0, 8], sizes = [8, 8], strides = [1, 1]} : vector<16x32xf32> to vector<8x8xf32>
    %49 = arith.truncf %48 : vector<8x8xf32> to vector<8x8xbf16>
    %cst_20 = arith.constant dense<0.000000e+00> : vector<8x8xf32>
    %50 = tpu.matmul %47, %49, %cst_20 {dimension_numbers = #tpu.dot_dimension_numbers<[1], [1], [0], [0], [0, 0, 1, 0], [], []>} : vector<8x8xbf16>, vector<8x8xbf16>, vector<8x8xf32> -> vector<8x8xf32>
    %51 = vector.broadcast %38 : vector<1x8xf32> to vector<8x8xf32>
    %52 = arith.addf %50, %51 : vector<8x8xf32>
    %53 = vector.extract_strided_slice %34 {offsets = [0, 16], sizes = [8, 8], strides = [1, 1]} : vector<16x32xf32> to vector<8x8xf32>
    %54 = arith.truncf %53 : vector<8x8xf32> to vector<8x8xbf16>
    %55 = vector.extract_strided_slice %35 {offsets = [0, 16], sizes = [8, 8], strides = [1, 1]} : vector<16x32xf32> to vector<8x8xf32>
    %56 = arith.truncf %55 : vector<8x8xf32> to vector<8x8xbf16>
    %cst_21 = arith.constant dense<0.000000e+00> : vector<8x8xf32>
    %57 = tpu.matmul %54, %56, %cst_21 {dimension_numbers = #tpu.dot_dimension_numbers<[1], [1], [0], [0], [0, 0, 1, 0], [], []>} : vector<8x8xbf16>, vector<8x8xbf16>, vector<8x8xf32> -> vector<8x8xf32>
    %58 = vector.broadcast %38 : vector<1x8xf32> to vector<8x8xf32>
    %59 = arith.addf %57, %58 : vector<8x8xf32>
    %60 = vector.extract_strided_slice %34 {offsets = [0, 24], sizes = [8, 8], strides = [1, 1]} : vector<16x32xf32> to vector<8x8xf32>
    %61 = arith.truncf %60 : vector<8x8xf32> to vector<8x8xbf16>
    %62 = vector.extract_strided_slice %35 {offsets = [0, 24], sizes = [8, 8], strides = [1, 1]} : vector<16x32xf32> to vector<8x8xf32>
    %63 = arith.truncf %62 : vector<8x8xf32> to vector<8x8xbf16>
    %cst_22 = arith.constant dense<0.000000e+00> : vector<8x8xf32>
    %64 = tpu.matmul %61, %63, %cst_22 {dimension_numbers = #tpu.dot_dimension_numbers<[1], [1], [0], [0], [0, 0, 1, 0], [], []>} : vector<8x8xbf16>, vector<8x8xbf16>, vector<8x8xf32> -> vector<8x8xf32>
    %65 = vector.broadcast %38 : vector<1x8xf32> to vector<8x8xf32>
    %66 = arith.addf %64, %65 : vector<8x8xf32>
    %67 = vector.extract_strided_slice %25 {offsets = [1, 0, 0], sizes = [1, 1, 8], strides = [1, 1, 1]} : vector<2x1x8xf32> to vector<1x1x8xf32>
    %68 = vector.shape_cast %67 : vector<1x1x8xf32> to vector<1x8xf32>
    %69 = vector.extract_strided_slice %34 {offsets = [8, 0], sizes = [8, 8], strides = [1, 1]} : vector<16x32xf32> to vector<8x8xf32>
    %70 = arith.truncf %69 : vector<8x8xf32> to vector<8x8xbf16>
    %71 = vector.extract_strided_slice %35 {offsets = [8, 0], sizes = [8, 8], strides = [1, 1]} : vector<16x32xf32> to vector<8x8xf32>
    %72 = arith.truncf %71 : vector<8x8xf32> to vector<8x8xbf16>
    %cst_23 = arith.constant dense<0.000000e+00> : vector<8x8xf32>
    %73 = tpu.matmul %70, %72, %cst_23 {dimension_numbers = #tpu.dot_dimension_numbers<[1], [1], [0], [0], [0, 0, 1, 0], [], []>} : vector<8x8xbf16>, vector<8x8xbf16>, vector<8x8xf32> -> vector<8x8xf32>
    %74 = vector.broadcast %68 : vector<1x8xf32> to vector<8x8xf32>
    %75 = arith.addf %73, %74 : vector<8x8xf32>
    %76 = vector.extract_strided_slice %34 {offsets = [8, 8], sizes = [8, 8], strides = [1, 1]} : vector<16x32xf32> to vector<8x8xf32>
    %77 = arith.truncf %76 : vector<8x8xf32> to vector<8x8xbf16>
    %78 = vector.extract_strided_slice %35 {offsets = [8, 8], sizes = [8, 8], strides = [1, 1]} : vector<16x32xf32> to vector<8x8xf32>
    %79 = arith.truncf %78 : vector<8x8xf32> to vector<8x8xbf16>
    %cst_24 = arith.constant dense<0.000000e+00> : vector<8x8xf32>
    %80 = tpu.matmul %77, %79, %cst_24 {dimension_numbers = #tpu.dot_dimension_numbers<[1], [1], [0], [0], [0, 0, 1, 0], [], []>} : vector<8x8xbf16>, vector<8x8xbf16>, vector<8x8xf32> -> vector<8x8xf32>
    %81 = vector.broadcast %68 : vector<1x8xf32> to vector<8x8xf32>
    %82 = arith.addf %80, %81 : vector<8x8xf32>
    %83 = vector.extract_strided_slice %34 {offsets = [8, 16], sizes = [8, 8], strides = [1, 1]} : vector<16x32xf32> to vector<8x8xf32>
    %84 = arith.truncf %83 : vector<8x8xf32> to vector<8x8xbf16>
    %85 = vector.extract_strided_slice %35 {offsets = [8, 16], sizes = [8, 8], strides = [1, 1]} : vector<16x32xf32> to vector<8x8xf32>
    %86 = arith.truncf %85 : vector<8x8xf32> to vector<8x8xbf16>
    %cst_25 = arith.constant dense<0.000000e+00> : vector<8x8xf32>
    %87 = tpu.matmul %84, %86, %cst_25 {dimension_numbers = #tpu.dot_dimension_numbers<[1], [1], [0], [0], [0, 0, 1, 0], [], []>} : vector<8x8xbf16>, vector<8x8xbf16>, vector<8x8xf32> -> vector<8x8xf32>
    %88 = vector.broadcast %68 : vector<1x8xf32> to vector<8x8xf32>
    %89 = arith.addf %87, %88 : vector<8x8xf32>
    %90 = vector.extract_strided_slice %34 {offsets = [8, 24], sizes = [8, 8], strides = [1, 1]} : vector<16x32xf32> to vector<8x8xf32>
    %91 = arith.truncf %90 : vector<8x8xf32> to vector<8x8xbf16>
    %92 = vector.extract_strided_slice %35 {offsets = [8, 24], sizes = [8, 8], strides = [1, 1]} : vector<16x32xf32> to vector<8x8xf32>
    %93 = arith.truncf %92 : vector<8x8xf32> to vector<8x8xbf16>
    %cst_26 = arith.constant dense<0.000000e+00> : vector<8x8xf32>
    %94 = tpu.matmul %91, %93, %cst_26 {dimension_numbers = #tpu.dot_dimension_numbers<[1], [1], [0], [0], [0, 0, 1, 0], [], []>} : vector<8x8xbf16>, vector<8x8xbf16>, vector<8x8xf32> -> vector<8x8xf32>
    %95 = vector.broadcast %68 : vector<1x8xf32> to vector<8x8xf32>
    %96 = arith.addf %94, %95 : vector<8x8xf32>
    %97 = tpu.concatenate %45, %52, %59, %66, %75, %82, %89, %96 in 0 : vector<8x8xf32>, vector<8x8xf32>, vector<8x8xf32>, vector<8x8xf32>, vector<8x8xf32>, vector<8x8xf32>, vector<8x8xf32>, vector<8x8xf32> -> vector<64x8xf32>
    %cst_27 = arith.constant dense<0xFF800000> : vector<64xf32>
    %98 = vector.multi_reduction <maximumf>, %97, %cst_27 [1] : vector<64x8xf32> to vector<64xf32>
    %99 = vector.shape_cast %98 : vector<64xf32> to vector<64x1xf32>
    %100 = vector.broadcast %99 : vector<64x1xf32> to vector<64x8xf32>
    %101 = arith.subf %97, %100 : vector<64x8xf32>
    %102 = math.exp %101 : vector<64x8xf32>
    %cst_28 = arith.constant dense<0.000000e+00> : vector<64xf32>
    %103 = vector.multi_reduction <add>, %102, %cst_28 [1] : vector<64x8xf32> to vector<64xf32>
    %104 = vector.shape_cast %103 : vector<64xf32> to vector<64x1xf32>
    %105 = tpu.reciprocal %104 {approx = true} : vector<64x1xf32> -> vector<64x1xf32>
    %106 = vector.broadcast %105 : vector<64x1xf32> to vector<64x8xf32>
    %107 = arith.mulf %102, %106 : vector<64x8xf32>
    %108 = vector.extract_strided_slice %107 {offsets = [0, 0], sizes = [8, 8], strides = [1, 1]} : vector<64x8xf32> to vector<8x8xf32>
    %109 = arith.truncf %108 : vector<8x8xf32> to vector<8x8xbf16>
    %110 = vector.extract_strided_slice %36 {offsets = [0, 0], sizes = [8, 8], strides = [1, 1]} : vector<16x32xf32> to vector<8x8xf32>
    %111 = arith.truncf %110 : vector<8x8xf32> to vector<8x8xbf16>
    %cst_29 = arith.constant dense<0.000000e+00> : vector<8x8xf32>
    %112 = tpu.matmul %109, %111, %cst_29 {dimension_numbers = #tpu.dot_dimension_numbers<[1], [0], [0], [1], [0, 0, 1, 1], [], []>} : vector<8x8xbf16>, vector<8x8xbf16>, vector<8x8xf32> -> vector<8x8xf32>
    %113 = vector.extract_strided_slice %107 {offsets = [8, 0], sizes = [8, 8], strides = [1, 1]} : vector<64x8xf32> to vector<8x8xf32>
    %114 = arith.truncf %113 : vector<8x8xf32> to vector<8x8xbf16>
    %115 = vector.extract_strided_slice %36 {offsets = [0, 8], sizes = [8, 8], strides = [1, 1]} : vector<16x32xf32> to vector<8x8xf32>
    %116 = arith.truncf %115 : vector<8x8xf32> to vector<8x8xbf16>
    %cst_30 = arith.constant dense<0.000000e+00> : vector<8x8xf32>
    %117 = tpu.matmul %114, %116, %cst_30 {dimension_numbers = #tpu.dot_dimension_numbers<[1], [0], [0], [1], [0, 0, 1, 1], [], []>} : vector<8x8xbf16>, vector<8x8xbf16>, vector<8x8xf32> -> vector<8x8xf32>
    %118 = vector.extract_strided_slice %107 {offsets = [16, 0], sizes = [8, 8], strides = [1, 1]} : vector<64x8xf32> to vector<8x8xf32>
    %119 = arith.truncf %118 : vector<8x8xf32> to vector<8x8xbf16>
    %120 = vector.extract_strided_slice %36 {offsets = [0, 16], sizes = [8, 8], strides = [1, 1]} : vector<16x32xf32> to vector<8x8xf32>
    %121 = arith.truncf %120 : vector<8x8xf32> to vector<8x8xbf16>
    %cst_31 = arith.constant dense<0.000000e+00> : vector<8x8xf32>
    %122 = tpu.matmul %119, %121, %cst_31 {dimension_numbers = #tpu.dot_dimension_numbers<[1], [0], [0], [1], [0, 0, 1, 1], [], []>} : vector<8x8xbf16>, vector<8x8xbf16>, vector<8x8xf32> -> vector<8x8xf32>
    %123 = vector.extract_strided_slice %107 {offsets = [24, 0], sizes = [8, 8], strides = [1, 1]} : vector<64x8xf32> to vector<8x8xf32>
    %124 = arith.truncf %123 : vector<8x8xf32> to vector<8x8xbf16>
    %125 = vector.extract_strided_slice %36 {offsets = [0, 24], sizes = [8, 8], strides = [1, 1]} : vector<16x32xf32> to vector<8x8xf32>
    %126 = arith.truncf %125 : vector<8x8xf32> to vector<8x8xbf16>
    %cst_32 = arith.constant dense<0.000000e+00> : vector<8x8xf32>
    %127 = tpu.matmul %124, %126, %cst_32 {dimension_numbers = #tpu.dot_dimension_numbers<[1], [0], [0], [1], [0, 0, 1, 1], [], []>} : vector<8x8xbf16>, vector<8x8xbf16>, vector<8x8xf32> -> vector<8x8xf32>
    %128 = tpu.concatenate %112, %117, %122, %127 in 1 : vector<8x8xf32>, vector<8x8xf32>, vector<8x8xf32>, vector<8x8xf32> -> vector<8x32xf32>
    %129 = vector.extract_strided_slice %107 {offsets = [32, 0], sizes = [8, 8], strides = [1, 1]} : vector<64x8xf32> to vector<8x8xf32>
    %130 = arith.truncf %129 : vector<8x8xf32> to vector<8x8xbf16>
    %131 = vector.extract_strided_slice %36 {offsets = [8, 0], sizes = [8, 8], strides = [1, 1]} : vector<16x32xf32> to vector<8x8xf32>
    %132 = arith.truncf %131 : vector<8x8xf32> to vector<8x8xbf16>
    %cst_33 = arith.constant dense<0.000000e+00> : vector<8x8xf32>
    %133 = tpu.matmul %130, %132, %cst_33 {dimension_numbers = #tpu.dot_dimension_numbers<[1], [0], [0], [1], [0, 0, 1, 1], [], []>} : vector<8x8xbf16>, vector<8x8xbf16>, vector<8x8xf32> -> vector<8x8xf32>
    %134 = vector.extract_strided_slice %107 {offsets = [40, 0], sizes = [8, 8], strides = [1, 1]} : vector<64x8xf32> to vector<8x8xf32>
    %135 = arith.truncf %134 : vector<8x8xf32> to vector<8x8xbf16>
    %136 = vector.extract_strided_slice %36 {offsets = [8, 8], sizes = [8, 8], strides = [1, 1]} : vector<16x32xf32> to vector<8x8xf32>
    %137 = arith.truncf %136 : vector<8x8xf32> to vector<8x8xbf16>
    %cst_34 = arith.constant dense<0.000000e+00> : vector<8x8xf32>
    %138 = tpu.matmul %135, %137, %cst_34 {dimension_numbers = #tpu.dot_dimension_numbers<[1], [0], [0], [1], [0, 0, 1, 1], [], []>} : vector<8x8xbf16>, vector<8x8xbf16>, vector<8x8xf32> -> vector<8x8xf32>
    %139 = vector.extract_strided_slice %107 {offsets = [48, 0], sizes = [8, 8], strides = [1, 1]} : vector<64x8xf32> to vector<8x8xf32>
    %140 = arith.truncf %139 : vector<8x8xf32> to vector<8x8xbf16>
    %141 = vector.extract_strided_slice %36 {offsets = [8, 16], sizes = [8, 8], strides = [1, 1]} : vector<16x32xf32> to vector<8x8xf32>
    %142 = arith.truncf %141 : vector<8x8xf32> to vector<8x8xbf16>
    %cst_35 = arith.constant dense<0.000000e+00> : vector<8x8xf32>
    %143 = tpu.matmul %140, %142, %cst_35 {dimension_numbers = #tpu.dot_dimension_numbers<[1], [0], [0], [1], [0, 0, 1, 1], [], []>} : vector<8x8xbf16>, vector<8x8xbf16>, vector<8x8xf32> -> vector<8x8xf32>
    %144 = vector.extract_strided_slice %107 {offsets = [56, 0], sizes = [8, 8], strides = [1, 1]} : vector<64x8xf32> to vector<8x8xf32>
    %145 = arith.truncf %144 : vector<8x8xf32> to vector<8x8xbf16>
    %146 = vector.extract_strided_slice %36 {offsets = [8, 24], sizes = [8, 8], strides = [1, 1]} : vector<16x32xf32> to vector<8x8xf32>
    %147 = arith.truncf %146 : vector<8x8xf32> to vector<8x8xbf16>
    %cst_36 = arith.constant dense<0.000000e+00> : vector<8x8xf32>
    %148 = tpu.matmul %145, %147, %cst_36 {dimension_numbers = #tpu.dot_dimension_numbers<[1], [0], [0], [1], [0, 0, 1, 1], [], []>} : vector<8x8xbf16>, vector<8x8xbf16>, vector<8x8xf32> -> vector<8x8xf32>
    %149 = tpu.concatenate %133, %138, %143, %148 in 1 : vector<8x8xf32>, vector<8x8xf32>, vector<8x8xf32>, vector<8x8xf32> -> vector<8x32xf32>
    %150 = tpu.concatenate %128, %149 in 0 : vector<8x32xf32>, vector<8x32xf32> -> vector<16x32xf32>
    %c0_37 = arith.constant 0 : index
    %c0_38 = arith.constant 0 : index
    %c0_39 = arith.constant 0 : index
    %151 = vector.load %arg7[%c0_37, %c0_38, %c0_39] : memref<2x32x32xbf16, #tpu.memory_space<vmem>>, vector<1x32x32xbf16>
    %152 = vector.shape_cast %151 : vector<1x32x32xbf16> to vector<32x32xbf16>
    %153 = arith.truncf %150 : vector<16x32xf32> to vector<16x32xbf16>
    %cst_40 = arith.constant dense<0.000000e+00> : vector<16x32xf32>
    %154 = tpu.matmul %153, %152, %cst_40 {dimension_numbers = #tpu.dot_dimension_numbers<[1], [0], [0], [1], [0, 0, 1, 1], [], []>} : vector<16x32xbf16>, vector<32x32xbf16>, vector<16x32xf32> -> vector<16x32xf32>
    %c0_41 = arith.constant 0 : index
    %c0_42 = arith.constant 0 : index
    %c0_43 = arith.constant 0 : index
    %155 = vector.load %arg8[%c0_41, %c0_42, %c0_43] : memref<2x1x32xf32, #tpu.memory_space<vmem>>, vector<1x1x32xf32>
    %156 = vector.shape_cast %155 : vector<1x1x32xf32> to vector<1x32xf32>
    %157 = vector.broadcast %156 : vector<1x32xf32> to vector<16x32xf32>
    %158 = arith.addf %154, %157 : vector<16x32xf32>
    %159 = arith.addf %158, %24 : vector<16x32xf32>
    %c0_44 = arith.constant 0 : index
    %c0_45 = arith.constant 0 : index
    %c0_46 = arith.constant 0 : index
    %160 = vector.load %arg9[%c0_44, %c0_45, %c0_46] : memref<2x1x32xf32, #tpu.memory_space<vmem>>, vector<1x1x32xf32>
    %161 = vector.shape_cast %160 : vector<1x1x32xf32> to vector<1x32xf32>
    %c0_47 = arith.constant 0 : index
    %c0_48 = arith.constant 0 : index
    %c0_49 = arith.constant 0 : index
    %162 = vector.load %arg10[%c0_47, %c0_48, %c0_49] : memref<2x1x32xf32, #tpu.memory_space<vmem>>, vector<1x1x32xf32>
    %163 = vector.shape_cast %162 : vector<1x1x32xf32> to vector<1x32xf32>
    %cst_50 = arith.constant dense<0.000000e+00> : vector<16xf32>
    %164 = vector.multi_reduction <add>, %159, %cst_50 [1] : vector<16x32xf32> to vector<16xf32>
    %165 = vector.shape_cast %164 : vector<16xf32> to vector<16x1xf32>
    %cst_51 = arith.constant 3.200000e+01 : f32
    %166 = vector.broadcast %cst_51 : f32 to vector<16x1xf32>
    %167 = arith.divf %165, %166 : vector<16x1xf32>
    %168 = vector.broadcast %167 : vector<16x1xf32> to vector<16x32xf32>
    %169 = arith.subf %159, %168 : vector<16x32xf32>
    %170 = arith.mulf %169, %169 : vector<16x32xf32>
    %cst_52 = arith.constant dense<0.000000e+00> : vector<16xf32>
    %171 = vector.multi_reduction <add>, %170, %cst_52 [1] : vector<16x32xf32> to vector<16xf32>
    %172 = vector.shape_cast %171 : vector<16xf32> to vector<16x1xf32>
    %cst_53 = arith.constant 3.200000e+01 : f32
    %173 = vector.broadcast %cst_53 : f32 to vector<16x1xf32>
    %174 = arith.divf %172, %173 : vector<16x1xf32>
    %175 = vector.broadcast %167 : vector<16x1xf32> to vector<16x32xf32>
    %176 = arith.subf %159, %175 : vector<16x32xf32>
    %cst_54 = arith.constant 9.99999996E-13 : f32
    %177 = vector.broadcast %cst_54 : f32 to vector<16x1xf32>
    %178 = arith.addf %174, %177 : vector<16x1xf32>
    %179 = math.rsqrt %178 : vector<16x1xf32>
    %180 = vector.broadcast %179 : vector<16x1xf32> to vector<16x32xf32>
    %181 = arith.mulf %176, %180 : vector<16x32xf32>
    %182 = vector.broadcast %161 : vector<1x32xf32> to vector<16x32xf32>
    %183 = arith.mulf %181, %182 : vector<16x32xf32>
    %184 = vector.broadcast %163 : vector<1x32xf32> to vector<16x32xf32>
    %185 = arith.addf %183, %184 : vector<16x32xf32>
    %c0_55 = arith.constant 0 : index
    %c0_56 = arith.constant 0 : index
    %c0_57 = arith.constant 0 : index
    %186 = vector.load %arg11[%c0_55, %c0_56, %c0_57] : memref<2x32x64xbf16, #tpu.memory_space<vmem>>, vector<1x32x64xbf16>
    %187 = vector.shape_cast %186 : vector<1x32x64xbf16> to vector<32x64xbf16>
    %188 = arith.truncf %185 : vector<16x32xf32> to vector<16x32xbf16>
    %cst_58 = arith.constant dense<0.000000e+00> : vector<16x64xf32>
    %189 = tpu.matmul %188, %187, %cst_58 {dimension_numbers = #tpu.dot_dimension_numbers<[1], [0], [0], [1], [0, 0, 1, 1], [], []>} : vector<16x32xbf16>, vector<32x64xbf16>, vector<16x64xf32> -> vector<16x64xf32>
    %c0_59 = arith.constant 0 : index
    %c0_60 = arith.constant 0 : index
    %c0_61 = arith.constant 0 : index
    %190 = vector.load %arg12[%c0_59, %c0_60, %c0_61] : memref<2x1x64xf32, #tpu.memory_space<vmem>>, vector<1x1x64xf32>
    %191 = vector.shape_cast %190 : vector<1x1x64xf32> to vector<1x64xf32>
    %192 = vector.broadcast %191 : vector<1x64xf32> to vector<16x64xf32>
    %193 = arith.addf %189, %192 : vector<16x64xf32>
    %194 = arith.mulf %193, %193 : vector<16x64xf32>
    %195 = arith.mulf %193, %194 : vector<16x64xf32>
    %cst_62 = arith.constant 4.471500e-02 : f32
    %196 = vector.broadcast %cst_62 : f32 to vector<16x64xf32>
    %197 = arith.mulf %196, %195 : vector<16x64xf32>
    %198 = arith.addf %193, %197 : vector<16x64xf32>
    %cst_63 = arith.constant 0.797884583 : f32
    %199 = vector.broadcast %cst_63 : f32 to vector<16x64xf32>
    %200 = arith.mulf %199, %198 : vector<16x64xf32>
    %201 = math.tanh %200 : vector<16x64xf32>
    %cst_64 = arith.constant 1.000000e+00 : f32
    %202 = vector.broadcast %cst_64 : f32 to vector<16x64xf32>
    %203 = arith.addf %202, %201 : vector<16x64xf32>
    %cst_65 = arith.constant 5.000000e-01 : f32
    %204 = vector.broadcast %cst_65 : f32 to vector<16x64xf32>
    %205 = arith.mulf %204, %203 : vector<16x64xf32>
    %206 = arith.mulf %193, %205 : vector<16x64xf32>
    %c0_66 = arith.constant 0 : index
    %c0_67 = arith.constant 0 : index
    %c0_68 = arith.constant 0 : index
    %207 = vector.load %arg13[%c0_66, %c0_67, %c0_68] : memref<2x64x32xbf16, #tpu.memory_space<vmem>>, vector<1x64x32xbf16>
    %208 = vector.shape_cast %207 : vector<1x64x32xbf16> to vector<64x32xbf16>
    %209 = arith.truncf %206 : vector<16x64xf32> to vector<16x64xbf16>
    %cst_69 = arith.constant dense<0.000000e+00> : vector<16x32xf32>
    %210 = tpu.matmul %209, %208, %cst_69 {dimension_numbers = #tpu.dot_dimension_numbers<[1], [0], [0], [1], [0, 0, 1, 1], [], []>} : vector<16x64xbf16>, vector<64x32xbf16>, vector<16x32xf32> -> vector<16x32xf32>
    %c0_70 = arith.constant 0 : index
    %c0_71 = arith.constant 0 : index
    %c0_72 = arith.constant 0 : index
    %211 = vector.load %arg14[%c0_70, %c0_71, %c0_72] : memref<2x1x32xf32, #tpu.memory_space<vmem>>, vector<1x1x32xf32>
    %212 = vector.shape_cast %211 : vector<1x1x32xf32> to vector<1x32xf32>
    %213 = vector.broadcast %212 : vector<1x32xf32> to vector<16x32xf32>
    %214 = arith.addf %210, %213 : vector<16x32xf32>
    %215 = arith.addf %214, %185 : vector<16x32xf32>
    %c0_73 = arith.constant 0 : index
    %c0_74 = arith.constant 0 : index
    %c0_75 = arith.constant 0 : index
    %216 = vector.load %arg15[%c0_73, %c0_74, %c0_75] : memref<2x1x32xf32, #tpu.memory_space<vmem>>, vector<1x1x32xf32>
    %217 = vector.shape_cast %216 : vector<1x1x32xf32> to vector<1x32xf32>
    %c0_76 = arith.constant 0 : index
    %c0_77 = arith.constant 0 : index
    %c0_78 = arith.constant 0 : index
    %218 = vector.load %arg16[%c0_76, %c0_77, %c0_78] : memref<2x1x32xf32, #tpu.memory_space<vmem>>, vector<1x1x32xf32>
    %219 = vector.shape_cast %218 : vector<1x1x32xf32> to vector<1x32xf32>
    %cst_79 = arith.constant dense<0.000000e+00> : vector<16xf32>
    %220 = vector.multi_reduction <add>, %215, %cst_79 [1] : vector<16x32xf32> to vector<16xf32>
    %221 = vector.shape_cast %220 : vector<16xf32> to vector<16x1xf32>
    %cst_80 = arith.constant 3.200000e+01 : f32
    %222 = vector.broadcast %cst_80 : f32 to vector<16x1xf32>
    %223 = arith.divf %221, %222 : vector<16x1xf32>
    %224 = vector.broadcast %223 : vector<16x1xf32> to vector<16x32xf32>
    %225 = arith.subf %215, %224 : vector<16x32xf32>
    %226 = arith.mulf %225, %225 : vector<16x32xf32>
    %cst_81 = arith.constant dense<0.000000e+00> : vector<16xf32>
    %227 = vector.multi_reduction <add>, %226, %cst_81 [1] : vector<16x32xf32> to vector<16xf32>
    %228 = vector.shape_cast %227 : vector<16xf32> to vector<16x1xf32>
    %cst_82 = arith.constant 3.200000e+01 : f32
    %229 = vector.broadcast %cst_82 : f32 to vector<16x1xf32>
    %230 = arith.divf %228, %229 : vector<16x1xf32>
    %231 = vector.broadcast %223 : vector<16x1xf32> to vector<16x32xf32>
    %232 = arith.subf %215, %231 : vector<16x32xf32>
    %cst_83 = arith.constant 9.99999996E-13 : f32
    %233 = vector.broadcast %cst_83 : f32 to vector<16x1xf32>
    %234 = arith.addf %230, %233 : vector<16x1xf32>
    %235 = math.rsqrt %234 : vector<16x1xf32>
    %236 = vector.broadcast %235 : vector<16x1xf32> to vector<16x32xf32>
    %237 = arith.mulf %232, %236 : vector<16x32xf32>
    %238 = vector.broadcast %217 : vector<1x32xf32> to vector<16x32xf32>
    %239 = arith.mulf %237, %238 : vector<16x32xf32>
    %240 = vector.broadcast %219 : vector<1x32xf32> to vector<16x32xf32>
    %241 = arith.addf %239, %240 : vector<16x32xf32>
    %c1 = arith.constant 1 : index
    %c0_84 = arith.constant 0 : index
    %c0_85 = arith.constant 0 : index
    %242 = vector.load %arg5[%c1, %c0_84, %c0_85] : memref<2x32x96xbf16, #tpu.memory_space<vmem>>, vector<1x32x96xbf16>
    %243 = vector.shape_cast %242 : vector<1x32x96xbf16> to vector<32x96xbf16>
    %244 = arith.truncf %241 : vector<16x32xf32> to vector<16x32xbf16>
    %cst_86 = arith.constant dense<0.000000e+00> : vector<16x96xf32>
    %245 = tpu.matmul %244, %243, %cst_86 {dimension_numbers = #tpu.dot_dimension_numbers<[1], [0], [0], [1], [0, 0, 1, 1], [], []>} : vector<16x32xbf16>, vector<32x96xbf16>, vector<16x96xf32> -> vector<16x96xf32>
    %c1_87 = arith.constant 1 : index
    %c0_88 = arith.constant 0 : index
    %c0_89 = arith.constant 0 : index
    %246 = vector.load %arg6[%c1_87, %c0_88, %c0_89] : memref<2x1x96xf32, #tpu.memory_space<vmem>>, vector<1x1x96xf32>
    %247 = vector.shape_cast %246 : vector<1x1x96xf32> to vector<1x96xf32>
    %248 = vector.broadcast %247 : vector<1x96xf32> to vector<16x96xf32>
    %249 = arith.addf %245, %248 : vector<16x96xf32>
    %250 = vector.extract_strided_slice %249 {offsets = [0, 0], sizes = [16, 32], strides = [1, 1]} : vector<16x96xf32> to vector<16x32xf32>
    %251 = vector.extract_strided_slice %249 {offsets = [0, 32], sizes = [16, 32], strides = [1, 1]} : vector<16x96xf32> to vector<16x32xf32>
    %252 = vector.extract_strided_slice %249 {offsets = [0, 64], sizes = [16, 32], strides = [1, 1]} : vector<16x96xf32> to vector<16x32xf32>
    %253 = vector.extract_strided_slice %25 {offsets = [0, 0, 0], sizes = [1, 1, 8], strides = [1, 1, 1]} : vector<2x1x8xf32> to vector<1x1x8xf32>
    %254 = vector.shape_cast %253 : vector<1x1x8xf32> to vector<1x8xf32>
    %255 = vector.extract_strided_slice %250 {offsets = [0, 0], sizes = [8, 8], strides = [1, 1]} : vector<16x32xf32> to vector<8x8xf32>
    %256 = arith.truncf %255 : vector<8x8xf32> to vector<8x8xbf16>
    %257 = vector.extract_strided_slice %251 {offsets = [0, 0], sizes = [8, 8], strides = [1, 1]} : vector<16x32xf32> to vector<8x8xf32>
    %258 = arith.truncf %257 : vector<8x8xf32> to vector<8x8xbf16>
    %cst_90 = arith.constant dense<0.000000e+00> : vector<8x8xf32>
    %259 = tpu.matmul %256, %258, %cst_90 {dimension_numbers = #tpu.dot_dimension_numbers<[1], [1], [0], [0], [0, 0, 1, 0], [], []>} : vector<8x8xbf16>, vector<8x8xbf16>, vector<8x8xf32> -> vector<8x8xf32>
    %260 = vector.broadcast %254 : vector<1x8xf32> to vector<8x8xf32>
    %261 = arith.addf %259, %260 : vector<8x8xf32>
    %262 = vector.extract_strided_slice %250 {offsets = [0, 8], sizes = [8, 8], strides = [1, 1]} : vector<16x32xf32> to vector<8x8xf32>
    %263 = arith.truncf %262 : vector<8x8xf32> to vector<8x8xbf16>
    %264 = vector.extract_strided_slice %251 {offsets = [0, 8], sizes = [8, 8], strides = [1, 1]} : vector<16x32xf32> to vector<8x8xf32>
    %265 = arith.truncf %264 : vector<8x8xf32> to vector<8x8xbf16>
    %cst_91 = arith.constant dense<0.000000e+00> : vector<8x8xf32>
    %266 = tpu.matmul %263, %265, %cst_91 {dimension_numbers = #tpu.dot_dimension_numbers<[1], [1], [0], [0], [0, 0, 1, 0], [], []>} : vector<8x8xbf16>, vector<8x8xbf16>, vector<8x8xf32> -> vector<8x8xf32>
    %267 = vector.broadcast %254 : vector<1x8xf32> to vector<8x8xf32>
    %268 = arith.addf %266, %267 : vector<8x8xf32>
    %269 = vector.extract_strided_slice %250 {offsets = [0, 16], sizes = [8, 8], strides = [1, 1]} : vector<16x32xf32> to vector<8x8xf32>
    %270 = arith.truncf %269 : vector<8x8xf32> to vector<8x8xbf16>
    %271 = vector.extract_strided_slice %251 {offsets = [0, 16], sizes = [8, 8], strides = [1, 1]} : vector<16x32xf32> to vector<8x8xf32>
    %272 = arith.truncf %271 : vector<8x8xf32> to vector<8x8xbf16>
    %cst_92 = arith.constant dense<0.000000e+00> : vector<8x8xf32>
    %273 = tpu.matmul %270, %272, %cst_92 {dimension_numbers = #tpu.dot_dimension_numbers<[1], [1], [0], [0], [0, 0, 1, 0], [], []>} : vector<8x8xbf16>, vector<8x8xbf16>, vector<8x8xf32> -> vector<8x8xf32>
    %274 = vector.broadcast %254 : vector<1x8xf32> to vector<8x8xf32>
    %275 = arith.addf %273, %274 : vector<8x8xf32>
    %276 = vector.extract_strided_slice %250 {offsets = [0, 24], sizes = [8, 8], strides = [1, 1]} : vector<16x32xf32> to vector<8x8xf32>
    %277 = arith.truncf %276 : vector<8x8xf32> to vector<8x8xbf16>
    %278 = vector.extract_strided_slice %251 {offsets = [0, 24], sizes = [8, 8], strides = [1, 1]} : vector<16x32xf32> to vector<8x8xf32>
    %279 = arith.truncf %278 : vector<8x8xf32> to vector<8x8xbf16>
    %cst_93 = arith.constant dense<0.000000e+00> : vector<8x8xf32>
    %280 = tpu.matmul %277, %279, %cst_93 {dimension_numbers = #tpu.dot_dimension_numbers<[1], [1], [0], [0], [0, 0, 1, 0], [], []>} : vector<8x8xbf16>, vector<8x8xbf16>, vector<8x8xf32> -> vector<8x8xf32>
    %281 = vector.broadcast %254 : vector<1x8xf32> to vector<8x8xf32>
    %282 = arith.addf %280, %281 : vector<8x8xf32>
    %283 = vector.extract_strided_slice %25 {offsets = [1, 0, 0], sizes = [1, 1, 8], strides = [1, 1, 1]} : vector<2x1x8xf32> to vector<1x1x8xf32>
    %284 = vector.shape_cast %283 : vector<1x1x8xf32> to vector<1x8xf32>
    %285 = vector.extract_strided_slice %250 {offsets = [8, 0], sizes = [8, 8], strides = [1, 1]} : vector<16x32xf32> to vector<8x8xf32>
    %286 = arith.truncf %285 : vector<8x8xf32> to vector<8x8xbf16>
    %287 = vector.extract_strided_slice %251 {offsets = [8, 0], sizes = [8, 8], strides = [1, 1]} : vector<16x32xf32> to vector<8x8xf32>
    %288 = arith.truncf %287 : vector<8x8xf32> to vector<8x8xbf16>
    %cst_94 = arith.constant dense<0.000000e+00> : vector<8x8xf32>
    %289 = tpu.matmul %286, %288, %cst_94 {dimension_numbers = #tpu.dot_dimension_numbers<[1], [1], [0], [0], [0, 0, 1, 0], [], []>} : vector<8x8xbf16>, vector<8x8xbf16>, vector<8x8xf32> -> vector<8x8xf32>
    %290 = vector.broadcast %284 : vector<1x8xf32> to vector<8x8xf32>
    %291 = arith.addf %289, %290 : vector<8x8xf32>
    %292 = vector.extract_strided_slice %250 {offsets = [8, 8], sizes = [8, 8], strides = [1, 1]} : vector<16x32xf32> to vector<8x8xf32>
    %293 = arith.truncf %292 : vector<8x8xf32> to vector<8x8xbf16>
    %294 = vector.extract_strided_slice %251 {offsets = [8, 8], sizes = [8, 8], strides = [1, 1]} : vector<16x32xf32> to vector<8x8xf32>
    %295 = arith.truncf %294 : vector<8x8xf32> to vector<8x8xbf16>
    %cst_95 = arith.constant dense<0.000000e+00> : vector<8x8xf32>
    %296 = tpu.matmul %293, %295, %cst_95 {dimension_numbers = #tpu.dot_dimension_numbers<[1], [1], [0], [0], [0, 0, 1, 0], [], []>} : vector<8x8xbf16>, vector<8x8xbf16>, vector<8x8xf32> -> vector<8x8xf32>
    %297 = vector.broadcast %284 : vector<1x8xf32> to vector<8x8xf32>
    %298 = arith.addf %296, %297 : vector<8x8xf32>
    %299 = vector.extract_strided_slice %250 {offsets = [8, 16], sizes = [8, 8], strides = [1, 1]} : vector<16x32xf32> to vector<8x8xf32>
    %300 = arith.truncf %299 : vector<8x8xf32> to vector<8x8xbf16>
    %301 = vector.extract_strided_slice %251 {offsets = [8, 16], sizes = [8, 8], strides = [1, 1]} : vector<16x32xf32> to vector<8x8xf32>
    %302 = arith.truncf %301 : vector<8x8xf32> to vector<8x8xbf16>
    %cst_96 = arith.constant dense<0.000000e+00> : vector<8x8xf32>
    %303 = tpu.matmul %300, %302, %cst_96 {dimension_numbers = #tpu.dot_dimension_numbers<[1], [1], [0], [0], [0, 0, 1, 0], [], []>} : vector<8x8xbf16>, vector<8x8xbf16>, vector<8x8xf32> -> vector<8x8xf32>
    %304 = vector.broadcast %284 : vector<1x8xf32> to vector<8x8xf32>
    %305 = arith.addf %303, %304 : vector<8x8xf32>
    %306 = vector.extract_strided_slice %250 {offsets = [8, 24], sizes = [8, 8], strides = [1, 1]} : vector<16x32xf32> to vector<8x8xf32>
    %307 = arith.truncf %306 : vector<8x8xf32> to vector<8x8xbf16>
    %308 = vector.extract_strided_slice %251 {offsets = [8, 24], sizes = [8, 8], strides = [1, 1]} : vector<16x32xf32> to vector<8x8xf32>
    %309 = arith.truncf %308 : vector<8x8xf32> to vector<8x8xbf16>
    %cst_97 = arith.constant dense<0.000000e+00> : vector<8x8xf32>
    %310 = tpu.matmul %307, %309, %cst_97 {dimension_numbers = #tpu.dot_dimension_numbers<[1], [1], [0], [0], [0, 0, 1, 0], [], []>} : vector<8x8xbf16>, vector<8x8xbf16>, vector<8x8xf32> -> vector<8x8xf32>
    %311 = vector.broadcast %284 : vector<1x8xf32> to vector<8x8xf32>
    %312 = arith.addf %310, %311 : vector<8x8xf32>
    %313 = tpu.concatenate %261, %268, %275, %282, %291, %298, %305, %312 in 0 : vector<8x8xf32>, vector<8x8xf32>, vector<8x8xf32>, vector<8x8xf32>, vector<8x8xf32>, vector<8x8xf32>, vector<8x8xf32>, vector<8x8xf32> -> vector<64x8xf32>
    %cst_98 = arith.constant dense<0xFF800000> : vector<64xf32>
    %314 = vector.multi_reduction <maximumf>, %313, %cst_98 [1] : vector<64x8xf32> to vector<64xf32>
    %315 = vector.shape_cast %314 : vector<64xf32> to vector<64x1xf32>
    %316 = vector.broadcast %315 : vector<64x1xf32> to vector<64x8xf32>
    %317 = arith.subf %313, %316 : vector<64x8xf32>
    %318 = math.exp %317 : vector<64x8xf32>
    %cst_99 = arith.constant dense<0.000000e+00> : vector<64xf32>
    %319 = vector.multi_reduction <add>, %318, %cst_99 [1] : vector<64x8xf32> to vector<64xf32>
    %320 = vector.shape_cast %319 : vector<64xf32> to vector<64x1xf32>
    %321 = tpu.reciprocal %320 {approx = true} : vector<64x1xf32> -> vector<64x1xf32>
    %322 = vector.broadcast %321 : vector<64x1xf32> to vector<64x8xf32>
    %323 = arith.mulf %318, %322 : vector<64x8xf32>
    %324 = vector.extract_strided_slice %323 {offsets = [0, 0], sizes = [8, 8], strides = [1, 1]} : vector<64x8xf32> to vector<8x8xf32>
    %325 = arith.truncf %324 : vector<8x8xf32> to vector<8x8xbf16>
    %326 = vector.extract_strided_slice %252 {offsets = [0, 0], sizes = [8, 8], strides = [1, 1]} : vector<16x32xf32> to vector<8x8xf32>
    %327 = arith.truncf %326 : vector<8x8xf32> to vector<8x8xbf16>
    %cst_100 = arith.constant dense<0.000000e+00> : vector<8x8xf32>
    %328 = tpu.matmul %325, %327, %cst_100 {dimension_numbers = #tpu.dot_dimension_numbers<[1], [0], [0], [1], [0, 0, 1, 1], [], []>} : vector<8x8xbf16>, vector<8x8xbf16>, vector<8x8xf32> -> vector<8x8xf32>
    %329 = vector.extract_strided_slice %323 {offsets = [8, 0], sizes = [8, 8], strides = [1, 1]} : vector<64x8xf32> to vector<8x8xf32>
    %330 = arith.truncf %329 : vector<8x8xf32> to vector<8x8xbf16>
    %331 = vector.extract_strided_slice %252 {offsets = [0, 8], sizes = [8, 8], strides = [1, 1]} : vector<16x32xf32> to vector<8x8xf32>
    %332 = arith.truncf %331 : vector<8x8xf32> to vector<8x8xbf16>
    %cst_101 = arith.constant dense<0.000000e+00> : vector<8x8xf32>
    %333 = tpu.matmul %330, %332, %cst_101 {dimension_numbers = #tpu.dot_dimension_numbers<[1], [0], [0], [1], [0, 0, 1, 1], [], []>} : vector<8x8xbf16>, vector<8x8xbf16>, vector<8x8xf32> -> vector<8x8xf32>
    %334 = vector.extract_strided_slice %323 {offsets = [16, 0], sizes = [8, 8], strides = [1, 1]} : vector<64x8xf32> to vector<8x8xf32>
    %335 = arith.truncf %334 : vector<8x8xf32> to vector<8x8xbf16>
    %336 = vector.extract_strided_slice %252 {offsets = [0, 16], sizes = [8, 8], strides = [1, 1]} : vector<16x32xf32> to vector<8x8xf32>
    %337 = arith.truncf %336 : vector<8x8xf32> to vector<8x8xbf16>
    %cst_102 = arith.constant dense<0.000000e+00> : vector<8x8xf32>
    %338 = tpu.matmul %335, %337, %cst_102 {dimension_numbers = #tpu.dot_dimension_numbers<[1], [0], [0], [1], [0, 0, 1, 1], [], []>} : vector<8x8xbf16>, vector<8x8xbf16>, vector<8x8xf32> -> vector<8x8xf32>
    %339 = vector.extract_strided_slice %323 {offsets = [24, 0], sizes = [8, 8], strides = [1, 1]} : vector<64x8xf32> to vector<8x8xf32>
    %340 = arith.truncf %339 : vector<8x8xf32> to vector<8x8xbf16>
    %341 = vector.extract_strided_slice %252 {offsets = [0, 24], sizes = [8, 8], strides = [1, 1]} : vector<16x32xf32> to vector<8x8xf32>
    %342 = arith.truncf %341 : vector<8x8xf32> to vector<8x8xbf16>
    %cst_103 = arith.constant dense<0.000000e+00> : vector<8x8xf32>
    %343 = tpu.matmul %340, %342, %cst_103 {dimension_numbers = #tpu.dot_dimension_numbers<[1], [0], [0], [1], [0, 0, 1, 1], [], []>} : vector<8x8xbf16>, vector<8x8xbf16>, vector<8x8xf32> -> vector<8x8xf32>
    %344 = tpu.concatenate %328, %333, %338, %343 in 1 : vector<8x8xf32>, vector<8x8xf32>, vector<8x8xf32>, vector<8x8xf32> -> vector<8x32xf32>
    %345 = vector.extract_strided_slice %323 {offsets = [32, 0], sizes = [8, 8], strides = [1, 1]} : vector<64x8xf32> to vector<8x8xf32>
    %346 = arith.truncf %345 : vector<8x8xf32> to vector<8x8xbf16>
    %347 = vector.extract_strided_slice %252 {offsets = [8, 0], sizes = [8, 8], strides = [1, 1]} : vector<16x32xf32> to vector<8x8xf32>
    %348 = arith.truncf %347 : vector<8x8xf32> to vector<8x8xbf16>
    %cst_104 = arith.constant dense<0.000000e+00> : vector<8x8xf32>
    %349 = tpu.matmul %346, %348, %cst_104 {dimension_numbers = #tpu.dot_dimension_numbers<[1], [0], [0], [1], [0, 0, 1, 1], [], []>} : vector<8x8xbf16>, vector<8x8xbf16>, vector<8x8xf32> -> vector<8x8xf32>
    %350 = vector.extract_strided_slice %323 {offsets = [40, 0], sizes = [8, 8], strides = [1, 1]} : vector<64x8xf32> to vector<8x8xf32>
    %351 = arith.truncf %350 : vector<8x8xf32> to vector<8x8xbf16>
    %352 = vector.extract_strided_slice %252 {offsets = [8, 8], sizes = [8, 8], strides = [1, 1]} : vector<16x32xf32> to vector<8x8xf32>
    %353 = arith.truncf %352 : vector<8x8xf32> to vector<8x8xbf16>
    %cst_105 = arith.constant dense<0.000000e+00> : vector<8x8xf32>
    %354 = tpu.matmul %351, %353, %cst_105 {dimension_numbers = #tpu.dot_dimension_numbers<[1], [0], [0], [1], [0, 0, 1, 1], [], []>} : vector<8x8xbf16>, vector<8x8xbf16>, vector<8x8xf32> -> vector<8x8xf32>
    %355 = vector.extract_strided_slice %323 {offsets = [48, 0], sizes = [8, 8], strides = [1, 1]} : vector<64x8xf32> to vector<8x8xf32>
    %356 = arith.truncf %355 : vector<8x8xf32> to vector<8x8xbf16>
    %357 = vector.extract_strided_slice %252 {offsets = [8, 16], sizes = [8, 8], strides = [1, 1]} : vector<16x32xf32> to vector<8x8xf32>
    %358 = arith.truncf %357 : vector<8x8xf32> to vector<8x8xbf16>
    %cst_106 = arith.constant dense<0.000000e+00> : vector<8x8xf32>
    %359 = tpu.matmul %356, %358, %cst_106 {dimension_numbers = #tpu.dot_dimension_numbers<[1], [0], [0], [1], [0, 0, 1, 1], [], []>} : vector<8x8xbf16>, vector<8x8xbf16>, vector<8x8xf32> -> vector<8x8xf32>
    %360 = vector.extract_strided_slice %323 {offsets = [56, 0], sizes = [8, 8], strides = [1, 1]} : vector<64x8xf32> to vector<8x8xf32>
    %361 = arith.truncf %360 : vector<8x8xf32> to vector<8x8xbf16>
    %362 = vector.extract_strided_slice %252 {offsets = [8, 24], sizes = [8, 8], strides = [1, 1]} : vector<16x32xf32> to vector<8x8xf32>
    %363 = arith.truncf %362 : vector<8x8xf32> to vector<8x8xbf16>
    %cst_107 = arith.constant dense<0.000000e+00> : vector<8x8xf32>
    %364 = tpu.matmul %361, %363, %cst_107 {dimension_numbers = #tpu.dot_dimension_numbers<[1], [0], [0], [1], [0, 0, 1, 1], [], []>} : vector<8x8xbf16>, vector<8x8xbf16>, vector<8x8xf32> -> vector<8x8xf32>
    %365 = tpu.concatenate %349, %354, %359, %364 in 1 : vector<8x8xf32>, vector<8x8xf32>, vector<8x8xf32>, vector<8x8xf32> -> vector<8x32xf32>
    %366 = tpu.concatenate %344, %365 in 0 : vector<8x32xf32>, vector<8x32xf32> -> vector<16x32xf32>
    %c1_108 = arith.constant 1 : index
    %c0_109 = arith.constant 0 : index
    %c0_110 = arith.constant 0 : index
    %367 = vector.load %arg7[%c1_108, %c0_109, %c0_110] : memref<2x32x32xbf16, #tpu.memory_space<vmem>>, vector<1x32x32xbf16>
    %368 = vector.shape_cast %367 : vector<1x32x32xbf16> to vector<32x32xbf16>
    %369 = arith.truncf %366 : vector<16x32xf32> to vector<16x32xbf16>
    %cst_111 = arith.constant dense<0.000000e+00> : vector<16x32xf32>
    %370 = tpu.matmul %369, %368, %cst_111 {dimension_numbers = #tpu.dot_dimension_numbers<[1], [0], [0], [1], [0, 0, 1, 1], [], []>} : vector<16x32xbf16>, vector<32x32xbf16>, vector<16x32xf32> -> vector<16x32xf32>
    %c1_112 = arith.constant 1 : index
    %c0_113 = arith.constant 0 : index
    %c0_114 = arith.constant 0 : index
    %371 = vector.load %arg8[%c1_112, %c0_113, %c0_114] : memref<2x1x32xf32, #tpu.memory_space<vmem>>, vector<1x1x32xf32>
    %372 = vector.shape_cast %371 : vector<1x1x32xf32> to vector<1x32xf32>
    %373 = vector.broadcast %372 : vector<1x32xf32> to vector<16x32xf32>
    %374 = arith.addf %370, %373 : vector<16x32xf32>
    %375 = arith.addf %374, %241 : vector<16x32xf32>
    %c1_115 = arith.constant 1 : index
    %c0_116 = arith.constant 0 : index
    %c0_117 = arith.constant 0 : index
    %376 = vector.load %arg9[%c1_115, %c0_116, %c0_117] : memref<2x1x32xf32, #tpu.memory_space<vmem>>, vector<1x1x32xf32>
    %377 = vector.shape_cast %376 : vector<1x1x32xf32> to vector<1x32xf32>
    %c1_118 = arith.constant 1 : index
    %c0_119 = arith.constant 0 : index
    %c0_120 = arith.constant 0 : index
    %378 = vector.load %arg10[%c1_118, %c0_119, %c0_120] : memref<2x1x32xf32, #tpu.memory_space<vmem>>, vector<1x1x32xf32>
    %379 = vector.shape_cast %378 : vector<1x1x32xf32> to vector<1x32xf32>
    %cst_121 = arith.constant dense<0.000000e+00> : vector<16xf32>
    %380 = vector.multi_reduction <add>, %375, %cst_121 [1] : vector<16x32xf32> to vector<16xf32>
    %381 = vector.shape_cast %380 : vector<16xf32> to vector<16x1xf32>
    %cst_122 = arith.constant 3.200000e+01 : f32
    %382 = vector.broadcast %cst_122 : f32 to vector<16x1xf32>
    %383 = arith.divf %381, %382 : vector<16x1xf32>
    %384 = vector.broadcast %383 : vector<16x1xf32> to vector<16x32xf32>
    %385 = arith.subf %375, %384 : vector<16x32xf32>
    %386 = arith.mulf %385, %385 : vector<16x32xf32>
    %cst_123 = arith.constant dense<0.000000e+00> : vector<16xf32>
    %387 = vector.multi_reduction <add>, %386, %cst_123 [1] : vector<16x32xf32> to vector<16xf32>
    %388 = vector.shape_cast %387 : vector<16xf32> to vector<16x1xf32>
    %cst_124 = arith.constant 3.200000e+01 : f32
    %389 = vector.broadcast %cst_124 : f32 to vector<16x1xf32>
    %390 = arith.divf %388, %389 : vector<16x1xf32>
    %391 = vector.broadcast %383 : vector<16x1xf32> to vector<16x32xf32>
    %392 = arith.subf %375, %391 : vector<16x32xf32>
    %cst_125 = arith.constant 9.99999996E-13 : f32
    %393 = vector.broadcast %cst_125 : f32 to vector<16x1xf32>
    %394 = arith.addf %390, %393 : vector<16x1xf32>
    %395 = math.rsqrt %394 : vector<16x1xf32>
    %396 = vector.broadcast %395 : vector<16x1xf32> to vector<16x32xf32>
    %397 = arith.mulf %392, %396 : vector<16x32xf32>
    %398 = vector.broadcast %377 : vector<1x32xf32> to vector<16x32xf32>
    %399 = arith.mulf %397, %398 : vector<16x32xf32>
    %400 = vector.broadcast %379 : vector<1x32xf32> to vector<16x32xf32>
    %401 = arith.addf %399, %400 : vector<16x32xf32>
    %c1_126 = arith.constant 1 : index
    %c0_127 = arith.constant 0 : index
    %c0_128 = arith.constant 0 : index
    %402 = vector.load %arg11[%c1_126, %c0_127, %c0_128] : memref<2x32x64xbf16, #tpu.memory_space<vmem>>, vector<1x32x64xbf16>
    %403 = vector.shape_cast %402 : vector<1x32x64xbf16> to vector<32x64xbf16>
    %404 = arith.truncf %401 : vector<16x32xf32> to vector<16x32xbf16>
    %cst_129 = arith.constant dense<0.000000e+00> : vector<16x64xf32>
    %405 = tpu.matmul %404, %403, %cst_129 {dimension_numbers = #tpu.dot_dimension_numbers<[1], [0], [0], [1], [0, 0, 1, 1], [], []>} : vector<16x32xbf16>, vector<32x64xbf16>, vector<16x64xf32> -> vector<16x64xf32>
    %c1_130 = arith.constant 1 : index
    %c0_131 = arith.constant 0 : index
    %c0_132 = arith.constant 0 : index
    %406 = vector.load %arg12[%c1_130, %c0_131, %c0_132] : memref<2x1x64xf32, #tpu.memory_space<vmem>>, vector<1x1x64xf32>
    %407 = vector.shape_cast %406 : vector<1x1x64xf32> to vector<1x64xf32>
    %408 = vector.broadcast %407 : vector<1x64xf32> to vector<16x64xf32>
    %409 = arith.addf %405, %408 : vector<16x64xf32>
    %410 = arith.mulf %409, %409 : vector<16x64xf32>
    %411 = arith.mulf %409, %410 : vector<16x64xf32>
    %cst_133 = arith.constant 4.471500e-02 : f32
    %412 = vector.broadcast %cst_133 : f32 to vector<16x64xf32>
    %413 = arith.mulf %412, %411 : vector<16x64xf32>
    %414 = arith.addf %409, %413 : vector<16x64xf32>
    %cst_134 = arith.constant 0.797884583 : f32
    %415 = vector.broadcast %cst_134 : f32 to vector<16x64xf32>
    %416 = arith.mulf %415, %414 : vector<16x64xf32>
    %417 = math.tanh %416 : vector<16x64xf32>
    %cst_135 = arith.constant 1.000000e+00 : f32
    %418 = vector.broadcast %cst_135 : f32 to vector<16x64xf32>
    %419 = arith.addf %418, %417 : vector<16x64xf32>
    %cst_136 = arith.constant 5.000000e-01 : f32
    %420 = vector.broadcast %cst_136 : f32 to vector<16x64xf32>
    %421 = arith.mulf %420, %419 : vector<16x64xf32>
    %422 = arith.mulf %409, %421 : vector<16x64xf32>
    %c1_137 = arith.constant 1 : index
    %c0_138 = arith.constant 0 : index
    %c0_139 = arith.constant 0 : index
    %423 = vector.load %arg13[%c1_137, %c0_138, %c0_139] : memref<2x64x32xbf16, #tpu.memory_space<vmem>>, vector<1x64x32xbf16>
    %424 = vector.shape_cast %423 : vector<1x64x32xbf16> to vector<64x32xbf16>
    %425 = arith.truncf %422 : vector<16x64xf32> to vector<16x64xbf16>
    %cst_140 = arith.constant dense<0.000000e+00> : vector<16x32xf32>
    %426 = tpu.matmul %425, %424, %cst_140 {dimension_numbers = #tpu.dot_dimension_numbers<[1], [0], [0], [1], [0, 0, 1, 1], [], []>} : vector<16x64xbf16>, vector<64x32xbf16>, vector<16x32xf32> -> vector<16x32xf32>
    %c1_141 = arith.constant 1 : index
    %c0_142 = arith.constant 0 : index
    %c0_143 = arith.constant 0 : index
    %427 = vector.load %arg14[%c1_141, %c0_142, %c0_143] : memref<2x1x32xf32, #tpu.memory_space<vmem>>, vector<1x1x32xf32>
    %428 = vector.shape_cast %427 : vector<1x1x32xf32> to vector<1x32xf32>
    %429 = vector.broadcast %428 : vector<1x32xf32> to vector<16x32xf32>
    %430 = arith.addf %426, %429 : vector<16x32xf32>
    %431 = arith.addf %430, %401 : vector<16x32xf32>
    %c1_144 = arith.constant 1 : index
    %c0_145 = arith.constant 0 : index
    %c0_146 = arith.constant 0 : index
    %432 = vector.load %arg15[%c1_144, %c0_145, %c0_146] : memref<2x1x32xf32, #tpu.memory_space<vmem>>, vector<1x1x32xf32>
    %433 = vector.shape_cast %432 : vector<1x1x32xf32> to vector<1x32xf32>
    %c1_147 = arith.constant 1 : index
    %c0_148 = arith.constant 0 : index
    %c0_149 = arith.constant 0 : index
    %434 = vector.load %arg16[%c1_147, %c0_148, %c0_149] : memref<2x1x32xf32, #tpu.memory_space<vmem>>, vector<1x1x32xf32>
    %435 = vector.shape_cast %434 : vector<1x1x32xf32> to vector<1x32xf32>
    %cst_150 = arith.constant dense<0.000000e+00> : vector<16xf32>
    %436 = vector.multi_reduction <add>, %431, %cst_150 [1] : vector<16x32xf32> to vector<16xf32>
    %437 = vector.shape_cast %436 : vector<16xf32> to vector<16x1xf32>
    %cst_151 = arith.constant 3.200000e+01 : f32
    %438 = vector.broadcast %cst_151 : f32 to vector<16x1xf32>
    %439 = arith.divf %437, %438 : vector<16x1xf32>
    %440 = vector.broadcast %439 : vector<16x1xf32> to vector<16x32xf32>
    %441 = arith.subf %431, %440 : vector<16x32xf32>
    %442 = arith.mulf %441, %441 : vector<16x32xf32>
    %cst_152 = arith.constant dense<0.000000e+00> : vector<16xf32>
    %443 = vector.multi_reduction <add>, %442, %cst_152 [1] : vector<16x32xf32> to vector<16xf32>
    %444 = vector.shape_cast %443 : vector<16xf32> to vector<16x1xf32>
    %cst_153 = arith.constant 3.200000e+01 : f32
    %445 = vector.broadcast %cst_153 : f32 to vector<16x1xf32>
    %446 = arith.divf %444, %445 : vector<16x1xf32>
    %447 = vector.broadcast %439 : vector<16x1xf32> to vector<16x32xf32>
    %448 = arith.subf %431, %447 : vector<16x32xf32>
    %cst_154 = arith.constant 9.99999996E-13 : f32
    %449 = vector.broadcast %cst_154 : f32 to vector<16x1xf32>
    %450 = arith.addf %446, %449 : vector<16x1xf32>
    %451 = math.rsqrt %450 : vector<16x1xf32>
    %452 = vector.broadcast %451 : vector<16x1xf32> to vector<16x32xf32>
    %453 = arith.mulf %448, %452 : vector<16x32xf32>
    %454 = vector.broadcast %433 : vector<1x32xf32> to vector<16x32xf32>
    %455 = arith.mulf %453, %454 : vector<16x32xf32>
    %456 = vector.broadcast %435 : vector<1x32xf32> to vector<16x32xf32>
    %457 = arith.addf %455, %456 : vector<16x32xf32>
    %458 = vector.extract_strided_slice %457 {offsets = [0, 0], sizes = [1, 32], strides = [1, 1]} : vector<16x32xf32> to vector<1x32xf32>
    %459 = vector.extract_strided_slice %457 {offsets = [8, 0], sizes = [1, 32], strides = [1, 1]} : vector<16x32xf32> to vector<1x32xf32>
    %460 = tpu.concatenate %458, %459 in 0 : vector<1x32xf32>, vector<1x32xf32> -> vector<2x32xf32>
    %c0_155 = arith.constant 0 : index
    %c0_156 = arith.constant 0 : index
    %461 = vector.load %arg17[%c0_155, %c0_156] : memref<32x32xbf16, #tpu.memory_space<vmem>>, vector<32x32xbf16>
    %462 = arith.truncf %460 : vector<2x32xf32> to vector<2x32xbf16>
    %cst_157 = arith.constant dense<0.000000e+00> : vector<2x32xf32>
    %463 = tpu.matmul %462, %461, %cst_157 {dimension_numbers = #tpu.dot_dimension_numbers<[1], [0], [0], [1], [0, 0, 1, 1], [], []>} : vector<2x32xbf16>, vector<32x32xbf16>, vector<2x32xf32> -> vector<2x32xf32>
    %c0_158 = arith.constant 0 : index
    %c0_159 = arith.constant 0 : index
    %464 = vector.load %arg18[%c0_158, %c0_159] : memref<1x32xf32, #tpu.memory_space<vmem>>, vector<1x32xf32>
    %465 = vector.broadcast %464 : vector<1x32xf32> to vector<2x32xf32>
    %466 = arith.addf %463, %465 : vector<2x32xf32>
    %467 = math.tanh %466 : vector<2x32xf32>
    %c0_160 = arith.constant 0 : index
    %c0_161 = arith.constant 0 : index
    %468 = vector.load %arg19[%c0_160, %c0_161] : memref<32x128xbf16, #tpu.memory_space<vmem>>, vector<32x128xbf16>
    %469 = arith.truncf %467 : vector<2x32xf32> to vector<2x32xbf16>
    %cst_162 = arith.constant dense<0.000000e+00> : vector<2x128xf32>
    %470 = tpu.matmul %469, %468, %cst_162 {dimension_numbers = #tpu.dot_dimension_numbers<[1], [0], [0], [1], [0, 0, 1, 1], [], []>} : vector<2x32xbf16>, vector<32x128xbf16>, vector<2x128xf32> -> vector<2x128xf32>
    %c0_163 = arith.constant 0 : index
    %c0_164 = arith.constant 0 : index
    %471 = vector.load %arg20[%c0_163, %c0_164] : memref<1x128xf32, #tpu.memory_space<vmem>>, vector<1x128xf32>
    %472 = vector.broadcast %471 : vector<1x128xf32> to vector<2x128xf32>
    %473 = arith.addf %470, %472 : vector<2x128xf32>
    %474 = vector.shape_cast %473 : vector<2x128xf32> to vector<2x1x128xf32>
    %c0_165 = arith.constant 0 : index
    %c0_166 = arith.constant 0 : index
    %c0_167 = arith.constant 0 : index
    %475 = vector.load %arg21[%c0_165, %c0_166, %c0_167] : memref<2x1x128xf32, #tpu.memory_space<vmem>>, vector<2x1x128xf32>
    tpu.vector_store %arg21[%c0_165, %c0_166, %c0_167], %474 {strides = array<i32>} : memref<2x1x128xf32, #tpu.memory_space<vmem>>, vector<2x1x128xf32>,
    return
  }
  func.func @transform_0(%arg0: i32) -> (i32, i32) {
    %c0_i32 = arith.constant 0 : i32
    %c0_i32_0 = arith.constant 0 : i32
    return %arg0, %c0_i32 : i32, i32
  }
  func.func @transform_1(%arg0: i32) -> (i32, i32, i32) {
    %c0_i32 = arith.constant 0 : i32
    %c0_i32_0 = arith.constant 0 : i32
    %c0_i32_1 = arith.constant 0 : i32
    return %arg0, %c0_i32, %c0_i32_0 : i32, i32, i32
  }
  func.func @transform_2(%arg0: i32) -> (i32, i32) {
    %c0_i32 = arith.constant 0 : i32
    %c0_i32_0 = arith.constant 0 : i32
    %c0_i32_1 = arith.constant 0 : i32
    return %c0_i32, %c0_i32_0 : i32, i32
  }
  func.func @transform_3(%arg0: i32) -> (i32, i32) {
    %c0_i32 = arith.constant 0 : i32
    %c0_i32_0 = arith.constant 0 : i32
    %c0_i32_1 = arith.constant 0 : i32
    return %c0_i32, %c0_i32_0 : i32, i32
  }
  func.func @transform_4(%arg0: i32) -> (i32, i32, i32) {
    %c0_i32 = arith.constant 0 : i32
    %c0_i32_0 = arith.constant 0 : i32
    %c0_i32_1 = arith.constant 0 : i32
    %c0_i32_2 = arith.constant 0 : i32
    return %c0_i32, %c0_i32_0, %c0_i32_1 : i32, i32, i32
  }
  func.func @transform_5(%arg0: i32) -> (i32, i32, i32) {
    %c0_i32 = arith.constant 0 : i32
    %c0_i32_0 = arith.constant 0 : i32
    %c0_i32_1 = arith.constant 0 : i32
    %c0_i32_2 = arith.constant 0 : i32
    return %c0_i32, %c0_i32_0, %c0_i32_1 : i32, i32, i32
  }
  func.func @transform_6(%arg0: i32) -> (i32, i32, i32) {
    %c0_i32 = arith.constant 0 : i32
    %c0_i32_0 = arith.constant 0 : i32
    %c0_i32_1 = arith.constant 0 : i32
    %c0_i32_2 = arith.constant 0 : i32
    return %c0_i32, %c0_i32_0, %c0_i32_1 : i32, i32, i32
  }
  func.func @transform_7(%arg0: i32) -> (i32, i32, i32) {
    %c0_i32 = arith.constant 0 : i32
    %c0_i32_0 = arith.constant 0 : i32
    %c0_i32_1 = arith.constant 0 : i32
    %c0_i32_2 = arith.constant 0 : i32
    return %c0_i32, %c0_i32_0, %c0_i32_1 : i32, i32, i32
  }
  func.func @transform_8(%arg0: i32) -> (i32, i32, i32) {
    %c0_i32 = arith.constant 0 : i32
    %c0_i32_0 = arith.constant 0 : i32
    %c0_i32_1 = arith.constant 0 : i32
    %c0_i32_2 = arith.constant 0 : i32
    return %c0_i32, %c0_i32_0, %c0_i32_1 : i32, i32, i32
  }
  func.func @transform_9(%arg0: i32) -> (i32, i32, i32) {
    %c0_i32 = arith.constant 0 : i32
    %c0_i32_0 = arith.constant 0 : i32
    %c0_i32_1 = arith.constant 0 : i32
    %c0_i32_2 = arith.constant 0 : i32
    return %c0_i32, %c0_i32_0, %c0_i32_1 : i32, i32, i32
  }
  func.func @transform_10(%arg0: i32) -> (i32, i32, i32) {
    %c0_i32 = arith.constant 0 : i32
    %c0_i32_0 = arith.constant 0 : i32
    %c0_i32_1 = arith.constant 0 : i32
    %c0_i32_2 = arith.constant 0 : i32
    return %c0_i32, %c0_i32_0, %c0_i32_1 : i32, i32, i32
  }
  func.func @transform_11(%arg0: i32) -> (i32, i32, i32) {
    %c0_i32 = arith.constant 0 : i32
    %c0_i32_0 = arith.constant 0 : i32
    %c0_i32_1 = arith.constant 0 : i32
    %c0_i32_2 = arith.constant 0 : i32
    return %c0_i32, %c0_i32_0, %c0_i32_1 : i32, i32, i32
  }
  func.func @transform_12(%arg0: i32) -> (i32, i32, i32) {
    %c0_i32 = arith.constant 0 : i32
    %c0_i32_0 = arith.constant 0 : i32
    %c0_i32_1 = arith.constant 0 : i32
    %c0_i32_2 = arith.constant 0 : i32
    return %c0_i32, %c0_i32_0, %c0_i32_1 : i32, i32, i32
  }
  func.func @transform_13(%arg0: i32) -> (i32, i32, i32) {
    %c0_i32 = arith.constant 0 : i32
    %c0_i32_0 = arith.constant 0 : i32
    %c0_i32_1 = arith.constant 0 : i32
    %c0_i32_2 = arith.constant 0 : i32
    return %c0_i32, %c0_i32_0, %c0_i32_1 : i32, i32, i32
  }
  func.func @transform_14(%arg0: i32) -> (i32, i32, i32) {
    %c0_i32 = arith.constant 0 : i32
    %c0_i32_0 = arith.constant 0 : i32
    %c0_i32_1 = arith.constant 0 : i32
    %c0_i32_2 = arith.constant 0 : i32
    return %c0_i32, %c0_i32_0, %c0_i32_1 : i32, i32, i32
  }
  func.func @transform_15(%arg0: i32) -> (i32, i32, i32) {
    %c0_i32 = arith.constant 0 : i32
    %c0_i32_0 = arith.constant 0 : i32
    %c0_i32_1 = arith.constant 0 : i32
    %c0_i32_2 = arith.constant 0 : i32
    return %c0_i32, %c0_i32_0, %c0_i32_1 : i32, i32, i32
  }
  func.func @transform_16(%arg0: i32) -> (i32, i32) {
    %c0_i32 = arith.constant 0 : i32
    %c0_i32_0 = arith.constant 0 : i32
    %c0_i32_1 = arith.constant 0 : i32
    return %c0_i32, %c0_i32_0 : i32, i32
  }
  func.func @transform_17(%arg0: i32) -> (i32, i32) {
    %c0_i32 = arith.constant 0 : i32
    %c0_i32_0 = arith.constant 0 : i32
    %c0_i32_1 = arith.constant 0 : i32
    return %c0_i32, %c0_i32_0 : i32, i32
  }
  func.func @transform_18(%arg0: i32) -> (i32, i32) {
    %c0_i32 = arith.constant 0 : i32
    %c0_i32_0 = arith.constant 0 : i32
    %c0_i32_1 = arith.constant 0 : i32
    return %c0_i32, %c0_i32_0 : i32, i32
  }
  func.func @transform_19(%arg0: i32) -> (i32, i32) {
    %c0_i32 = arith.constant 0 : i32
    %c0_i32_0 = arith.constant 0 : i32
    %c0_i32_1 = arith.constant 0 : i32
    return %c0_i32, %c0_i32_0 : i32, i32
  }
  func.func @transform_20(%arg0: i32) -> (i32, i32, i32) {
    %c0_i32 = arith.constant 0 : i32
    %c0_i32_0 = arith.constant 0 : i32
    %c0_i32_1 = arith.constant 0 : i32
    return %arg0, %c0_i32, %c0_i32_0 : i32, i32, i32
  }
}

</mosaic_0001>

<bundles_post_ra>
// kernel: tpu_custom_call.1
= control target key start
LH: loop header
LB: loop body
LE: loop exit
PB: predicated region body
PF: predicated region fallthrough
CT: control target
= control target key end

     0   :  { %s4881_s0 = inlined_call_operand.hbm [shape: f32[16,32], index: 0, kind: input, shape index: {}]   ;;  %s4882_s1 = inlined_call_operand.hbm [shape: f32[2,1,8], index: 1, kind: input, shape index: {}]   ;;  %s4883_s2 = inlined_call_operand.hbm [shape: f32[1,32], index: 2, kind: input, shape index: {}]   ;;  %s4884_s3 = inlined_call_operand.hbm [shape: f32[1,32], index: 3, kind: input, shape index: {}]   ;;  %s4885_s4 = inlined_call_operand.vmem [shape: bf16[2,32,96], index: 4, kind: input, shape index: {}]   ;;  %s4886_s5 = inlined_call_operand.hbm [shape: f32[2,1,96], index: 5, kind: input, shape index: {}]   ;;  %s4887_s6 = inlined_call_operand.vmem [shape: bf16[2,32,32], index: 6, kind: input, shape index: {}]   ;;  %s4888_s7 = inlined_call_operand.hbm [shape: f32[2,1,32], index: 7, kind: input, shape index: {}]   ;;  %s4889_s8 = inlined_call_operand.hbm [shape: f32[2,1,32], index: 8, kind: input, shape index: {}]   ;;  %s4890_s9 = inlined_call_operand.hbm [shape: f32[2,1,32], index: 9, kind: input, shape index: {}]   ;;  %s4891_s10 = inlined_call_operand.vmem [shape: bf16[2,32,64], index: 10, kind: input, shape index: {}]   ;;  %s4892_s11 = inlined_call_operand.hbm [shape: f32[2,1,64], index: 11, kind: input, shape index: {}]   ;;  %s4893_s12 = inlined_call_operand.vmem [shape: bf16[2,64,32], index: 12, kind: input, shape index: {}]   ;;  %s4894_s13 = inlined_call_operand.hbm [shape: f32[2,1,32], index: 13, kind: input, shape index: {}]   ;;  %s4895_s14 = inlined_call_operand.hbm [shape: f32[2,1,32], index: 14, kind: input, shape index: {}]   ;;  %s4896_s15 = inlined_call_operand.hbm [shape: f32[2,1,32], index: 15, kind: input, shape index: {}]   ;;  %s4897_s16 = inlined_call_operand.vmem [shape: bf16[32,32], index: 16, kind: input, shape index: {}]   ;;  %s4898_s17 = inlined_call_operand.hbm [shape: f32[1,32], index: 17, kind: input, shape index: {}]   ;;  %s4899_s18 = inlined_call_operand.vmem [shape: bf16[32,128], index: 18, kind: input, shape index: {}]   ;;  %s4900_s19 = inlined_call_operand.vmem [shape: f32[1,128], index: 19, kind: input, shape index: {}]   ;;  %s4901_s20 = inlined_call_operand.hbm [shape: f32[2,1,128], index: 20, kind: output, shape index: {}]  }
   0x1   :  { %4903 = sst [smem:[#allocation32_spill]] %s4881_s0 }
   0x2   :  { %4904 = sst [smem:[#allocation33_spill]] %s4882_s1 }
   0x3   :  { %4905 = sst [smem:[#allocation34_spill]] %s4883_s2 }
   0x4   :  { %4906 = sst [smem:[#allocation35_spill]] %s4884_s3 }
   0x5   :  { %4907 = sst [smem:[#allocation36_spill]] %s4885_s4 }
   0x6   :  { %25 = vsyncpa [#allocation3], 0 }
   0x7   :  { %26 = vsyncpa [#allocation6], 0 }
   0x8   :  { %27 = vsyncpa [#allocation9], 0 }
   0x9   :  { %28 = vsyncpa [#allocation12], 0 }
   0xa   :  { %29 = vsyncpa [#allocation15], 0 }
   0xb   :  { %30 = vsyncpa [#allocation18], 0 }
   0xc   :  { %31 = vsyncpa [#allocation21], 0 }
   0xd   :  { %32 = vsyncpa [#allocation4], 0  ;;  %s4089_s1 = smov [#allocation5]  }
   0xe   :  { %s50_s22 = sshll.u32 %s4089_s1, 4  ;;  %s51_s22 = int_to_ptr.vmem [resolvable:$true] %s50_s22 }
   0xf   :  { %s3801_s23 = scalar_lea.vmem %s51_s22, 32  ;;  %p3806_p1 = scmp.lt.s32.totalorder %s51_s22, %s51_s22 }
  0x10   :  { %p3802_p0 = scmp.ne.s32.totalorder %s51_s22, %s3801_s23  ;;  %p3807_p2 = scmp.lt.s32.totalorder %s3801_s23, %s3801_s23 }
  0x12   :  { %p3808_p3 = por %p3807_p2, %p3806_p1 }
  0x14   :  { %p3809_p4 = pnand %p3808_p3, %p3802_p0 }
  0x16   :  { %3812 = shalt.err (!%p3809_p4)
}
  0x17   :  { %s4090_s24 = smov 16   ;;  %s4091_s2 = smov 1  }
  0x18   :  { %s4908_s26 = sld [smem:[#allocation33_spill]]  ;;  %s4092_s27 = smov [#allocation8]  }
  0x19   :  { %s73_s28 = sshll.u32 %s4092_s27, 4  ;;  %s4093_s4 = smov [#allocation11]   ;;  %s74_s28 = int_to_ptr.vmem [resolvable:$true] %s73_s28 }
  0x1a   :  { %s98_s29 = sshll.u32 %s4093_s4, 4  ;;  %s3821_s30 = scalar_lea.vmem %s74_s28, 16  ;;  %s99_s29 = int_to_ptr.vmem [resolvable:$true] %s98_s29 }
  0x1b   :  { %p3822_p5 = scmp.ne.s32.totalorder %s74_s28, %s3821_s30  ;;  %s3825_s0 = scalar_lea.vmem %s74_s28, 32 }
  0x1c   :  { %p3826_p6 = scmp.lt.s32.totalorder %s74_s28, %s74_s28  ;;  %p3827_p7 = scmp.lt.s32.totalorder %s3825_s0, %s3821_s30 }
  0x1e   :  { %56 = dma.hbm_to_vmem [thread:$0]  %s4908_s26, 32, %s51_s22, [#allocation6], %s4090_s24, %s4090_s24, %s4091_s2  }
  0x1f   :  { %p3828_p8 = por %p3827_p7, %p3826_p6 }
  0x21   :  { %p3829_p9 = pnand %p3828_p8, %p3822_p5 }
  0x23   :  { %3832 = shalt.err (!%p3829_p9)
}
  0x24   :  { %s4909_s23 = sld [smem:[#allocation35_spill]]  ;;  %s3841_s25 = scalar_lea.vmem %s99_s29, 32 }
  0x25   :  { %p3842_p10 = scmp.ne.s32.totalorder %s99_s29, %s3841_s25  ;;  %p3846_p11 = scmp.lt.s32.totalorder %s99_s29, %s99_s29 }
  0x26   :  { %p3847_p12 = scmp.lt.s32.totalorder %s3841_s25, %s3841_s25 }
  0x28   :  { %p3848_p13 = por %p3847_p12, %p3846_p11 }
  0x2a   :  { %76 = dma.hbm_to_vmem [thread:$0]  %s4909_s23, 16, %s74_s28, [#allocation9]  }
  0x2b   :  { %p3849_p0 = pnand %p3848_p13, %p3842_p10 }
  0x2d   :  { %3852 = shalt.err (!%p3849_p0)
}
  0x2e   :  { %104 = dma.hbm_to_vmem [thread:$0]  %s4888_s7, 32, %s99_s29, [#allocation12], %s4090_s24, %s4090_s24, %s4091_s2  }
  0x2f   :  { %s4094_s26 = smov [#allocation14]   ;;  %s4095_s4 = smov [#allocation17]  }
  0x30   :  { %s122_s27 = sshll.u32 %s4094_s26, 4  ;;  %s150_s28 = sshll.u32 %s4095_s4, 4  ;;  %s123_s27 = int_to_ptr.vmem [resolvable:$true] %s122_s27  ;;  %s151_s28 = int_to_ptr.vmem [resolvable:$true] %s150_s28 }
  0x31   :  { %s3861_s30 = scalar_lea.vmem %s123_s27, 32  ;;  %p3866_p2 = scmp.lt.s32.totalorder %s123_s27, %s123_s27 }
  0x32   :  { %p3862_p1 = scmp.ne.s32.totalorder %s123_s27, %s3861_s30  ;;  %p3867_p3 = scmp.lt.s32.totalorder %s3861_s30, %s3861_s30 }
  0x34   :  { %p3868_p4 = por %p3867_p3, %p3866_p2 }
  0x36   :  { %p3869_p5 = pnand %p3868_p4, %p3862_p1 }
  0x38   :  { %3872 = shalt.err (!%p3869_p5)
}
  0x39   :  { %128 = dma.hbm_to_vmem [thread:$0]  %s4890_s9, 32, %s123_s27, [#allocation15], %s4090_s24, %s4090_s24, %s4091_s2  }
  0x3a   :  { %s3881_s7 = scalar_lea.vmem %s151_s28, 32  ;;  %p3886_p7 = scmp.lt.s32.totalorder %s151_s28, %s151_s28 }
  0x3b   :  { %p3882_p6 = scmp.ne.s32.totalorder %s151_s28, %s3881_s7  ;;  %p3887_p8 = scmp.lt.s32.totalorder %s3881_s7, %s3881_s7 }
  0x3d   :  { %p3888_p9 = por %p3887_p8, %p3886_p7 }
  0x3f   :  { %p3889_p10 = pnand %p3888_p9, %p3882_p6 }
  0x41   :  { %3892 = shalt.err (!%p3889_p10)
}
  0x42   :  { %156 = dma.hbm_to_vmem [thread:$0]  %s4894_s13, 32, %s151_s28, [#allocation18], %s4090_s24, %s4090_s24, %s4091_s2  }
  0x43   :  { %s4096_s23 = smov [#allocation20]   ;;  %s4097_s22 = smov [#allocation2]  }
  0x44   :  { %s174_s25 = sshll.u32 %s4096_s23, 4  ;;  %s38_s9 = sshll.u32 %s4097_s22, 4  ;;  %s175_s25 = int_to_ptr.vmem [resolvable:$true] %s174_s25  ;;  %s39_s9 = int_to_ptr.vmem [resolvable:$true] %s38_s9 }
  0x45   :  { %s3901_s3 = scalar_lea.vmem %s175_s25, 32  ;;  %p3906_p12 = scmp.lt.s32.totalorder %s175_s25, %s175_s25 }
  0x46   :  { %p3902_p11 = scmp.ne.s32.totalorder %s175_s25, %s3901_s3  ;;  %p3907_p13 = scmp.lt.s32.totalorder %s3901_s3, %s3901_s3 }
  0x48   :  { %p3908_p0 = por %p3907_p13, %p3906_p12 }
  0x4a   :  { %p3909_p1 = pnand %p3908_p0, %p3902_p11 }
  0x4c   :  { %3912 = shalt.err (!%p3909_p1)
}
  0x4d   :  { %180 = dma.hbm_to_vmem [thread:$0]  %s4896_s15, 32, %s175_s25, [#allocation21], %s4090_s24, %s4090_s24, %s4091_s2  }
  0x4e   :  { %s3921_s13 = scalar_lea.vmem %s39_s9, 256  ;;  %p3926_p3 = scmp.lt.s32.totalorder %s39_s9, %s39_s9 }
  0x4f   :  { %p3922_p2 = scmp.ne.s32.totalorder %s39_s9, %s3921_s13  ;;  %p3927_p4 = scmp.lt.s32.totalorder %s3921_s13, %s3921_s13 }
  0x51   :  { %p3928_p5 = por %p3927_p4, %p3926_p3 }
  0x53   :  { %p3929_p6 = pnand %p3928_p5, %p3922_p2 }
  0x55   :  { %3932 = shalt.err (!%p3929_p6)
}
  0x56   :  { %s4098_s4 = smov 128   ;;  %s4099_s28 = smov 8  }
  0x57   :  { %s4910_s21 = sld [smem:[#allocation32_spill]]  ;;  %s4100_s7 = smov [#allocation7]  }
  0x58   :  { %s63_s29 = sshll.u32 %s4100_s7, 4  ;;  %s4101_s1 = smov [#allocation10]   ;;  %s64_s29 = int_to_ptr.vmem [resolvable:$true] %s63_s29 }
  0x59   :  { %s84_s15 = sshll.u32 %s4101_s1, 4  ;;  %s3941_s23 = scalar_lea.vmem %s64_s29, 16  ;;  %s85_s15 = int_to_ptr.vmem [resolvable:$true] %s84_s15 }
  0x5a   :  { %p3942_p7 = scmp.ne.s32.totalorder %s64_s29, %s3941_s23  ;;  %s3945_s25 = scalar_lea.vmem %s64_s29, 32 }
  0x5b   :  { %p3946_p8 = scmp.lt.s32.totalorder %s64_s29, %s64_s29  ;;  %p3947_p9 = scmp.lt.s32.totalorder %s3945_s25, %s3941_s23 }
  0x5d   :  { %44 = dma.hbm_to_vmem [thread:$0]  %s4910_s21, 256, %s39_s9, [#allocation3], %s4098_s4, %s4098_s4, %s4099_s28  }
  0x5e   :  { %p3948_p10 = por %p3947_p9, %p3946_p8 }
  0x60   :  { %p3949_p11 = pnand %p3948_p10, %p3942_p7 }
  0x62   :  { %3952 = shalt.err (!%p3949_p11)
}
  0x63   :  { %s4911_s26 = sld [smem:[#allocation34_spill]]  ;;  %s3961_s27 = scalar_lea.vmem %s85_s15, 32 }
  0x64   :  { %p3962_p12 = scmp.ne.s32.totalorder %s85_s15, %s3961_s27  ;;  %p3966_p13 = scmp.lt.s32.totalorder %s85_s15, %s85_s15 }
  0x65   :  { %p3967_p0 = scmp.lt.s32.totalorder %s3961_s27, %s3961_s27 }
  0x67   :  { %p3968_p1 = por %p3967_p0, %p3966_p13 }
  0x69   :  { %66 = dma.hbm_to_vmem [thread:$0]  %s4911_s26, 16, %s64_s29, [#allocation6]  }
  0x6a   :  { %p3969_p2 = pnand %p3968_p1, %p3962_p12 }
  0x6c   :  { %3972 = shalt.err (!%p3969_p2)
}
  0x6d   :  { %90 = dma.hbm_to_vmem [thread:$0]  %s4886_s5, 32, %s85_s15, [#allocation9], %s4090_s24, %s4090_s24, %s4091_s2  }
  0x6e   :  { %s4102_s4 = smov [#allocation13]   ;;  %s4103_s0 = smov [#allocation16]  }
  0x6f   :  { %s110_s30 = sshll.u32 %s4102_s4, 4  ;;  %s136_s21 = sshll.u32 %s4103_s0, 4  ;;  %s111_s30 = int_to_ptr.vmem [resolvable:$true] %s110_s30  ;;  %s137_s21 = int_to_ptr.vmem [resolvable:$true] %s136_s21 }
  0x70   :  { %s3981_s7 = scalar_lea.vmem %s111_s30, 32  ;;  %p3986_p4 = scmp.lt.s32.totalorder %s111_s30, %s111_s30 }
  0x71   :  { %p3982_p3 = scmp.ne.s32.totalorder %s111_s30, %s3981_s7  ;;  %p3987_p5 = scmp.lt.s32.totalorder %s3981_s7, %s3981_s7 }
  0x73   :  { %p3988_p6 = por %p3987_p5, %p3986_p4 }
  0x75   :  { %p3989_p7 = pnand %p3988_p6, %p3982_p3 }
  0x77   :  { %3992 = shalt.err (!%p3989_p7)
}
  0x78   :  { %116 = dma.hbm_to_vmem [thread:$0]  %s4889_s8, 32, %s111_s30, [#allocation12], %s4090_s24, %s4090_s24, %s4091_s2  }
  0x79   :  { %s4001_s5 = scalar_lea.vmem %s137_s21, 32  ;;  %p4006_p9 = scmp.lt.s32.totalorder %s137_s21, %s137_s21 }
  0x7a   :  { %p4002_p8 = scmp.ne.s32.totalorder %s137_s21, %s4001_s5  ;;  %p4007_p10 = scmp.lt.s32.totalorder %s4001_s5, %s4001_s5 }
  0x7c   :  { %p4008_p11 = por %p4007_p10, %p4006_p9 }
  0x7e   :  { %p4009_p12 = pnand %p4008_p11, %p4002_p8 }
  0x80   :  { %4012 = shalt.err (!%p4009_p12)
}
  0x81   :  { %142 = dma.hbm_to_vmem [thread:$0]  %s4892_s11, 32, %s137_s21, [#allocation15], %s4090_s24, %s4090_s24, %s4091_s2  }
  0x82   :  { %s4104_s25 = smov [#allocation19]   ;;  %s4105_s3 = smov [#allocation22]  }
  0x83   :  { %s162_s22 = sshll.u32 %s4104_s25, 4  ;;  %s189_s8 = sshll.u32 %s4105_s3, 4  ;;  %s163_s22 = int_to_ptr.vmem [resolvable:$true] %s162_s22  ;;  %s190_s8 = int_to_ptr.vmem [resolvable:$true] %s189_s8 }
  0x84   :  { %s4021_s26 = scalar_lea.vmem %s163_s22, 32  ;;  %p4026_p0 = scmp.lt.s32.totalorder %s163_s22, %s163_s22 }
  0x85   :  { %p4022_p13 = scmp.ne.s32.totalorder %s163_s22, %s4021_s26  ;;  %p4027_p1 = scmp.lt.s32.totalorder %s4021_s26, %s4021_s26 }
  0x87   :  { %p4028_p2 = por %p4027_p1, %p4026_p0 }
  0x89   :  { %p4029_p3 = pnand %p4028_p2, %p4022_p13 }
  0x8b   :  { %4032 = shalt.err (!%p4029_p3)
}
  0x8c   :  { %168 = dma.hbm_to_vmem [thread:$0]  %s4895_s14, 32, %s163_s22, [#allocation18], %s4090_s24, %s4090_s24, %s4091_s2  }
  0x8d   :  { %s4041_s11 = scalar_lea.vmem %s190_s8, 16  ;;  %s4045_s13 = scalar_lea.vmem %s190_s8, 32 }
  0x8e   :  { %p4042_p4 = scmp.ne.s32.totalorder %s190_s8, %s4041_s11  ;;  %p4046_p5 = scmp.lt.s32.totalorder %s190_s8, %s190_s8 }
  0x8f   :  { %p4047_p6 = scmp.lt.s32.totalorder %s4045_s13, %s4041_s11 }
  0x91   :  { %p4048_p7 = por %p4047_p6, %p4046_p5 }
  0x93   :  { %p4049_p8 = pnand %p4048_p7, %p4042_p4 }
  0x95   :  { %4052 = shalt.err (!%p4049_p8)
}
  0x96   :  { %192 = dma.hbm_to_vmem [thread:$0]  %s4898_s17, 16, %s190_s8, [#allocation21]  }
  0x97   :  { %4073 = dma.done.wait [#allocation3], 256  }
  0x98   :  { %4074 = vsyncadd [#allocation3], 4294967040 }
  0x99   :  { %4075 = dma.done.wait [#allocation6], 48  }
  0x9a   :  { %4076 = vsyncadd [#allocation6], 4294967248 }
  0x9b   :  { %4077 = dma.done.wait [#allocation9], 48  }
  0x9c   :  { %4078 = vsyncadd [#allocation9], 4294967248 }
  0x9d   :  { %4079 = dma.done.wait [#allocation12], 64  }
  0x9e   :  { %4080 = vsyncadd [#allocation12], 4294967232 }
  0x9f   :  { %4081 = dma.done.wait [#allocation15], 64  }
  0xa0   :  { %4082 = vsyncadd [#allocation15], 4294967232 }
  0xa1   :  { %4083 = dma.done.wait [#allocation18], 64  }
  0xa2   :  { %4084 = vsyncadd [#allocation18], 4294967232 }
  0xa3   :  { %4085 = dma.done.wait [#allocation21], 48  }
  0xa4   :  { %4086 = vsyncadd [#allocation21], 4294967248  ;;  %vm241_vm0 = vcmask 261120   ;;  %v237_v0 = vld [vmem:[#allocation2] sm:$0xff]  ;;  %v238_v1 = vld [vmem:[#allocation2 + $0x8] sm:$0xff]  ;;  %s4912_s0 = sld [smem:[#allocation36_spill]] }
  0xa5   :  { %v242_v2 = vsel %vm241_vm0, %v237_v0, 0.0  ;;  %v245_v3 = vsel %vm241_vm0, %v238_v1, 0.0  ;;  %v4106_v15 = vmov 0.0   ;;  %vm4107_vm1 = vmmov 0   ;;  %v3122_v25 = vld [vmem:[#allocation7] ss:$0 sm:$0xff] }
  0xa6   :  { %243 = vadd.xlane.f32.xlu0 %v242_v2  ;;  %3330 = vmatprep.subr.bf16.mxu0 %v4106_v15  ;;  %v3123_v29 = vld [vmem:[#allocation8] ss:$0 sm:$0xff]  ;;  %v3124_v34 = vld [vmem:[#allocation10] ss:$0 sm:$0xff]  ;;  %s4108_s29 = smov 88   ;;  %s4109_s1 = smov 96  }
  0xa7   :  { %3334 = vmatprep.mubr.msk.bf16.mxu0 %vm4107_vm1, %v4106_v15  ;;  %3338 = vmatprep.subr.bf16.mxu1 %v4106_v15  ;;  %s4110_s5 = smov 80   ;;  %s4111_s15 = smov 72   ;;  %vm365_vm2 = vcmask 64512   ;;  %vm862_vm3 = vcmask 1043456   ;;  %vm1066_vm4 = vcmask 130048   ;;  %vm1068_vm5 = vcmask 195584  }
  0xa8   :  { %3340 = vmatprep.mubr.msk.bf16.mxu1 %vm4107_vm1, %v4106_v15  ;;  %s4112_s23 = smov 120   ;;  %s4113_s25 = smov 112   ;;  %vm1521_vm6 = vcmask 523264   ;;  %vm2935_vm7 = vcmask 1040384  }
  0xa9   :  { %s4114_s22 = smov 104   ;;  %s4115_s3 = smov 56  }
  0xaa   :  { %246 = vadd.xlane.f32.xlu0 %v245_v3  ;;  %v3673_v14 = vld [vmem:[%s4912_s0 + $0x8] sm:$0xff]   ;;  %v3674_v16 = vld [vmem:[%s4912_s0] sm:$0xff]   ;;  %s4116_s8 = smov 48   ;;  %s4117_s26 = smov 64  }
  0xab   :  { %3331 = vmatpush3.bf16.msra.mxu0 %v3673_v14  ;;  %s4118_s27 = smov 40   ;;  %s4119_s30 = smov 24  }
  0xac   :  { %3332 = vmatprep.subr.bf16.mxu0 %v4106_v15 }
  0xaf   :  { %3333 = vmatpush3.bf16.msra.mxu0 %v3674_v16 }
  0xb0   :  { %3344 = vmatprep.subr.bf16.mxu0 %v4106_v15 }
 0x12f   :  { %v244_v4 = vpop.xlane.xlu0 %243 }
 0x130   :  { %v249_v5 = vmul.f32 0.03125, %v244_v4 }
 0x132   :  { %v251_v6 = vsub.f32 %v237_v0, %v249_v5 }
 0x133   :  { %v247_v7 = vpop.xlane.xlu0 %246 }
 0x134   :  { %v250_v8 = vmul.f32 0.03125, %v247_v7  ;;  %v253_v9 = vmul.f32 %v251_v6, %v251_v6 }
 0x136   :  { %v252_v10 = vsub.f32 %v238_v1, %v250_v8  ;;  %v255_v11 = vsel %vm241_vm0, %v253_v9, 0.0  ;;  %v4395_v1 = vld [vmem:[#allocation5] ss:$0 sm:$0xff] }
 0x137   :  { %256 = vadd.xlane.f32.xlu1 %v255_v11 }
 0x138   :  { %v254_v12 = vmul.f32 %v252_v10, %v252_v10 }
 0x13a   :  { %v258_v13 = vsel %vm241_vm0, %v254_v12, 0.0 }
 0x13b   :  { %259 = vadd.xlane.f32.xlu1 %v258_v13 }
 0x1c0   :  { %v257_v17 = vpop.xlane.xlu1 %256 }
 0x1c1   :  { %v261_v18 = vmul.f32 0.03125, %v257_v17 }
 0x1c3   :  { %v263_v19 = vadd.f32 1e-12, %v261_v18 }
 0x1c4   :  { %v260_v20 = vpop.xlane.xlu1 %259 }
 0x1c5   :  { %3697 = vrsqrt.f32 %v263_v19  ;;  %v262_v21 = vmul.f32 0.03125, %v260_v20 }
 0x1c7   :  { %v264_v22 = vadd.f32 1e-12, %v262_v21 }
 0x1c9   :  { %3699 = vrsqrt.f32 %v264_v22 }
 0x1d2   :  { %v3698_v23 = vpop.eup %3697 }
 0x1d3   :  { %v267_v24 = vmul.f32 %v3698_v23, %v251_v6 }
 0x1d5   :  { %v275_v28 = vmul.f32 %v3122_v25, %v267_v24 }
 0x1d6   :  { %v3700_v26 = vpop.eup %3699 }
 0x1d7   :  { %v268_v27 = vmul.f32 %v3700_v26, %v252_v10  ;;  %v4312_v31 = vadd.f32 %v3123_v29, %v275_v28  ;;  %v4412_v26 = vld [vmem:[#allocation5 + $0x1] ss:$0 sm:$0xff] }
 0x1d9   :  { %v276_v30 = vmul.f32 %v3122_v25, %v268_v27 }
 0x1db   :  { %v4314_v32 = vadd.f32 %v3123_v29, %v276_v30 }
 0x1dd   :  { %v291_v33 = vpack.c.bf16 %v4314_v32, %v4312_v31 }
 0x1df   :  { %3335 = vmatmul.mubr.msk.bf16.vlgmr.msra.gmra.mxu0 %vm241_vm0, %v291_v33 }
 0x1e0   :  { %3346 = vmatprep.mubr.msk.bf16.mxu0 %vm4107_vm1, %v4106_v15 }
 0x29f   :  { %v348_v35 = vpop.f32.mrf.mxu0 }
 0x2a0   :  { %v349_v36 = vadd.f32 %v3124_v34, %v348_v35 }
 0x2a1   :  { %v3336_v37 = vpop.f32.mrf.mxu0 }
 0x2a2   :  { %v4321_v38 = vpack.c.bf16 %v349_v36, %v349_v36 }
 0x2a3   :  { %v351_v39 = vpop.f32.mrf.mxu0 }
 0x2a4   :  { %414 = vrot.lane.b32.xlu1 %v4321_v38, %s4108_s29  ;;  %363 = vrot.lane.b32.xlu0 %v4321_v38, %s4109_s1  ;;  %v352_v41 = vadd.f32 %v3124_v34, %v351_v39 }
 0x2a5   :  { %v3337_v40 = vpop.f32.mrf.mxu0 }
 0x2a6   :  { %v4331_v42 = vpack.c.bf16 %v352_v41, %v352_v41 }
 0x2a8   :  { %464 = vrot.lane.b32.xlu1 %v4321_v38, %s4110_s5  ;;  %514 = vrot.lane.b32.xlu0 %v4321_v38, %s4111_s15 }
 0x2ac   :  { %412 = vrot.lane.b32.xlu1 %v4321_v38, %s4112_s23  ;;  %570 = vrot.lane.b32.xlu0 %v4331_v42, %s4109_s1 }
 0x2b0   :  { %462 = vrot.lane.b32.xlu1 %v4321_v38, %s4113_s25  ;;  %620 = vrot.lane.b32.xlu0 %v4331_v42, %s4108_s29 }
 0x2b4   :  { %512 = vrot.lane.b32.xlu1 %v4321_v38, %s4114_s22  ;;  %618 = vrot.lane.b32.xlu0 %v4331_v42, %s4112_s23 }
 0x2b8   :  { %670 = vrot.lane.b32.xlu1 %v4331_v42, %s4110_s5  ;;  %668 = vrot.lane.b32.xlu0 %v4331_v42, %s4113_s25 }
 0x2bc   :  { %720 = vrot.lane.b32.xlu1 %v4331_v42, %s4111_s15 }
 0x2c0   :  { %718 = vrot.lane.b32.xlu1 %v4331_v42, %s4114_s22 }
 0x316   :  { %v415_v43 = vpop.permute.xlu1 %414  ;;  %v364_v44 = vpop.permute.xlu0 %363 }
 0x317   :  { %v420_v45 = vsel %vm365_vm2, %v415_v43, 0  ;;  %v370_v46 = vsel %vm365_vm2, %v364_v44, 0 }
 0x318   :  { %3339 = vmatpush3.bf16.xpose.msra.mxu1 %v370_v46  ;;  %3345 = vmatpush3.bf16.xpose.msra.mxu0 %v420_v45 }
 0x319   :  { %3350 = vmatprep.subr.bf16.mxu1 %v4106_v15  ;;  %3356 = vmatprep.subr.bf16.mxu0 %v4106_v15 }
 0x31a   :  { %v465_v47 = vpop.permute.xlu1 %464  ;;  %v515_v48 = vpop.permute.xlu0 %514 }
 0x31b   :  { %v470_v51 = vsel %vm365_vm2, %v465_v47, 0  ;;  %v520_v52 = vsel %vm365_vm2, %v515_v48, 0 }
 0x31e   :  { %v413_v49 = vpop.permute.xlu1 %412  ;;  %v571_v50 = vpop.permute.xlu0 %570 }
 0x31f   :  { %3341 = vmatmul.mubr.msk.bf16.vlgmr.msra.gmra.mxu1 %vm365_vm2, %v4321_v38  ;;  %3347 = vmatmul.mubr.msk.bf16.vlgmr.msra.gmra.mxu0 %vm365_vm2, %v413_v49  ;;  %v576_v56 = vsel %vm365_vm2, %v571_v50, 0 }
 0x320   :  { %3351 = vmatpush3.bf16.xpose.msra.mxu1 %v470_v51  ;;  %3357 = vmatpush3.bf16.xpose.msra.mxu0 %v520_v52 }
 0x321   :  { %3358 = vmatprep.mubr.msk.bf16.mxu0 %vm4107_vm1, %v4106_v15  ;;  %3352 = vmatprep.mubr.msk.bf16.mxu1 %vm4107_vm1, %v4106_v15 }
 0x322   :  { %v463_v53 = vpop.permute.xlu1 %462  ;;  %3362 = vmatprep.subr.bf16.mxu1 %v4106_v15  ;;  %3368 = vmatprep.subr.bf16.mxu0 %v4106_v15  ;;  %v621_v54 = vpop.permute.xlu0 %620 }
 0x323   :  { %v626_v57 = vsel %vm365_vm2, %v621_v54, 0 }
 0x326   :  { %v513_v55 = vpop.permute.xlu1 %512  ;;  %v619_v59 = vpop.permute.xlu0 %618 }
 0x327   :  { %3353 = vmatmul.mubr.msk.bf16.vlgmr.msra.gmra.mxu1 %vm365_vm2, %v463_v53  ;;  %3359 = vmatmul.mubr.msk.bf16.vlgmr.msra.gmra.mxu0 %vm365_vm2, %v513_v55 }
 0x328   :  { %3363 = vmatpush3.bf16.xpose.msra.mxu1 %v576_v56  ;;  %3369 = vmatpush3.bf16.xpose.msra.mxu0 %v626_v57 }
 0x329   :  { %3364 = vmatprep.mubr.msk.bf16.mxu1 %vm4107_vm1, %v4106_v15  ;;  %3370 = vmatprep.mubr.msk.bf16.mxu0 %vm4107_vm1, %v4106_v15 }
 0x32a   :  { %v671_v58 = vpop.permute.xlu1 %670  ;;  %3374 = vmatprep.subr.bf16.mxu1 %v4106_v15  ;;  %3380 = vmatprep.subr.bf16.mxu0 %v4106_v15  ;;  %v669_v63 = vpop.permute.xlu0 %668 }
 0x32b   :  { %v676_v61 = vsel %vm365_vm2, %v671_v58, 0 }
 0x32e   :  { %v721_v60 = vpop.permute.xlu1 %720 }
 0x32f   :  { %v726_v62 = vsel %vm365_vm2, %v721_v60, 0  ;;  %3365 = vmatmul.mubr.msk.bf16.vlgmr.msra.gmra.mxu1 %vm365_vm2, %v4331_v42  ;;  %3371 = vmatmul.mubr.msk.bf16.vlgmr.msra.gmra.mxu0 %vm365_vm2, %v619_v59 }
 0x330   :  { %3375 = vmatpush3.bf16.xpose.msra.mxu1 %v676_v61  ;;  %3381 = vmatpush3.bf16.xpose.msra.mxu0 %v726_v62 }
 0x331   :  { %3376 = vmatprep.mubr.msk.bf16.mxu1 %vm4107_vm1, %v4106_v15  ;;  %3382 = vmatprep.mubr.msk.bf16.mxu0 %vm4107_vm1, %v4106_v15 }
 0x332   :  { %3392 = vmatprep.subr.bf16.mxu0 %v4106_v15  ;;  %3386 = vmatprep.subr.bf16.mxu1 %v4106_v15  ;;  %v719_v0 = vpop.permute.xlu1 %718 }
 0x337   :  { %3377 = vmatmul.mubr.msk.bf16.vlgmr.msra.gmra.mxu1 %vm365_vm2, %v669_v63  ;;  %3383 = vmatmul.mubr.msk.bf16.vlgmr.msra.gmra.mxu0 %vm365_vm2, %v719_v0 }
 0x338   :  { %3388 = vmatprep.mubr.msk.bf16.mxu1 %vm4107_vm1, %v4106_v15  ;;  %3394 = vmatprep.mubr.msk.bf16.mxu0 %vm4107_vm1, %v4106_v15 }
 0x3df   :  { %v406_v2 = vpop.f32.mrf.mxu1  ;;  %v456_v3 = vpop.f32.mrf.mxu0 }
 0x3e0   :  { %v4398_v4 = vadd.f32 %v4395_v1, %v406_v2  ;;  %v4401_v5 = vadd.f32 %v4395_v1, %v456_v3 }
 0x3e1   :  { %v3342_v6 = vpop.f32.mrf.mxu1  ;;  %v3348_v7 = vpop.f32.mrf.mxu0 }
 0x3e2   :  { %v768_v8 = vsel %vm365_vm2, %v4398_v4, -inf  ;;  %v771_v9 = vsel %vm365_vm2, %v4401_v5, -inf }
 0x3e3   :  { %v409_v10 = vpop.f32.mrf.mxu1  ;;  %769 = vmax.xlane.f32.xlu0 %v768_v8  ;;  %772 = vmax.xlane.f32.xlu1 %v771_v9  ;;  %v459_v11 = vpop.f32.mrf.mxu0 }
 0x3e5   :  { %v3343_v12 = vpop.f32.mrf.mxu1  ;;  %v3349_v13 = vpop.f32.mrf.mxu0 }
 0x3e7   :  { %v506_v14 = vpop.f32.mrf.mxu1  ;;  %v556_v16 = vpop.f32.mrf.mxu0 }
 0x3e8   :  { %v507_v17 = vadd.f32 %v4395_v1, %v506_v14  ;;  %v4409_v20 = vadd.f32 %v4395_v1, %v556_v16 }
 0x3e9   :  { %v3354_v18 = vpop.f32.mrf.mxu1  ;;  %v3360_v19 = vpop.f32.mrf.mxu0 }
 0x3ea   :  { %v774_v21 = vsel %vm365_vm2, %v507_v17, -inf  ;;  %v777_v27 = vsel %vm365_vm2, %v4409_v20, -inf }
 0x3eb   :  { %v509_v22 = vpop.f32.mrf.mxu1  ;;  %775 = vmax.xlane.f32.xlu0 %v774_v21  ;;  %v559_v23 = vpop.f32.mrf.mxu0 }
 0x3ed   :  { %v3355_v24 = vpop.f32.mrf.mxu1  ;;  %v3361_v25 = vpop.f32.mrf.mxu0 }
 0x3ef   :  { %v612_v28 = vpop.f32.mrf.mxu1  ;;  %778 = vmax.xlane.f32.xlu0 %v777_v27  ;;  %v662_v29 = vpop.f32.mrf.mxu0 }
 0x3f0   :  { %v4417_v30 = vadd.f32 %v4412_v26, %v612_v28  ;;  %v4420_v33 = vadd.f32 %v4412_v26, %v662_v29 }
 0x3f1   :  { %v3366_v34 = vpop.f32.mrf.mxu1  ;;  %v3372_v35 = vpop.f32.mrf.mxu0 }
 0x3f2   :  { %v780_v36 = vsel %vm365_vm2, %v4417_v30, -inf  ;;  %v783_v37 = vsel %vm365_vm2, %v4420_v33, -inf }
 0x3f3   :  { %v615_v39 = vpop.f32.mrf.mxu1  ;;  %781 = vmax.xlane.f32.xlu0 %v780_v36  ;;  %784 = vmax.xlane.f32.xlu1 %v783_v37  ;;  %v665_v40 = vpop.f32.mrf.mxu0 }
 0x3f5   :  { %v3367_v41 = vpop.f32.mrf.mxu1  ;;  %v3373_v43 = vpop.f32.mrf.mxu0 }
 0x3f7   :  { %v712_v44 = vpop.f32.mrf.mxu1  ;;  %v762_v45 = vpop.f32.mrf.mxu0 }
 0x3f8   :  { %v4427_v46 = vadd.f32 %v4412_v26, %v712_v44  ;;  %v763_v54 = vadd.f32 %v4412_v26, %v762_v45 }
 0x3f9   :  { %v3378_v47 = vpop.f32.mrf.mxu1  ;;  %v3384_v48 = vpop.f32.mrf.mxu0 }
 0x3fa   :  { %v786_v49 = vsel %vm365_vm2, %v4427_v46, -inf  ;;  %v789_v55 = vsel %vm365_vm2, %v763_v54, -inf }
 0x3fb   :  { %v715_v50 = vpop.f32.mrf.mxu1  ;;  %787 = vmax.xlane.f32.xlu0 %v786_v49  ;;  %v765_v51 = vpop.f32.mrf.mxu0 }
 0x3fd   :  { %v3379_v52 = vpop.f32.mrf.mxu1  ;;  %v3385_v53 = vpop.f32.mrf.mxu0 }
 0x404   :  { %907 = vrot.lane.b32.xlu1 %v4321_v38, %s4115_s3 }
 0x408   :  { %956 = vrot.lane.b32.xlu1 %v4321_v38, %s4116_s8 }
 0x411   :  { %857 = vrot.lane.b32.xlu0 %v4321_v38, %s4117_s26 }
 0x42c   :  { %790 = vmax.xlane.f32.xlu1 %v789_v55 }
 0x43d   :  { %1005 = vrot.lane.b32.xlu1 %v4321_v38, %s4118_s27 }
 0x46c   :  { %v770_v56 = vpop.xlane.xlu0 %769  ;;  %v773_v57 = vpop.xlane.xlu1 %772 }
 0x46d   :  { %v792_v58 = vsub.f32 %v4398_v4, %v770_v56  ;;  %v793_v59 = vsub.f32 %v4401_v5, %v773_v57 }
 0x46f   :  { %v800_v60 = vmul.f32 1.442695, %v792_v58  ;;  %v802_v61 = vmul.f32 1.442695, %v793_v59 }
 0x471   :  { %3701 = vpow2.f32 %v800_v60 }
 0x472   :  { %3703 = vpow2.f32 %v802_v61 }
 0x474   :  { %v776_v62 = vpop.xlane.xlu0 %775 }
 0x475   :  { %v794_v63 = vsub.f32 %v507_v17, %v776_v62 }
 0x477   :  { %v804_v0 = vmul.f32 1.442695, %v794_v63 }
 0x478   :  { %v779_v2 = vpop.xlane.xlu0 %778 }
 0x479   :  { %3705 = vpow2.f32 %v804_v0  ;;  %v795_v16 = vsub.f32 %v4409_v20, %v779_v2 }
 0x47b   :  { %v806_v17 = vmul.f32 1.442695, %v795_v16 }
 0x47c   :  { %v785_v3 = vpop.xlane.xlu1 %784  ;;  %v782_v7 = vpop.xlane.xlu0 %781 }
 0x47d   :  { %v797_v18 = vsub.f32 %v4420_v33, %v785_v3  ;;  %v796_v19 = vsub.f32 %v4417_v30, %v782_v7  ;;  %3707 = vpow2.f32 %v806_v17 }
 0x47e   :  { %v4443_v6 = vpop.eup %3701 }
 0x47f   :  { %v4445_v38 = vpop.eup %3703  ;;  %v816_v4 = vsel %vm365_vm2, %v4443_v6, 0.0  ;;  %v810_v21 = vmul.f32 1.442695, %v797_v18  ;;  %v808_v22 = vmul.f32 1.442695, %v796_v19 }
 0x480   :  { %817 = vadd.xlane.f32.xlu0 %v816_v4  ;;  %v908_v5 = vpop.permute.xlu1 %907  ;;  %v819_v8 = vsel %vm365_vm2, %v4445_v38, 0.0 }
 0x481   :  { %v913_v9 = vsel %vm862_vm3, %v908_v5, 0  ;;  %820 = vadd.xlane.f32.xlu1 %v819_v8  ;;  %3709 = vpow2.f32 %v810_v21 }
 0x482   :  { %3393 = vmatpush3.bf16.msra.mxu0 %v913_v9  ;;  %3711 = vpow2.f32 %v808_v22 }
 0x483   :  { %3404 = vmatprep.subr.bf16.mxu0 %v4106_v15 }
 0x484   :  { %v788_v10 = vpop.xlane.xlu0 %787  ;;  %v957_v25 = vpop.permute.xlu1 %956 }
 0x485   :  { %v798_v23 = vsub.f32 %v4427_v46, %v788_v10  ;;  %v962_v53 = vsel %vm862_vm3, %v957_v25, 0 }
 0x486   :  { %v4453_v11 = vpop.eup %3705 }
 0x487   :  { %v822_v12 = vsel %vm365_vm2, %v4453_v11, 0.0  ;;  %v812_v24 = vmul.f32 1.442695, %v798_v23 }
 0x488   :  { %823 = vadd.xlane.f32.xlu0 %v822_v12  ;;  %v858_v13 = vpop.permute.xlu0 %857 }
 0x489   :  { %v864_v14 = vsel %vm862_vm3, %v858_v13, 0  ;;  %3713 = vpow2.f32 %v812_v24 }
 0x48a   :  { %3387 = vmatpush3.bf16.msra.mxu1 %v864_v14  ;;  %v4467_v27 = vpop.eup %3707 }
 0x48b   :  { %3398 = vmatprep.subr.bf16.mxu1 %v4106_v15  ;;  %v825_v20 = vsel %vm365_vm2, %v4467_v27, 0.0 }
 0x48e   :  { %v4471_v29 = vpop.eup %3709 }
 0x48f   :  { %v4473_v34 = vpop.eup %3711  ;;  %v831_v35 = vsel %vm365_vm2, %v4471_v29, 0.0 }
 0x490   :  { %v828_v36 = vsel %vm365_vm2, %v4473_v34, 0.0 }
 0x492   :  { %1120 = vrot.lane.b32.xlu1 %v4331_v42, %s4115_s3 }
 0x496   :  { %v4479_v37 = vpop.eup %3713 }
 0x497   :  { %v834_v39 = vsel %vm365_vm2, %v4479_v37, 0.0 }
 0x49e   :  { %1071 = vrot.lane.b32.xlu0 %v4331_v42, %s4117_s26 }
 0x4b5   :  { %v791_v28 = vpop.xlane.xlu1 %790 }
 0x4b6   :  { %826 = vadd.xlane.f32.xlu1 %v825_v20  ;;  %v799_v30 = vsub.f32 %v763_v54, %v791_v28 }
 0x4b8   :  { %v814_v33 = vmul.f32 1.442695, %v799_v30 }
 0x4b9   :  { %v1006_v43 = vpop.permute.xlu1 %1005 }
 0x4ba   :  { %3715 = vpow2.f32 %v814_v33  ;;  %832 = vadd.xlane.f32.xlu1 %v831_v35 }
 0x4bd   :  { %829 = vadd.xlane.f32.xlu0 %v828_v36 }
 0x4c1   :  { %835 = vadd.xlane.f32.xlu0 %v834_v39 }
 0x4c7   :  { %v4483_v40 = vpop.eup %3715 }
 0x4c8   :  { %v837_v41 = vsel %vm365_vm2, %v4483_v40, 0.0 }
 0x4c9   :  { %838 = vadd.xlane.f32.xlu1 %v837_v41 }
 0x4d7   :  { %1169 = vrot.lane.b32.xlu0 %v4331_v42, %s4116_s8 }
 0x4da   :  { %1218 = vrot.lane.b32.xlu1 %v4331_v42, %s4118_s27  ;;  %v1011_v42 = vsel %vm862_vm3, %v1006_v43, 0 }
 0x509   :  { %v818_v44 = vpop.xlane.xlu0 %817 }
 0x50a   :  { %3717 = vrcp.f32 %v818_v44  ;;  %v821_v45 = vpop.xlane.xlu1 %820  ;;  %v3675_v44 = vld [vmem:[%s4887_s6 + $0x8] sm:$0xff]  }
 0x50b   :  { %3719 = vrcp.f32 %v821_v45 }
 0x50e   :  { %v1121_v59 = vpop.permute.xlu1 %1120 }
 0x511   :  { %v824_v46 = vpop.xlane.xlu0 %823 }
 0x512   :  { %3721 = vrcp.f32 %v824_v46 }
 0x515   :  { %v1072_v56 = vpop.permute.xlu0 %1071 }
 0x516   :  { %v1077_v58 = vsel %vm862_vm3, %v1072_v56, 0 }
 0x517   :  { %v3718_v47 = vpop.eup %3717 }
 0x518   :  { %v3720_v48 = vpop.eup %3719  ;;  %v848_v49 = vmul.f32 %v3718_v47, %v4443_v6 }
 0x519   :  { %v849_v50 = vmul.f32 %v3720_v48, %v4445_v38  ;;  %v1126_v38 = vsel %vm862_vm3, %v1121_v59, 0 }
 0x51a   :  { %v856_v51 = vpack.c.bf16 %v848_v49, %v848_v49 }
 0x51b   :  { %v906_v52 = vpack.c.bf16 %v849_v50, %v849_v50  ;;  %v3676_v50 = vld [vmem:[%s4887_s6] sm:$0xff]  }
 0x51c   :  { %3389 = vmatmul.mubr.msk.bf16.vlgmr.msra.gmra.mxu1 %vm365_vm2, %v856_v51 }
 0x51d   :  { %3395 = vmatmul.mubr.msk.bf16.vlgmr.msra.gmra.mxu0 %vm365_vm2, %v906_v52  ;;  %3399 = vmatpush3.bf16.msra.mxu1 %v962_v53 }
 0x51e   :  { %3405 = vmatpush3.bf16.msra.mxu0 %v1011_v42  ;;  %3400 = vmatprep.mubr.msk.bf16.mxu1 %vm4107_vm1, %v4106_v15 }
 0x51f   :  { %v3722_v54 = vpop.eup %3721  ;;  %3410 = vmatprep.subr.bf16.mxu1 %v4106_v15  ;;  %3406 = vmatprep.mubr.msk.bf16.mxu0 %vm4107_vm1, %v4106_v15 }
 0x520   :  { %v850_v55 = vmul.f32 %v3722_v54, %v4453_v11  ;;  %3416 = vmatprep.subr.bf16.mxu0 %v4106_v15 }
 0x522   :  { %v955_v57 = vpack.c.bf16 %v850_v55, %v850_v55 }
 0x524   :  { %3401 = vmatmul.mubr.msk.bf16.vlgmr.msra.gmra.mxu1 %vm365_vm2, %v955_v57 }
 0x525   :  { %3411 = vmatpush3.bf16.msra.mxu1 %v1077_v58  ;;  %3412 = vmatprep.mubr.msk.bf16.mxu1 %vm4107_vm1, %v4106_v15 }
 0x526   :  { %3422 = vmatprep.subr.bf16.mxu1 %v4106_v15 }
 0x53f   :  { %v827_v60 = vpop.xlane.xlu1 %826 }
 0x540   :  { %3723 = vrcp.f32 %v827_v60 }
 0x543   :  { %v833_v61 = vpop.xlane.xlu1 %832 }
 0x544   :  { %3725 = vrcp.f32 %v833_v61 }
 0x546   :  { %v830_v62 = vpop.xlane.xlu0 %829 }
 0x547   :  { %3727 = vrcp.f32 %v830_v62 }
 0x54a   :  { %v836_v63 = vpop.xlane.xlu0 %835 }
 0x54b   :  { %3729 = vrcp.f32 %v836_v63 }
 0x54d   :  { %v3724_v0 = vpop.eup %3723 }
 0x54e   :  { %v851_v2 = vmul.f32 %v3724_v0, %v4467_v27  ;;  %v1170_v9 = vpop.permute.xlu0 %1169 }
 0x54f   :  { %v1175_v16 = vsel %vm862_vm3, %v1170_v9, 0 }
 0x550   :  { %v1004_v3 = vpack.c.bf16 %v851_v2, %v851_v2 }
 0x551   :  { %v3726_v6 = vpop.eup %3725 }
 0x552   :  { %3407 = vmatmul.mubr.msk.bf16.vlgmr.msra.gmra.mxu0 %vm365_vm2, %v1004_v3  ;;  %v839_v4 = vpop.xlane.xlu1 %838  ;;  %v853_v5 = vmul.f32 %v3726_v6, %v4471_v29 }
 0x553   :  { %3417 = vmatpush3.bf16.msra.mxu0 %v1126_v38  ;;  %3731 = vrcp.f32 %v839_v4  ;;  %3418 = vmatprep.mubr.msk.bf16.mxu0 %vm4107_vm1, %v4106_v15 }
 0x554   :  { %v3728_v7 = vpop.eup %3727  ;;  %3428 = vmatprep.subr.bf16.mxu0 %v4106_v15  ;;  %v1119_v14 = vpack.c.bf16 %v853_v5, %v853_v5 }
 0x555   :  { %v852_v8 = vmul.f32 %v3728_v7, %v4473_v34 }
 0x556   :  { %v1219_v10 = vpop.permute.xlu1 %1218 }
 0x557   :  { %v1070_v11 = vpack.c.bf16 %v852_v8, %v852_v8  ;;  %v1224_v13 = vsel %vm862_vm3, %v1219_v10, 0 }
 0x558   :  { %v3730_v12 = vpop.eup %3729 }
 0x559   :  { %3413 = vmatmul.mubr.msk.bf16.vlgmr.msra.gmra.mxu1 %vm365_vm2, %v1070_v11  ;;  %v854_v17 = vmul.f32 %v3730_v12, %v4479_v37 }
 0x55a   :  { %3419 = vmatmul.mubr.msk.bf16.vlgmr.msra.gmra.mxu0 %vm365_vm2, %v1119_v14  ;;  %3423 = vmatpush3.bf16.msra.mxu1 %v1175_v16  ;;  %v3146_v16 = vld [vmem:[#allocation11] ss:$0 sm:$0xff] }
 0x55b   :  { %3429 = vmatpush3.bf16.msra.mxu0 %v1224_v13  ;;  %3424 = vmatprep.mubr.msk.bf16.mxu1 %vm4107_vm1, %v4106_v15  ;;  %v1168_v18 = vpack.c.bf16 %v854_v17, %v854_v17 }
 0x55c   :  { %3430 = vmatprep.mubr.msk.bf16.mxu0 %vm4107_vm1, %v4106_v15  ;;  %3434 = vmatprep.subr.bf16.mxu1 %v4106_v15 }
 0x55d   :  { %3442 = vmatprep.subr.bf16.mxu0 %v4106_v15 }
 0x560   :  { %v3732_v19 = vpop.eup %3731 }
 0x561   :  { %3425 = vmatmul.mubr.msk.bf16.vlgmr.msra.gmra.mxu1 %vm365_vm2, %v1168_v18  ;;  %v855_v21 = vmul.f32 %v3732_v19, %v4483_v40 }
 0x562   :  { %3438 = vmatprep.mubr.msk.bf16.mxu1 %vm4107_vm1, %v4106_v15  ;;  %3435 = vmatpush3.bf16.msra.mxu1 %v3675_v44 }
 0x563   :  { %v1217_v22 = vpack.c.bf16 %v855_v21, %v855_v21  ;;  %3436 = vmatprep.subr.bf16.mxu1 %v4106_v15 }
 0x565   :  { %3431 = vmatmul.mubr.msk.bf16.vlgmr.msra.gmra.mxu0 %vm365_vm2, %v1217_v22 }
 0x566   :  { %3446 = vmatprep.mubr.msk.bf16.mxu0 %vm4107_vm1, %v4106_v15  ;;  %3437 = vmatpush3.bf16.msra.mxu1 %v3676_v50  ;;  %v3150_v50 = vld [vmem:[#allocation13] ss:$0 sm:$0xff] }
 0x567   :  { %3450 = vmatprep.subr.bf16.mxu1 %v4106_v15 }
 0x5dc   :  { %v900_v23 = vpop.f32.mrf.mxu1 }
 0x5dd   :  { %v949_v24 = vpop.f32.mrf.mxu0 }
 0x5de   :  { %v3390_v25 = vpop.f32.mrf.mxu1 }
 0x5df   :  { %v3396_v27 = vpop.f32.mrf.mxu0 }
 0x5e0   :  { %v903_v20 = vpop.f32.mrf.mxu1 }
 0x5e1   :  { %v952_v28 = vpop.f32.mrf.mxu0 }
 0x5e2   :  { %v3391_v29 = vpop.f32.mrf.mxu1 }
 0x5e3   :  { %v3397_v30 = vpop.f32.mrf.mxu0 }
 0x5e4   :  { %v998_v33 = vpop.f32.mrf.mxu1 }
 0x5e6   :  { %v3402_v34 = vpop.f32.mrf.mxu1 }
 0x5e8   :  { %v1001_v35 = vpop.f32.mrf.mxu1 }
 0x5ea   :  { %v3403_v36 = vpop.f32.mrf.mxu1 }
 0x612   :  { %v1047_v37 = vpop.f32.mrf.mxu0 }
 0x614   :  { %v3408_v39 = vpop.f32.mrf.mxu0 }
 0x616   :  { %v1050_v40 = vpop.f32.mrf.mxu0 }
 0x617   :  { %v3678_v40 = vld [vmem:[%s4891_s10] sm:$0xff]  }
 0x618   :  { %v3409_v41 = vpop.f32.mrf.mxu0 }
 0x619   :  { %v1113_v43 = vpop.f32.mrf.mxu1 }
 0x61a   :  { %v1162_v45 = vpop.f32.mrf.mxu0 }
 0x61b   :  { %v3643_v46 = vpack.i.bf16 %v1162_v45, %v949_v24  ;;  %v3414_v47 = vpop.f32.mrf.mxu1 }
 0x61c   :  { %v3420_v48 = vpop.f32.mrf.mxu0 }
 0x61d   :  { %3644 = vrot.lane.b32.xlu0 %v3643_v46, %s4099_s28  ;;  %v1116_v49 = vpop.f32.mrf.mxu1 }
 0x61e   :  { %v1165_v51 = vpop.f32.mrf.mxu0 }
 0x61f   :  { %v3415_v52 = vpop.f32.mrf.mxu1 }
 0x620   :  { %v3421_v53 = vpop.f32.mrf.mxu0 }
 0x621   :  { %v1211_v42 = vpop.f32.mrf.mxu1 }
 0x622   :  { %v3648_v54 = vpack.i.bf16 %v1211_v42, %v998_v33  ;;  %v3151_v42 = vld [vmem:[#allocation14] ss:$0 sm:$0xff] }
 0x623   :  { %v3426_v55 = vpop.f32.mrf.mxu1 }
 0x624   :  { %3649 = vrot.lane.b32.xlu1 %v3648_v54, %s4090_s24 }
 0x625   :  { %v1214_v56 = vpop.f32.mrf.mxu1  ;;  %v1260_v57 = vpop.f32.mrf.mxu0 }
 0x626   :  { %v3653_v58 = vpack.i.bf16 %v1260_v57, %v1047_v37 }
 0x627   :  { %v3427_v59 = vpop.f32.mrf.mxu1  ;;  %v3432_v60 = vpop.f32.mrf.mxu0 }
 0x628   :  { %3654 = vrot.lane.b32.xlu0 %v3653_v58, %s4119_s30  ;;  %v3679_v58 = vld [vmem:[%s4893_s12 + $0x18] sm:$0xff]   ;;  %v3680_v59 = vld [vmem:[%s4893_s12 + $0x10] sm:$0xff]   ;;  %v3681_v60 = vld [vmem:[%s4893_s12 + $0x8] sm:$0xff]  }
 0x629   :  { %v1263_v61 = vpop.f32.mrf.mxu0 }
 0x62a   :  { %v3682_v61 = vld [vmem:[%s4893_s12] sm:$0xff]  }
 0x62b   :  { %v3433_v62 = vpop.f32.mrf.mxu0 }
 0x62c   :  { %v3152_v62 = vld [vmem:[#allocation16] ss:$0 sm:$0xff] }
 0x68f   :  { %v3645_v63 = vpop.permute.xlu0 %3644 }
 0x690   :  { %v3647_v2 = vunpack.i.h.bf16 %v3645_v63  ;;  %v3646_v3 = vunpack.i.l.bf16 %v3645_v63 }
 0x692   :  { %v1278_v7 = vsel %vm365_vm2, %v1113_v43, %v3647_v2  ;;  %v1065_v5 = vsel %vm365_vm2, %v900_v23, %v3646_v3 }
 0x696   :  { %v3650_v0 = vpop.permute.xlu1 %3649 }
 0x697   :  { %v3652_v6 = vunpack.i.h.bf16 %v3650_v0  ;;  %v3651_v38 = vunpack.i.l.bf16 %v3650_v0 }
 0x699   :  { %v1067_v10 = vsel %vm1066_vm4, %v1065_v5, %v3651_v38  ;;  %v1279_v11 = vsel %vm1066_vm4, %v1278_v7, %v3652_v6 }
 0x69a   :  { %v3655_v4 = vpop.permute.xlu0 %3654 }
 0x69b   :  { %v3657_v8 = vunpack.i.h.bf16 %v3655_v4  ;;  %v3656_v9 = vunpack.i.l.bf16 %v3655_v4 }
 0x69d   :  { %v1280_v12 = vsel %vm1068_vm5, %v1279_v11, %v3657_v8  ;;  %v1069_v13 = vsel %vm1068_vm5, %v1067_v10, %v3656_v9 }
 0x69e   :  { %v1285_v14 = vpack.c.bf16 %v1280_v12, %v1069_v13 }
 0x6a0   :  { %3439 = vmatmul.mubr.msk.bf16.vlgmr.msra.gmra.mxu1 %vm241_vm0, %v1285_v14 }
 0x6a1   :  { %3458 = vmatprep.mubr.msk.bf16.mxu1 %vm4107_vm1, %v4106_v15  ;;  %3451 = vmatpush3.bf16.msra.mxu1 %v3679_v58  ;;  %v3162_v58 = vld [vmem:[#allocation19] ss:$0 sm:$0xff] }
 0x6a2   :  { %3452 = vmatprep.subr.bf16.mxu1 %v4106_v15 }
 0x6a5   :  { %3453 = vmatpush3.bf16.msra.mxu1 %v3680_v59 }
 0x6a6   :  { %3454 = vmatprep.subr.bf16.mxu1 %v4106_v15 }
 0x6a9   :  { %3455 = vmatpush3.bf16.msra.mxu1 %v3681_v60 }
 0x6aa   :  { %3456 = vmatprep.subr.bf16.mxu1 %v4106_v15 }
 0x6ad   :  { %3457 = vmatpush3.bf16.msra.mxu1 %v3682_v61 }
 0x6ae   :  { %3476 = vmatprep.subr.bf16.mxu1 %v4106_v15 }
 0x760   :  { %v1342_v17 = vpop.f32.mrf.mxu1 }
 0x761   :  { %v1343_v18 = vadd.f32 %v3146_v16, %v1342_v17 }
 0x762   :  { %v3440_v19 = vpop.f32.mrf.mxu1 }
 0x763   :  { %v1349_v21 = vadd.f32 %v1343_v18, %v4312_v31 }
 0x764   :  { %v1345_v22 = vpop.f32.mrf.mxu1 }
 0x765   :  { %v1346_v23 = vadd.f32 %v3146_v16, %v1345_v22  ;;  %v1353_v24 = vsel %vm241_vm0, %v1349_v21, 0.0 }
 0x766   :  { %1354 = vadd.xlane.f32.xlu1 %v1353_v24  ;;  %v3441_v25 = vpop.f32.mrf.mxu1 }
 0x767   :  { %v1350_v27 = vadd.f32 %v1346_v23, %v4314_v32  ;;  %v3677_v32 = vld [vmem:[%s4891_s10 + $0x8] sm:$0xff]  }
 0x768   :  { %3443 = vmatpush3.bf16.msra.mxu0 %v3677_v32 }
 0x769   :  { %v1356_v20 = vsel %vm241_vm0, %v1350_v27, 0.0  ;;  %3444 = vmatprep.subr.bf16.mxu0 %v4106_v15 }
 0x76a   :  { %1357 = vadd.xlane.f32.xlu0 %v1356_v20 }
 0x76c   :  { %3445 = vmatpush3.bf16.msra.mxu0 %v3678_v40 }
 0x76d   :  { %3462 = vmatprep.subr.bf16.mxu0 %v4106_v15 }
 0x7ef   :  { %v1355_v28 = vpop.xlane.xlu1 %1354 }
 0x7f0   :  { %v1359_v29 = vmul.f32 0.03125, %v1355_v28 }
 0x7f2   :  { %v1361_v30 = vsub.f32 %v1349_v21, %v1359_v29 }
 0x7f3   :  { %v1358_v33 = vpop.xlane.xlu0 %1357 }
 0x7f4   :  { %v1360_v34 = vmul.f32 0.03125, %v1358_v33  ;;  %v1363_v35 = vmul.f32 %v1361_v30, %v1361_v30 }
 0x7f6   :  { %v1362_v36 = vsub.f32 %v1350_v27, %v1360_v34  ;;  %v1365_v31 = vsel %vm241_vm0, %v1363_v35, 0.0  ;;  %v3156_v27 = vld [vmem:[#allocation17] ss:$0 sm:$0xff] }
 0x7f7   :  { %1366 = vadd.xlane.f32.xlu0 %v1365_v31 }
 0x7f8   :  { %v1364_v37 = vmul.f32 %v1362_v36, %v1362_v36 }
 0x7fa   :  { %v1368_v39 = vsel %vm241_vm0, %v1364_v37, 0.0 }
 0x7fb   :  { %1369 = vadd.xlane.f32.xlu0 %v1368_v39 }
 0x880   :  { %v1367_v41 = vpop.xlane.xlu0 %1366 }
 0x881   :  { %v1371_v43 = vmul.f32 0.03125, %v1367_v41 }
 0x883   :  { %v1373_v44 = vadd.f32 1e-12, %v1371_v43 }
 0x884   :  { %v1370_v45 = vpop.xlane.xlu0 %1369 }
 0x885   :  { %3733 = vrsqrt.f32 %v1373_v44  ;;  %v1372_v46 = vmul.f32 0.03125, %v1370_v45 }
 0x887   :  { %v1374_v47 = vadd.f32 1e-12, %v1372_v46 }
 0x889   :  { %3735 = vrsqrt.f32 %v1374_v47 }
 0x892   :  { %v3734_v48 = vpop.eup %3733 }
 0x893   :  { %v1377_v49 = vmul.f32 %v3734_v48, %v1361_v30 }
 0x895   :  { %v1385_v53 = vmul.f32 %v3150_v50, %v1377_v49  ;;  %v3683_v49 = vld [vmem:[%s4912_s0 + $0x18] sm:$0xff]  }
 0x896   :  { %v3736_v51 = vpop.eup %3735 }
 0x897   :  { %v1378_v52 = vmul.f32 %v3736_v51, %v1362_v36  ;;  %v1393_v55 = vadd.f32 %v3151_v42, %v1385_v53 }
 0x899   :  { %v1386_v54 = vmul.f32 %v3150_v50, %v1378_v52  ;;  %v3684_v50 = vld [vmem:[%s4912_s0 + $0x10] sm:$0xff]  }
 0x89b   :  { %v1394_v56 = vadd.f32 %v3151_v42, %v1386_v54 }
 0x89d   :  { %v1399_v57 = vpack.c.bf16 %v1394_v56, %v1393_v55 }
 0x89f   :  { %3447 = vmatmul.mubr.msk.bf16.vlgmr.msra.gmra.mxu0 %vm241_vm0, %v1399_v57 }
 0x8a0   :  { %3466 = vmatprep.mubr.msk.bf16.mxu0 %vm4107_vm1, %v4106_v15  ;;  %3463 = vmatpush3.bf16.msra.mxu0 %v3683_v49 }
 0x8a1   :  { %3464 = vmatprep.subr.bf16.mxu0 %v4106_v15 }
 0x8a4   :  { %3465 = vmatpush3.bf16.msra.mxu0 %v3684_v50 }
 0x8a5   :  { %3470 = vmatprep.subr.bf16.mxu0 %v4106_v15 }
 0x95f   :  { %v1456_v63 = vpop.f32.mrf.mxu0 }
 0x960   :  { %v1457_v0 = vadd.f32 %v3152_v62, %v1456_v63 }
 0x961   :  { %v3448_v2 = vpop.f32.mrf.mxu0 }
 0x962   :  { %v1463_v3 = vmul.f32 %v1457_v0, %v1457_v0 }
 0x963   :  { %v1459_v6 = vpop.f32.mrf.mxu0 }
 0x964   :  { %v1465_v38 = vmul.f32 %v1463_v3, %v1457_v0  ;;  %v1460_v4 = vadd.f32 %v3152_v62, %v1459_v6  ;;  %v3163_v62 = vld [vmem:[#allocation20] ss:$0 sm:$0xff]  ;;  %v3168_v6 = vld [vmem:[#allocation10 + $0x1] ss:$0 sm:$0xff] }
 0x965   :  { %v3449_v7 = vpop.f32.mrf.mxu0 }
 0x966   :  { %v1467_v5 = vmul.f32 0.044715, %v1465_v38  ;;  %v1464_v8 = vmul.f32 %v1460_v4, %v1460_v4 }
 0x968   :  { %v1469_v9 = vadd.f32 %v1467_v5, %v1457_v0  ;;  %v1466_v10 = vmul.f32 %v1464_v8, %v1460_v4 }
 0x96a   :  { %v1471_v11 = vmul.f32 0.7978846, %v1469_v9  ;;  %v1468_v12 = vmul.f32 0.044715, %v1466_v10 }
 0x96c   :  { %3737 = vtanh.f32 %v1471_v11  ;;  %v1470_v13 = vadd.f32 %v1468_v12, %v1460_v4 }
 0x96e   :  { %v1472_v14 = vmul.f32 0.7978846, %v1470_v13 }
 0x970   :  { %3739 = vtanh.f32 %v1472_v14 }
 0x979   :  { %v3738_v16 = vpop.eup %3737 }
 0x97a   :  { %v1475_v17 = vadd.f32 1.0, %v3738_v16 }
 0x97c   :  { %v1477_v19 = vmul.f32 0.5, %v1475_v17 }
 0x97d   :  { %v3740_v18 = vpop.eup %3739 }
 0x97e   :  { %v1476_v21 = vadd.f32 1.0, %v3740_v18  ;;  %v1479_v23 = vmul.f32 %v1477_v19, %v1457_v0 }
 0x980   :  { %v1478_v22 = vmul.f32 0.5, %v1476_v21 }
 0x982   :  { %v1480_v24 = vmul.f32 %v1478_v22, %v1460_v4 }
 0x984   :  { %v1489_v25 = vpack.c.bf16 %v1480_v24, %v1479_v23 }
 0x986   :  { %3459 = vmatmul.mubr.msk.bf16.vlgmr.msra.gmra.mxu1 %vm1521_vm6, %v1489_v25 }
 0x987   :  { %3478 = vmatprep.mubr.msk.bf16.mxu1 %vm4107_vm1, %v4106_v15 }
 0xa46   :  { %v1559_v20 = vpop.f32.mrf.mxu1 }
 0xa47   :  { %v1560_v28 = vadd.f32 %v3156_v27, %v1559_v20 }
 0xa48   :  { %v3460_v29 = vpop.f32.mrf.mxu1 }
 0xa49   :  { %v1566_v30 = vadd.f32 %v1560_v28, %v1393_v55 }
 0xa4a   :  { %v1562_v33 = vpop.f32.mrf.mxu1 }
 0xa4b   :  { %v1563_v34 = vadd.f32 %v3156_v27, %v1562_v33  ;;  %v1570_v35 = vsel %vm241_vm0, %v1566_v30, 0.0 }
 0xa4c   :  { %1571 = vadd.xlane.f32.xlu1 %v1570_v35  ;;  %v3461_v36 = vpop.f32.mrf.mxu1 }
 0xa4d   :  { %v1567_v31 = vadd.f32 %v1563_v34, %v1394_v56 }
 0xa4f   :  { %v1573_v37 = vsel %vm241_vm0, %v1567_v31, 0.0 }
 0xa50   :  { %1574 = vadd.xlane.f32.xlu0 %v1573_v37 }
 0xad5   :  { %v1572_v39 = vpop.xlane.xlu1 %1571 }
 0xad6   :  { %v1576_v32 = vmul.f32 0.03125, %v1572_v39 }
 0xad8   :  { %v1578_v40 = vsub.f32 %v1566_v30, %v1576_v32 }
 0xad9   :  { %v1575_v41 = vpop.xlane.xlu0 %1574 }
 0xada   :  { %v1577_v43 = vmul.f32 0.03125, %v1575_v41  ;;  %v1580_v44 = vmul.f32 %v1578_v40, %v1578_v40 }
 0xadc   :  { %v1579_v45 = vsub.f32 %v1567_v31, %v1577_v43  ;;  %v1582_v46 = vsel %vm241_vm0, %v1580_v44, 0.0  ;;  %v3791_v43 = vld [vmem:[#allocation5] ss:$0 sm:$0xff] }
 0xadd   :  { %1583 = vadd.xlane.f32.xlu1 %v1582_v46 }
 0xade   :  { %v1581_v47 = vmul.f32 %v1579_v45, %v1579_v45 }
 0xae0   :  { %v1585_v48 = vsel %vm241_vm0, %v1581_v47, 0.0 }
 0xae1   :  { %1586 = vadd.xlane.f32.xlu0 %v1585_v48 }
 0xb66   :  { %v1584_v51 = vpop.xlane.xlu1 %1583 }
 0xb67   :  { %v1588_v52 = vmul.f32 0.03125, %v1584_v51 }
 0xb69   :  { %v1590_v53 = vadd.f32 1e-12, %v1588_v52 }
 0xb6a   :  { %v1587_v42 = vpop.xlane.xlu0 %1586 }
 0xb6b   :  { %3741 = vrsqrt.f32 %v1590_v53  ;;  %v1589_v54 = vmul.f32 0.03125, %v1587_v42 }
 0xb6d   :  { %v1591_v55 = vadd.f32 1e-12, %v1589_v54 }
 0xb6f   :  { %3743 = vrsqrt.f32 %v1591_v55 }
 0xb78   :  { %v3742_v56 = vpop.eup %3741 }
 0xb79   :  { %v1594_v57 = vmul.f32 %v3742_v56, %v1578_v40 }
 0xb7b   :  { %v1602_v61 = vmul.f32 %v3162_v58, %v1594_v57 }
 0xb7c   :  { %v3744_v59 = vpop.eup %3743 }
 0xb7d   :  { %v1595_v60 = vmul.f32 %v3744_v59, %v1579_v45  ;;  %v4603_v0 = vadd.f32 %v3163_v62, %v1602_v61 }
 0xb7f   :  { %v1603_v63 = vmul.f32 %v3162_v58, %v1595_v60 }
 0xb81   :  { %v4605_v2 = vadd.f32 %v3163_v62, %v1603_v63 }
 0xb83   :  { %v1617_v3 = vpack.c.bf16 %v4605_v2, %v4603_v0 }
 0xb85   :  { %3467 = vmatmul.mubr.msk.bf16.vlgmr.msra.gmra.mxu0 %vm241_vm0, %v1617_v3 }
 0xb86   :  { %3472 = vmatprep.mubr.msk.bf16.mxu0 %vm4107_vm1, %v4106_v15 }
 0xc45   :  { %v1675_v38 = vpop.f32.mrf.mxu0 }
 0xc46   :  { %v1676_v4 = vadd.f32 %v3168_v6, %v1675_v38 }
 0xc47   :  { %v3468_v7 = vpop.f32.mrf.mxu0 }
 0xc48   :  { %v4612_v5 = vpack.c.bf16 %v1676_v4, %v1676_v4 }
 0xc49   :  { %v1678_v8 = vpop.f32.mrf.mxu0 }
 0xc4a   :  { %1734 = vrot.lane.b32.xlu0 %v4612_v5, %s4108_s29  ;;  %1684 = vrot.lane.b32.xlu1 %v4612_v5, %s4109_s1  ;;  %v1679_v10 = vadd.f32 %v3168_v6, %v1678_v8  ;;  %v3792_v8 = vld [vmem:[#allocation5 + $0x1] ss:$0 sm:$0xff] }
 0xc4b   :  { %v3469_v9 = vpop.f32.mrf.mxu0 }
 0xc4c   :  { %v4626_v11 = vpack.c.bf16 %v1679_v10, %v1679_v10 }
 0xc4e   :  { %1782 = vrot.lane.b32.xlu0 %v4612_v5, %s4113_s25  ;;  %1784 = vrot.lane.b32.xlu1 %v4612_v5, %s4110_s5 }
 0xc52   :  { %1832 = vrot.lane.b32.xlu0 %v4612_v5, %s4114_s22  ;;  %1732 = vrot.lane.b32.xlu1 %v4612_v5, %s4112_s23 }
 0xc56   :  { %1834 = vrot.lane.b32.xlu1 %v4612_v5, %s4111_s15  ;;  %1984 = vrot.lane.b32.xlu0 %v4626_v11, %s4110_s5 }
 0xc5a   :  { %2034 = vrot.lane.b32.xlu0 %v4626_v11, %s4111_s15  ;;  %1884 = vrot.lane.b32.xlu1 %v4626_v11, %s4109_s1 }
 0xc5e   :  { %2032 = vrot.lane.b32.xlu0 %v4626_v11, %s4114_s22  ;;  %1934 = vrot.lane.b32.xlu1 %v4626_v11, %s4108_s29 }
 0xc62   :  { %1932 = vrot.lane.b32.xlu1 %v4626_v11, %s4112_s23 }
 0xc66   :  { %1982 = vrot.lane.b32.xlu1 %v4626_v11, %s4113_s25 }
 0xc6a   :  { %2171 = vrot.lane.b32.xlu1 %v4612_v5, %s4117_s26 }
 0xcbc   :  { %v1735_v12 = vpop.permute.xlu0 %1734  ;;  %v1685_v13 = vpop.permute.xlu1 %1684 }
 0xcbd   :  { %v1740_v14 = vsel %vm365_vm2, %v1735_v12, 0  ;;  %v1690_v16 = vsel %vm365_vm2, %v1685_v13, 0 }
 0xcbe   :  { %3471 = vmatpush3.bf16.xpose.msra.mxu0 %v1690_v16  ;;  %3477 = vmatpush3.bf16.xpose.msra.mxu1 %v1740_v14 }
 0xcbf   :  { %3482 = vmatprep.subr.bf16.mxu0 %v4106_v15  ;;  %3488 = vmatprep.subr.bf16.mxu1 %v4106_v15 }
 0xcc0   :  { %v1785_v17 = vpop.permute.xlu1 %1784  ;;  %v1783_v18 = vpop.permute.xlu0 %1782 }
 0xcc1   :  { %v1790_v21 = vsel %vm365_vm2, %v1785_v17, 0 }
 0xcc4   :  { %v1733_v19 = vpop.permute.xlu1 %1732  ;;  %v1833_v24 = vpop.permute.xlu0 %1832 }
 0xcc5   :  { %3473 = vmatmul.mubr.msk.bf16.vlgmr.msra.gmra.mxu0 %vm365_vm2, %v4612_v5  ;;  %3479 = vmatmul.mubr.msk.bf16.vlgmr.msra.gmra.mxu1 %vm365_vm2, %v1733_v19 }
 0xcc6   :  { %3483 = vmatpush3.bf16.xpose.msra.mxu0 %v1790_v21  ;;  %3484 = vmatprep.mubr.msk.bf16.mxu0 %vm4107_vm1, %v4106_v15 }
 0xcc7   :  { %3494 = vmatprep.subr.bf16.mxu0 %v4106_v15  ;;  %3490 = vmatprep.mubr.msk.bf16.mxu1 %vm4107_vm1, %v4106_v15 }
 0xcc8   :  { %v1835_v22 = vpop.permute.xlu1 %1834  ;;  %v1985_v20 = vpop.permute.xlu0 %1984 }
 0xcc9   :  { %v1840_v23 = vsel %vm365_vm2, %v1835_v22, 0  ;;  %v1990_v33 = vsel %vm365_vm2, %v1985_v20, 0 }
 0xcca   :  { %3489 = vmatpush3.bf16.xpose.msra.mxu1 %v1840_v23 }
 0xccb   :  { %3500 = vmatprep.subr.bf16.mxu1 %v4106_v15 }
 0xccc   :  { %v1885_v25 = vpop.permute.xlu1 %1884  ;;  %v2035_v34 = vpop.permute.xlu0 %2034 }
 0xccd   :  { %v1890_v27 = vsel %vm365_vm2, %v1885_v25, 0  ;;  %3485 = vmatmul.mubr.msk.bf16.vlgmr.msra.gmra.mxu0 %vm365_vm2, %v1783_v18  ;;  %v2040_v36 = vsel %vm365_vm2, %v2035_v34, 0 }
 0xcce   :  { %3495 = vmatpush3.bf16.xpose.msra.mxu0 %v1890_v27  ;;  %3496 = vmatprep.mubr.msk.bf16.mxu0 %vm4107_vm1, %v4106_v15 }
 0xccf   :  { %3506 = vmatprep.subr.bf16.mxu0 %v4106_v15 }
 0xcd0   :  { %v1935_v28 = vpop.permute.xlu1 %1934  ;;  %v2033_v39 = vpop.permute.xlu0 %2032 }
 0xcd1   :  { %v1940_v29 = vsel %vm365_vm2, %v1935_v28, 0  ;;  %3491 = vmatmul.mubr.msk.bf16.vlgmr.msra.gmra.mxu1 %vm365_vm2, %v1833_v24 }
 0xcd2   :  { %3501 = vmatpush3.bf16.xpose.msra.mxu1 %v1940_v29  ;;  %3502 = vmatprep.mubr.msk.bf16.mxu1 %vm4107_vm1, %v4106_v15 }
 0xcd3   :  { %3512 = vmatprep.subr.bf16.mxu1 %v4106_v15 }
 0xcd4   :  { %v1933_v30 = vpop.permute.xlu1 %1932 }
 0xcd5   :  { %3497 = vmatmul.mubr.msk.bf16.vlgmr.msra.gmra.mxu0 %vm365_vm2, %v4626_v11 }
 0xcd6   :  { %3507 = vmatpush3.bf16.xpose.msra.mxu0 %v1990_v33  ;;  %3508 = vmatprep.mubr.msk.bf16.mxu0 %vm4107_vm1, %v4106_v15 }
 0xcd7   :  { %3518 = vmatprep.subr.bf16.mxu0 %v4106_v15 }
 0xcd8   :  { %v1983_v35 = vpop.permute.xlu1 %1982 }
 0xcd9   :  { %3503 = vmatmul.mubr.msk.bf16.vlgmr.msra.gmra.mxu1 %vm365_vm2, %v1933_v30 }
 0xcda   :  { %3513 = vmatpush3.bf16.xpose.msra.mxu1 %v2040_v36  ;;  %3514 = vmatprep.mubr.msk.bf16.mxu1 %vm4107_vm1, %v4106_v15 }
 0xcdb   :  { %3524 = vmatprep.subr.bf16.mxu1 %v4106_v15 }
 0xcdc   :  { %v2172_v31 = vpop.permute.xlu1 %2171 }
 0xcdd   :  { %v2177_v37 = vsel %vm862_vm3, %v2172_v31, 0  ;;  %3509 = vmatmul.mubr.msk.bf16.vlgmr.msra.gmra.mxu0 %vm365_vm2, %v1983_v35 }
 0xcde   :  { %3519 = vmatpush3.bf16.msra.mxu0 %v2177_v37  ;;  %3520 = vmatprep.mubr.msk.bf16.mxu0 %vm4107_vm1, %v4106_v15 }
 0xcdf   :  { %3530 = vmatprep.subr.bf16.mxu0 %v4106_v15 }
 0xce1   :  { %3515 = vmatmul.mubr.msk.bf16.vlgmr.msra.gmra.mxu1 %vm365_vm2, %v2033_v39 }
 0xce2   :  { %3526 = vmatprep.mubr.msk.bf16.mxu1 %vm4107_vm1, %v4106_v15 }
 0xd85   :  { %v1726_v32 = vpop.f32.mrf.mxu0  ;;  %v1776_v40 = vpop.f32.mrf.mxu1 }
 0xd86   :  { %v4691_v41 = vadd.f32 %v4395_v1, %v1726_v32  ;;  %v1777_v44 = vadd.f32 %v3791_v43, %v1776_v40 }
 0xd87   :  { %v3474_v45 = vpop.f32.mrf.mxu0  ;;  %v3480_v46 = vpop.f32.mrf.mxu1 }
 0xd88   :  { %v2085_v47 = vsel %vm365_vm2, %v1777_v44, -inf  ;;  %v2082_v48 = vsel %vm365_vm2, %v4691_v41, -inf }
 0xd89   :  { %v1779_v49 = vpop.f32.mrf.mxu1  ;;  %2086 = vmax.xlane.f32.xlu0 %v2085_v47  ;;  %2083 = vmax.xlane.f32.xlu1 %v2082_v48  ;;  %v1729_v50 = vpop.f32.mrf.mxu0 }
 0xd8b   :  { %v3475_v51 = vpop.f32.mrf.mxu0  ;;  %v3481_v52 = vpop.f32.mrf.mxu1 }
 0xd8d   :  { %v1826_v53 = vpop.f32.mrf.mxu0 }
 0xd8e   :  { %v4696_v42 = vadd.f32 %v3791_v43, %v1826_v53 }
 0xd8f   :  { %v3486_v1 = vpop.f32.mrf.mxu0 }
 0xd90   :  { %v2088_v54 = vsel %vm365_vm2, %v4696_v42, -inf }
 0xd91   :  { %v1876_v55 = vpop.f32.mrf.mxu1  ;;  %2089 = vmax.xlane.f32.xlu0 %v2088_v54  ;;  %v1829_v56 = vpop.f32.mrf.mxu0 }
 0xd92   :  { %v1877_v57 = vadd.f32 %v3791_v43, %v1876_v55 }
 0xd93   :  { %v3487_v58 = vpop.f32.mrf.mxu0  ;;  %v3492_v59 = vpop.f32.mrf.mxu1 }
 0xd94   :  { %v2091_v60 = vsel %vm365_vm2, %v1877_v57, -inf }
 0xd95   :  { %v1879_v61 = vpop.f32.mrf.mxu1  ;;  %2092 = vmax.xlane.f32.xlu0 %v2091_v60  ;;  %v1926_v62 = vpop.f32.mrf.mxu0 }
 0xd96   :  { %v4702_v63 = vadd.f32 %v4412_v26, %v1926_v62 }
 0xd97   :  { %v3493_v3 = vpop.f32.mrf.mxu1  ;;  %v3498_v6 = vpop.f32.mrf.mxu0 }
 0xd98   :  { %v2094_v38 = vsel %vm365_vm2, %v4702_v63, -inf }
 0xd99   :  { %v1976_v4 = vpop.f32.mrf.mxu1  ;;  %2095 = vmax.xlane.f32.xlu1 %v2094_v38  ;;  %v1929_v7 = vpop.f32.mrf.mxu0 }
 0xd9a   :  { %v4706_v9 = vadd.f32 %v3792_v8, %v1976_v4 }
 0xd9b   :  { %v3499_v10 = vpop.f32.mrf.mxu0  ;;  %v3504_v12 = vpop.f32.mrf.mxu1 }
 0xd9c   :  { %v2097_v13 = vsel %vm365_vm2, %v4706_v9, -inf }
 0xd9d   :  { %v1979_v14 = vpop.f32.mrf.mxu1  ;;  %2098 = vmax.xlane.f32.xlu0 %v2097_v13  ;;  %v2026_v26 = vpop.f32.mrf.mxu0 }
 0xd9e   :  { %v2027_v16 = vadd.f32 %v3792_v8, %v2026_v26 }
 0xd9f   :  { %v3505_v17 = vpop.f32.mrf.mxu1  ;;  %v3510_v18 = vpop.f32.mrf.mxu0 }
 0xda0   :  { %v2100_v19 = vsel %vm365_vm2, %v2027_v16, -inf }
 0xda1   :  { %v2076_v21 = vpop.f32.mrf.mxu1  ;;  %2101 = vmax.xlane.f32.xlu1 %v2100_v19  ;;  %v2029_v22 = vpop.f32.mrf.mxu0 }
 0xda2   :  { %v2077_v23 = vadd.f32 %v3792_v8, %v2076_v21 }
 0xda3   :  { %v3511_v24 = vpop.f32.mrf.mxu0  ;;  %v3516_v25 = vpop.f32.mrf.mxu1 }
 0xda4   :  { %v2103_v27 = vsel %vm365_vm2, %v2077_v23, -inf }
 0xda5   :  { %v2079_v20 = vpop.f32.mrf.mxu1  ;;  %2104 = vmax.xlane.f32.xlu0 %v2103_v27 }
 0xda7   :  { %v3517_v28 = vpop.f32.mrf.mxu1 }
 0xdb2   :  { %2269 = vrot.lane.b32.xlu1 %v4612_v5, %s4116_s8 }
 0xdb6   :  { %2318 = vrot.lane.b32.xlu1 %v4612_v5, %s4118_s27 }
 0xdbb   :  { %2220 = vrot.lane.b32.xlu0 %v4612_v5, %s4115_s3 }
 0xe12   :  { %v2087_v29 = vpop.xlane.xlu0 %2086  ;;  %v2084_v30 = vpop.xlane.xlu1 %2083 }
 0xe13   :  { %v2107_v33 = vsub.f32 %v1777_v44, %v2087_v29  ;;  %v2106_v34 = vsub.f32 %v4691_v41, %v2084_v30 }
 0xe15   :  { %v2116_v35 = vmul.f32 1.442695, %v2107_v33  ;;  %v2114_v36 = vmul.f32 1.442695, %v2106_v34 }
 0xe17   :  { %3745 = vpow2.f32 %v2116_v35 }
 0xe18   :  { %3747 = vpow2.f32 %v2114_v36 }
 0xe1a   :  { %v2090_v31 = vpop.xlane.xlu0 %2089 }
 0xe1b   :  { %v2108_v50 = vsub.f32 %v4696_v42, %v2090_v31 }
 0xe1d   :  { %v2118_v52 = vmul.f32 1.442695, %v2108_v50 }
 0xe1e   :  { %v2093_v37 = vpop.xlane.xlu0 %2092 }
 0xe1f   :  { %v2109_v39 = vsub.f32 %v1877_v57, %v2093_v37 }
 0xe21   :  { %v2120_v32 = vmul.f32 1.442695, %v2109_v39 }
 0xe22   :  { %v2096_v51 = vpop.xlane.xlu1 %2095 }
 0xe23   :  { %3749 = vpow2.f32 %v2120_v32  ;;  %v2110_v53 = vsub.f32 %v4702_v63, %v2096_v51 }
 0xe24   :  { %v3746_v40 = vpop.eup %3745  ;;  %3751 = vpow2.f32 %v2118_v52 }
 0xe25   :  { %v3748_v43 = vpop.eup %3747  ;;  %v2133_v45 = vsel %vm365_vm2, %v3746_v40, 0.0  ;;  %v2122_v54 = vmul.f32 1.442695, %v2110_v53 }
 0xe26   :  { %2134 = vadd.xlane.f32.xlu0 %v2133_v45  ;;  %v2130_v5 = vsel %vm365_vm2, %v3748_v43, 0.0  ;;  %v2099_v44 = vpop.xlane.xlu0 %2098 }
 0xe27   :  { %2131 = vadd.xlane.f32.xlu1 %v2130_v5  ;;  %v2111_v56 = vsub.f32 %v4706_v9, %v2099_v44  ;;  %3753 = vpow2.f32 %v2122_v54 }
 0xe29   :  { %v2124_v58 = vmul.f32 1.442695, %v2111_v56 }
 0xe2a   :  { %v2102_v1 = vpop.xlane.xlu1 %2101 }
 0xe2b   :  { %v2112_v55 = vsub.f32 %v2027_v16, %v2102_v1 }
 0xe2d   :  { %v2126_v57 = vmul.f32 1.442695, %v2112_v55 }
 0xe2e   :  { %v2105_v46 = vpop.xlane.xlu0 %2104  ;;  %v2270_v9 = vpop.permute.xlu1 %2269 }
 0xe2f   :  { %v2113_v59 = vsub.f32 %v2077_v23, %v2105_v46  ;;  %3755 = vpow2.f32 %v2126_v57 }
 0xe30   :  { %v4721_v41 = vpop.eup %3749  ;;  %3757 = vpow2.f32 %v2124_v58 }
 0xe31   :  { %v2139_v47 = vsel %vm365_vm2, %v4721_v41, 0.0  ;;  %v2128_v42 = vmul.f32 1.442695, %v2113_v59  ;;  %v3752_v60 = vpop.eup %3751 }
 0xe32   :  { %2140 = vadd.xlane.f32.xlu0 %v2139_v47  ;;  %v2221_v48 = vpop.permute.xlu0 %2220  ;;  %v2136_v61 = vsel %vm365_vm2, %v3752_v60, 0.0  ;;  %v2319_v10 = vpop.permute.xlu1 %2318 }
 0xe33   :  { %v2226_v49 = vsel %vm862_vm3, %v2221_v48, 0  ;;  %3759 = vpow2.f32 %v2128_v42  ;;  %v2324_v22 = vsel %vm862_vm3, %v2319_v10, 0 }
 0xe34   :  { %3525 = vmatpush3.bf16.msra.mxu1 %v2226_v49  ;;  %v4735_v62 = vpop.eup %3753 }
 0xe35   :  { %3536 = vmatprep.subr.bf16.mxu1 %v4106_v15  ;;  %v2142_v63 = vsel %vm365_vm2, %v4735_v62, 0.0 }
 0xe38   :  { %2382 = vrot.lane.b32.xlu1 %v4626_v11, %s4117_s26 }
 0xe3c   :  { %v4739_v3 = vpop.eup %3755 }
 0xe3d   :  { %v4741_v6 = vpop.eup %3757  ;;  %v2148_v38 = vsel %vm365_vm2, %v4739_v3, 0.0 }
 0xe3e   :  { %v2145_v4 = vsel %vm365_vm2, %v4741_v6, 0.0 }
 0xe40   :  { %v4747_v7 = vpop.eup %3759 }
 0xe41   :  { %v2151_v8 = vsel %vm365_vm2, %v4747_v7, 0.0 }
 0xe48   :  { %2431 = vrot.lane.b32.xlu0 %v4626_v11, %s4115_s3 }
 0xe5c   :  { %2137 = vadd.xlane.f32.xlu1 %v2136_v61 }
 0xe60   :  { %2143 = vadd.xlane.f32.xlu1 %v2142_v63 }
 0xe64   :  { %2149 = vadd.xlane.f32.xlu1 %v2148_v38 }
 0xe67   :  { %2146 = vadd.xlane.f32.xlu0 %v2145_v4 }
 0xe6b   :  { %2152 = vadd.xlane.f32.xlu0 %v2151_v8  ;;  %v3685_v8 = vld [vmem:[%s4887_s6 + $0x18] sm:$0xff]  }
 0xe75   :  { %2480 = vrot.lane.b32.xlu1 %v4626_v11, %s4116_s8 }
 0xe81   :  { %2529 = vrot.lane.b32.xlu0 %v4626_v11, %s4118_s27  ;;  %v2275_v11 = vsel %vm862_vm3, %v2270_v9, 0 }
 0xeaf   :  { %v2135_v12 = vpop.xlane.xlu0 %2134 }
 0xeb0   :  { %3761 = vrcp.f32 %v2135_v12  ;;  %v2132_v13 = vpop.xlane.xlu1 %2131 }
 0xeb1   :  { %3763 = vrcp.f32 %v2132_v13  ;;  %v3686_v13 = vld [vmem:[%s4887_s6 + $0x10] sm:$0xff]  }
 0xeb4   :  { %v2383_v28 = vpop.permute.xlu1 %2382 }
 0xeb5   :  { %v2388_v32 = vsel %vm862_vm3, %v2383_v28, 0 }
 0xebb   :  { %v2141_v14 = vpop.xlane.xlu0 %2140 }
 0xebc   :  { %3765 = vrcp.f32 %v2141_v14 }
 0xebd   :  { %v3762_v26 = vpop.eup %3761 }
 0xebe   :  { %v3764_v16 = vpop.eup %3763  ;;  %v2163_v17 = vmul.f32 %v3762_v26, %v3746_v40 }
 0xebf   :  { %v2162_v18 = vmul.f32 %v3764_v16, %v3748_v43  ;;  %v2432_v25 = vpop.permute.xlu0 %2431 }
 0xec0   :  { %v2219_v19 = vpack.c.bf16 %v2163_v17, %v2163_v17  ;;  %v2437_v20 = vsel %vm862_vm3, %v2432_v25, 0 }
 0xec1   :  { %v2170_v21 = vpack.c.bf16 %v2162_v18, %v2162_v18 }
 0xec2   :  { %3527 = vmatmul.mubr.msk.bf16.vlgmr.msra.gmra.mxu1 %vm365_vm2, %v2219_v19 }
 0xec3   :  { %3521 = vmatmul.mubr.msk.bf16.vlgmr.msra.gmra.mxu0 %vm365_vm2, %v2170_v21  ;;  %3537 = vmatpush3.bf16.msra.mxu1 %v2324_v22 }
 0xec4   :  { %3531 = vmatpush3.bf16.msra.mxu0 %v2275_v11  ;;  %3538 = vmatprep.mubr.msk.bf16.mxu1 %vm4107_vm1, %v4106_v15 }
 0xec5   :  { %3548 = vmatprep.subr.bf16.mxu1 %v4106_v15  ;;  %3532 = vmatprep.mubr.msk.bf16.mxu0 %vm4107_vm1, %v4106_v15 }
 0xec6   :  { %3542 = vmatprep.subr.bf16.mxu0 %v4106_v15 }
 0xec9   :  { %v3766_v23 = vpop.eup %3765 }
 0xeca   :  { %v2165_v24 = vmul.f32 %v3766_v23, %v4721_v41 }
 0xecc   :  { %v2317_v27 = vpack.c.bf16 %v2165_v24, %v2165_v24 }
 0xece   :  { %3539 = vmatmul.mubr.msk.bf16.vlgmr.msra.gmra.mxu1 %vm365_vm2, %v2317_v27 }
 0xecf   :  { %3549 = vmatpush3.bf16.msra.mxu1 %v2437_v20  ;;  %3550 = vmatprep.mubr.msk.bf16.mxu1 %vm4107_vm1, %v4106_v15 }
 0xed0   :  { %3560 = vmatprep.subr.bf16.mxu1 %v4106_v15 }
 0xee5   :  { %v2138_v29 = vpop.xlane.xlu1 %2137 }
 0xee6   :  { %3767 = vrcp.f32 %v2138_v29 }
 0xee9   :  { %v2144_v30 = vpop.xlane.xlu1 %2143 }
 0xeea   :  { %3769 = vrcp.f32 %v2144_v30 }
 0xeed   :  { %v2150_v33 = vpop.xlane.xlu1 %2149 }
 0xef0   :  { %v2147_v34 = vpop.xlane.xlu0 %2146 }
 0xef1   :  { %3771 = vrcp.f32 %v2147_v34  ;;  %v2481_v43 = vpop.permute.xlu1 %2480 }
 0xef2   :  { %3773 = vrcp.f32 %v2150_v33  ;;  %v2486_v41 = vsel %vm862_vm3, %v2481_v43, 0 }
 0xef3   :  { %v3768_v35 = vpop.eup %3767 }
 0xef4   :  { %v2153_v36 = vpop.xlane.xlu0 %2152  ;;  %v2164_v31 = vmul.f32 %v3768_v35, %v3752_v60 }
 0xef5   :  { %3775 = vrcp.f32 %v2153_v36 }
 0xef6   :  { %v2268_v37 = vpack.c.bf16 %v2164_v31, %v2164_v31 }
 0xef7   :  { %v3770_v39 = vpop.eup %3769 }
 0xef8   :  { %3533 = vmatmul.mubr.msk.bf16.vlgmr.msra.gmra.mxu0 %vm365_vm2, %v2268_v37  ;;  %v2166_v40 = vmul.f32 %v3770_v39, %v4735_v62  ;;  %v2530_v47 = vpop.permute.xlu0 %2529 }
 0xef9   :  { %3543 = vmatpush3.bf16.msra.mxu0 %v2388_v32  ;;  %3544 = vmatprep.mubr.msk.bf16.mxu0 %vm4107_vm1, %v4106_v15  ;;  %v2535_v51 = vsel %vm862_vm3, %v2530_v47, 0  ;;  %v3192_v47 = vld [vmem:[#allocation11 + $0x1] ss:$0 sm:$0xff] }
 0xefa   :  { %3554 = vmatprep.subr.bf16.mxu0 %v4106_v15  ;;  %v2381_v5 = vpack.c.bf16 %v2166_v40, %v2166_v40 }
 0xefe   :  { %v3772_v45 = vpop.eup %3771 }
 0xeff   :  { %v3774_v44 = vpop.eup %3773  ;;  %v2167_v46 = vmul.f32 %v3772_v45, %v4741_v6 }
 0xf00   :  { %3545 = vmatmul.mubr.msk.bf16.vlgmr.msra.gmra.mxu0 %vm365_vm2, %v2381_v5  ;;  %v2168_v50 = vmul.f32 %v3774_v44, %v4739_v3 }
 0xf01   :  { %3555 = vmatpush3.bf16.msra.mxu0 %v2486_v41  ;;  %v2430_v48 = vpack.c.bf16 %v2167_v46, %v2167_v46  ;;  %3556 = vmatprep.mubr.msk.bf16.mxu0 %vm4107_vm1, %v4106_v15 }
 0xf02   :  { %v3776_v49 = vpop.eup %3775  ;;  %3566 = vmatprep.subr.bf16.mxu0 %v4106_v15  ;;  %v2479_v53 = vpack.c.bf16 %v2168_v50, %v2168_v50 }
 0xf03   :  { %3551 = vmatmul.mubr.msk.bf16.vlgmr.msra.gmra.mxu1 %vm365_vm2, %v2430_v48  ;;  %v2169_v52 = vmul.f32 %v3776_v49, %v4747_v7 }
 0xf04   :  { %3561 = vmatpush3.bf16.msra.mxu1 %v2535_v51  ;;  %3562 = vmatprep.mubr.msk.bf16.mxu1 %vm4107_vm1, %v4106_v15 }
 0xf05   :  { %3574 = vmatprep.subr.bf16.mxu1 %v4106_v15  ;;  %v2528_v1 = vpack.c.bf16 %v2169_v52, %v2169_v52 }
 0xf08   :  { %3557 = vmatmul.mubr.msk.bf16.vlgmr.msra.gmra.mxu0 %vm365_vm2, %v2479_v53 }
 0xf09   :  { %3570 = vmatprep.mubr.msk.bf16.mxu0 %vm4107_vm1, %v4106_v15  ;;  %3567 = vmatpush3.bf16.msra.mxu0 %v3685_v8 }
 0xf0a   :  { %3568 = vmatprep.subr.bf16.mxu0 %v4106_v15 }
 0xf0b   :  { %3563 = vmatmul.mubr.msk.bf16.vlgmr.msra.gmra.mxu1 %vm365_vm2, %v2528_v1 }
 0xf0c   :  { %3578 = vmatprep.mubr.msk.bf16.mxu1 %vm4107_vm1, %v4106_v15 }
 0xf0d   :  { %3569 = vmatpush3.bf16.msra.mxu0 %v3686_v13 }
 0xf0e   :  { %3582 = vmatprep.subr.bf16.mxu0 %v4106_v15 }
 0xf82   :  { %v2262_v54 = vpop.f32.mrf.mxu1 }
 0xf83   :  { %v2213_v55 = vpop.f32.mrf.mxu0 }
 0xf84   :  { %v3528_v56 = vpop.f32.mrf.mxu1 }
 0xf85   :  { %v3522_v57 = vpop.f32.mrf.mxu0 }
 0xf86   :  { %v2265_v58 = vpop.f32.mrf.mxu1 }
 0xf87   :  { %v2216_v59 = vpop.f32.mrf.mxu0 }
 0xf88   :  { %v3529_v42 = vpop.f32.mrf.mxu1 }
 0xf89   :  { %v3523_v60 = vpop.f32.mrf.mxu0 }
 0xf8e   :  { %v2360_v61 = vpop.f32.mrf.mxu1 }
 0xf90   :  { %v3540_v62 = vpop.f32.mrf.mxu1 }
 0xf92   :  { %v2363_v63 = vpop.f32.mrf.mxu1 }
 0xf94   :  { %v3541_v3 = vpop.f32.mrf.mxu1 }
 0xfb8   :  { %v2311_v6 = vpop.f32.mrf.mxu0 }
 0xfba   :  { %v3534_v38 = vpop.f32.mrf.mxu0 }
 0xfbc   :  { %v2314_v4 = vpop.f32.mrf.mxu0 }
 0xfbe   :  { %v3535_v7 = vpop.f32.mrf.mxu0 }
 0xfc0   :  { %v2424_v9 = vpop.f32.mrf.mxu0 }
 0xfc2   :  { %v3546_v10 = vpop.f32.mrf.mxu0 }
 0xfc3   :  { %v2473_v12 = vpop.f32.mrf.mxu1 }
 0xfc4   :  { %v2427_v14 = vpop.f32.mrf.mxu0  ;;  %v3658_v26 = vpack.i.bf16 %v2473_v12, %v2262_v54 }
 0xfc5   :  { %v3552_v16 = vpop.f32.mrf.mxu1  ;;  %v3196_v14 = vld [vmem:[#allocation13 + $0x1] ss:$0 sm:$0xff] }
 0xfc6   :  { %v3547_v17 = vpop.f32.mrf.mxu0  ;;  %3659 = vrot.lane.b32.xlu1 %v3658_v26, %s4099_s28 }
 0xfc7   :  { %v2476_v18 = vpop.f32.mrf.mxu1 }
 0xfc8   :  { %v2522_v19 = vpop.f32.mrf.mxu0  ;;  %v3197_v18 = vld [vmem:[#allocation14 + $0x1] ss:$0 sm:$0xff] }
 0xfc9   :  { %v3663_v21 = vpack.i.bf16 %v2522_v19, %v2311_v6  ;;  %v3553_v22 = vpop.f32.mrf.mxu1  ;;  %v3688_v6 = vld [vmem:[%s4891_s10 + $0x10] sm:$0xff]  }
 0xfca   :  { %v3558_v11 = vpop.f32.mrf.mxu0 }
 0xfcb   :  { %3664 = vrot.lane.b32.xlu0 %v3663_v21, %s4090_s24  ;;  %v2571_v23 = vpop.f32.mrf.mxu1 }
 0xfcc   :  { %v2525_v24 = vpop.f32.mrf.mxu0  ;;  %v3668_v25 = vpack.i.bf16 %v2571_v23, %v2360_v61  ;;  %v3689_v23 = vld [vmem:[%s4893_s12 + $0x38] sm:$0xff]  }
 0xfcd   :  { %v3564_v27 = vpop.f32.mrf.mxu1  ;;  %v3690_v24 = vld [vmem:[%s4893_s12 + $0x30] sm:$0xff]  }
 0xfce   :  { %v3559_v20 = vpop.f32.mrf.mxu0  ;;  %3669 = vrot.lane.b32.xlu1 %v3668_v25, %s4119_s30  ;;  %v3691_v25 = vld [vmem:[%s4893_s12 + $0x28] sm:$0xff]   ;;  %v3692_v27 = vld [vmem:[%s4893_s12 + $0x20] sm:$0xff]  }
 0xfcf   :  { %v2574_v28 = vpop.f32.mrf.mxu1  ;;  %v3202_v20 = vld [vmem:[#allocation16 + $0x1] ss:$0 sm:$0xff] }
 0xfd1   :  { %v3565_v29 = vpop.f32.mrf.mxu1 }
0x1038   :  { %v3660_v30 = vpop.permute.xlu1 %3659 }
0x1039   :  { %v3662_v33 = vunpack.i.h.bf16 %v3660_v30  ;;  %v3661_v34 = vunpack.i.l.bf16 %v3660_v30 }
0x103b   :  { %v2378_v39 = vsel %vm365_vm2, %v2213_v55, %v3661_v34  ;;  %v2589_v32 = vsel %vm365_vm2, %v2424_v9, %v3662_v33 }
0x103d   :  { %v3665_v35 = vpop.permute.xlu0 %3664 }
0x103e   :  { %v3667_v36 = vunpack.i.h.bf16 %v3665_v35  ;;  %v3666_v31 = vunpack.i.l.bf16 %v3665_v35 }
0x1040   :  { %v3670_v37 = vpop.permute.xlu1 %3669  ;;  %v2590_v45 = vsel %vm1066_vm4, %v2589_v32, %v3667_v36  ;;  %v2379_v5 = vsel %vm1066_vm4, %v2378_v39, %v3666_v31 }
0x1041   :  { %v3672_v40 = vunpack.i.h.bf16 %v3670_v37  ;;  %v3671_v43 = vunpack.i.l.bf16 %v3670_v37 }
0x1043   :  { %v2380_v44 = vsel %vm1068_vm5, %v2379_v5, %v3671_v43  ;;  %v2591_v46 = vsel %vm1068_vm5, %v2590_v45, %v3672_v40 }
0x1044   :  { %v2597_v41 = vpack.c.bf16 %v2591_v46, %v2380_v44 }
0x1046   :  { %3571 = vmatmul.mubr.msk.bf16.vlgmr.msra.gmra.mxu0 %vm241_vm0, %v2597_v41 }
0x1047   :  { %3590 = vmatprep.mubr.msk.bf16.mxu0 %vm4107_vm1, %v4106_v15  ;;  %3583 = vmatpush3.bf16.msra.mxu0 %v3689_v23 }
0x1048   :  { %3584 = vmatprep.subr.bf16.mxu0 %v4106_v15 }
0x104b   :  { %3585 = vmatpush3.bf16.msra.mxu0 %v3690_v24 }
0x104c   :  { %3586 = vmatprep.subr.bf16.mxu0 %v4106_v15 }
0x104f   :  { %3587 = vmatpush3.bf16.msra.mxu0 %v3691_v25 }
0x1050   :  { %3588 = vmatprep.subr.bf16.mxu0 %v4106_v15 }
0x1053   :  { %3589 = vmatpush3.bf16.msra.mxu0 %v3692_v27  ;;  %v3221_v27 = vld [vmem:[#allocation20 + $0x1] ss:$0 sm:$0xff] }
0x1106   :  { %v2655_v48 = vpop.f32.mrf.mxu0 }
0x1107   :  { %v2656_v49 = vadd.f32 %v3192_v47, %v2655_v48 }
0x1108   :  { %v3572_v50 = vpop.f32.mrf.mxu0 }
0x1109   :  { %v2662_v51 = vadd.f32 %v2656_v49, %v4603_v0 }
0x110a   :  { %v2658_v52 = vpop.f32.mrf.mxu0 }
0x110b   :  { %v2659_v53 = vadd.f32 %v3192_v47, %v2658_v52  ;;  %v2668_v1 = vsel %vm241_vm0, %v2662_v51, 0.0 }
0x110c   :  { %2669 = vadd.xlane.f32.xlu0 %v2668_v1  ;;  %v3573_v54 = vpop.f32.mrf.mxu0  ;;  %v3214_v1 = vld [vmem:[#allocation17 + $0x1] ss:$0 sm:$0xff] }
0x110d   :  { %v2663_v55 = vadd.f32 %v2659_v53, %v4605_v2  ;;  %v3687_v2 = vld [vmem:[%s4891_s10 + $0x18] sm:$0xff]  }
0x110e   :  { %3575 = vmatpush3.bf16.msra.mxu1 %v3687_v2 }
0x110f   :  { %v2671_v56 = vsel %vm241_vm0, %v2663_v55, 0.0  ;;  %3576 = vmatprep.subr.bf16.mxu1 %v4106_v15 }
0x1110   :  { %2672 = vadd.xlane.f32.xlu1 %v2671_v56 }
0x1112   :  { %3577 = vmatpush3.bf16.msra.mxu1 %v3688_v6 }
0x1113   :  { %3594 = vmatprep.subr.bf16.mxu1 %v4106_v15 }
0x1195   :  { %v2670_v57 = vpop.xlane.xlu0 %2669 }
0x1196   :  { %v2674_v58 = vmul.f32 0.03125, %v2670_v57 }
0x1198   :  { %v2676_v59 = vsub.f32 %v2662_v51, %v2674_v58 }
0x1199   :  { %v2673_v42 = vpop.xlane.xlu1 %2672 }
0x119a   :  { %v2675_v60 = vmul.f32 0.03125, %v2673_v42  ;;  %v2678_v61 = vmul.f32 %v2676_v59, %v2676_v59 }
0x119c   :  { %v2677_v62 = vsub.f32 %v2663_v55, %v2675_v60  ;;  %v2680_v0 = vsel %vm241_vm0, %v2678_v61, 0.0 }
0x119d   :  { %2681 = vadd.xlane.f32.xlu0 %v2680_v0 }
0x119e   :  { %v2679_v63 = vmul.f32 %v2677_v62, %v2677_v62 }
0x11a0   :  { %v2683_v3 = vsel %vm241_vm0, %v2679_v63, 0.0 }
0x11a1   :  { %2684 = vadd.xlane.f32.xlu0 %v2683_v3 }
0x1226   :  { %v2682_v38 = vpop.xlane.xlu0 %2681 }
0x1227   :  { %v2686_v4 = vmul.f32 0.03125, %v2682_v38 }
0x1229   :  { %v2688_v7 = vadd.f32 1e-12, %v2686_v4 }
0x122a   :  { %v2685_v8 = vpop.xlane.xlu0 %2684 }
0x122b   :  { %3777 = vrsqrt.f32 %v2688_v7  ;;  %v2687_v9 = vmul.f32 0.03125, %v2685_v8 }
0x122d   :  { %v2689_v10 = vadd.f32 1e-12, %v2687_v9 }
0x122f   :  { %3779 = vrsqrt.f32 %v2689_v10  ;;  %v3693_v10 = vld [vmem:[%s4897_s16 + $0x8] sm:$0xff]  }
0x1238   :  { %v3778_v12 = vpop.eup %3777 }
0x1239   :  { %v2692_v13 = vmul.f32 %v3778_v12, %v2676_v59  ;;  %v3694_v12 = vld [vmem:[%s4897_s16] sm:$0xff]  }
0x123b   :  { %v2700_v17 = vmul.f32 %v3196_v14, %v2692_v13 }
0x123c   :  { %v3780_v26 = vpop.eup %3779 }
0x123d   :  { %v2693_v16 = vmul.f32 %v3780_v26, %v2677_v62  ;;  %v2708_v21 = vadd.f32 %v3197_v18, %v2700_v17 }
0x123f   :  { %v2701_v19 = vmul.f32 %v3196_v14, %v2693_v16 }
0x1241   :  { %v2709_v22 = vadd.f32 %v3197_v18, %v2701_v19 }
0x1243   :  { %v2715_v11 = vpack.c.bf16 %v2709_v22, %v2708_v21 }
0x1245   :  { %3579 = vmatmul.mubr.msk.bf16.vlgmr.msra.gmra.mxu1 %vm241_vm0, %v2715_v11  ;;  %v3220_v11 = vld [vmem:[#allocation19 + $0x1] ss:$0 sm:$0xff] }
0x1246   :  { %3598 = vmatprep.mubr.msk.bf16.mxu1 %vm4107_vm1, %v4106_v15  ;;  %3595 = vmatpush3.bf16.msra.mxu1 %v3693_v10 }
0x1247   :  { %3596 = vmatprep.subr.bf16.mxu1 %v4106_v15 }
0x124a   :  { %3597 = vmatpush3.bf16.msra.mxu1 %v3694_v12 }
0x124b   :  { %3602 = vmatprep.subr.bf16.mxu1 %v4106_v15 }
0x1305   :  { %v2773_v28 = vpop.f32.mrf.mxu1 }
0x1306   :  { %v2774_v29 = vadd.f32 %v3202_v20, %v2773_v28 }
0x1307   :  { %v3580_v30 = vpop.f32.mrf.mxu1 }
0x1308   :  { %v2780_v33 = vmul.f32 %v2774_v29, %v2774_v29 }
0x1309   :  { %v2776_v34 = vpop.f32.mrf.mxu1 }
0x130a   :  { %v2782_v35 = vmul.f32 %v2780_v33, %v2774_v29  ;;  %v2777_v36 = vadd.f32 %v3202_v20, %v2776_v34  ;;  %v3695_v34 = vld [vmem:[%s4899_s18 + $0x8] sm:$0xff]  }
0x130b   :  { %v3581_v31 = vpop.f32.mrf.mxu1 }
0x130c   :  { %v2784_v37 = vmul.f32 0.044715, %v2782_v35  ;;  %v2781_v39 = vmul.f32 %v2777_v36, %v2777_v36  ;;  %v3696_v35 = vld [vmem:[%s4899_s18] sm:$0xff]   ;;  %s4121_s18 = smov [#allocation23]  }
0x130d   :  { %s3104_s0 = sshll.u32 %s4121_s18, 4  ;;  %s3105_s0 = int_to_ptr.vmem [resolvable:$true] %s3104_s0 }
0x130e   :  { %v2786_v32 = vadd.f32 %v2784_v37, %v2774_v29  ;;  %v2783_v40 = vmul.f32 %v2781_v39, %v2777_v36  ;;  %s4053_s29 = scalar_lea.vmem %s3105_s0, 32  ;;  %p4058_p10 = scmp.lt.s32.totalorder %s3105_s0, %s3105_s0 }
0x130f   :  { %p4054_p9 = scmp.ne.s32.totalorder %s3105_s0, %s4053_s29  ;;  %p4059_p11 = scmp.lt.s32.totalorder %s4053_s29, %s4053_s29 }
0x1310   :  { %v2788_v43 = vmul.f32 0.7978846, %v2786_v32  ;;  %v2785_v45 = vmul.f32 0.044715, %v2783_v40 }
0x1311   :  { %p4060_p12 = por %p4059_p11, %p4058_p10 }
0x1312   :  { %3781 = vtanh.f32 %v2788_v43  ;;  %v2787_v5 = vadd.f32 %v2785_v45, %v2777_v36 }
0x1313   :  { %p4061_p13 = pnand %p4060_p12, %p4054_p9 }
0x1314   :  { %v2789_v44 = vmul.f32 0.7978846, %v2787_v5  ;;  %v4120_v5 = vmov 1966171168  }
0x1316   :  { %3783 = vtanh.f32 %v2789_v44  ;;  %v3074_v44 = vunpack.c.l.s4 %v4120_v5 }
0x131f   :  { %v3782_v46 = vpop.eup %3781 }
0x1320   :  { %v2792_v41 = vadd.f32 1.0, %v3782_v46  ;;  %v3076_v46 = vlaneseq }
0x1322   :  { %v2794_v48 = vmul.f32 0.5, %v2792_v41  ;;  %v3077_v41 = vshrl.u32 %v3076_v46, 7 }
0x1323   :  { %v3784_v47 = vpop.eup %3783 }
0x1324   :  { %v2793_v49 = vadd.f32 1.0, %v3784_v47  ;;  %v2796_v51 = vmul.f32 %v2794_v48, %v2774_v29  ;;  %v3226_v47 = vld [vmem:[%s4900_s19] ss:$0 sm:$0xff] }
0x1326   :  { %v2795_v50 = vmul.f32 0.5, %v2793_v49 }
0x1328   :  { %v2797_v52 = vmul.f32 %v2795_v50, %v2777_v36  ;;  %v3222_v36 = vld [vmem:[#allocation22] ss:$0 sm:$0xff] }
0x132a   :  { %v2807_v53 = vpack.c.bf16 %v2797_v52, %v2796_v51 }
0x132c   :  { %3591 = vmatmul.mubr.msk.bf16.vlgmr.msra.gmra.mxu0 %vm1521_vm6, %v2807_v53 }
0x13ec   :  { %v2877_v54 = vpop.f32.mrf.mxu0 }
0x13ed   :  { %v2878_v55 = vadd.f32 %v3214_v1, %v2877_v54 }
0x13ee   :  { %v3592_v56 = vpop.f32.mrf.mxu0 }
0x13ef   :  { %v2884_v57 = vadd.f32 %v2878_v55, %v2708_v21 }
0x13f0   :  { %v2880_v58 = vpop.f32.mrf.mxu0 }
0x13f1   :  { %v2881_v59 = vadd.f32 %v3214_v1, %v2880_v58  ;;  %v2890_v42 = vsel %vm241_vm0, %v2884_v57, 0.0 }
0x13f2   :  { %2891 = vadd.xlane.f32.xlu1 %v2890_v42  ;;  %v3593_v60 = vpop.f32.mrf.mxu0 }
0x13f3   :  { %v2885_v61 = vadd.f32 %v2881_v59, %v2709_v22 }
0x13f5   :  { %v2893_v62 = vsel %vm241_vm0, %v2885_v61, 0.0 }
0x13f6   :  { %2894 = vadd.xlane.f32.xlu0 %v2893_v62 }
0x147b   :  { %v2892_v0 = vpop.xlane.xlu1 %2891 }
0x147c   :  { %v2896_v63 = vmul.f32 0.03125, %v2892_v0 }
0x147e   :  { %v2898_v3 = vsub.f32 %v2884_v57, %v2896_v63 }
0x147f   :  { %v2895_v2 = vpop.xlane.xlu0 %2894 }
0x1480   :  { %v2897_v6 = vmul.f32 0.03125, %v2895_v2  ;;  %v2900_v38 = vmul.f32 %v2898_v3, %v2898_v3 }
0x1482   :  { %v2899_v4 = vsub.f32 %v2885_v61, %v2897_v6  ;;  %v2902_v7 = vsel %vm241_vm0, %v2900_v38, 0.0 }
0x1483   :  { %2903 = vadd.xlane.f32.xlu1 %v2902_v7 }
0x1484   :  { %v2901_v8 = vmul.f32 %v2899_v4, %v2899_v4 }
0x1486   :  { %v2905_v9 = vsel %vm241_vm0, %v2901_v8, 0.0 }
0x1487   :  { %2906 = vadd.xlane.f32.xlu0 %v2905_v9 }
0x150c   :  { %v2904_v13 = vpop.xlane.xlu1 %2903 }
0x150d   :  { %v2908_v14 = vmul.f32 0.03125, %v2904_v13 }
0x150f   :  { %v2910_v26 = vadd.f32 1e-12, %v2908_v14 }
0x1510   :  { %v2907_v16 = vpop.xlane.xlu0 %2906 }
0x1511   :  { %3785 = vrsqrt.f32 %v2910_v26  ;;  %v2909_v17 = vmul.f32 0.03125, %v2907_v16 }
0x1513   :  { %v2911_v18 = vadd.f32 1e-12, %v2909_v17 }
0x1515   :  { %3787 = vrsqrt.f32 %v2911_v18 }
0x151e   :  { %v3786_v19 = vpop.eup %3785 }
0x151f   :  { %v2914_v21 = vmul.f32 %v3786_v19, %v2898_v3 }
0x1521   :  { %v2922_v24 = vmul.f32 %v3220_v11, %v2914_v21 }
0x1522   :  { %v3788_v22 = vpop.eup %3787 }
0x1523   :  { %v2915_v23 = vmul.f32 %v3788_v22, %v2899_v4  ;;  %v2930_v28 = vadd.f32 %v3221_v27, %v2922_v24 }
0x1525   :  { %v2923_v25 = vmul.f32 %v3220_v11, %v2915_v23 }
0x1527   :  { %v2931_v20 = vadd.f32 %v3221_v27, %v2923_v25 }
0x1529   :  { %v2933_v29 = vrot.slane %v2931_v20, 7 }
0x152b   :  { %v2936_v30 = vsel %vm2935_vm7, %v2930_v28, %v2933_v29 }
0x152c   :  { %v2941_v33 = vpack.c.bf16 %v2936_v30, %v2936_v30 }
0x152e   :  { %3599 = vmatmul.mubr.msk.bf16.vlgmr.msra.gmra.mxu1 %vm241_vm0, %v2941_v33 }
0x152f   :  { %3606 = vmatprep.mubr.msk.bf16.mxu1 %vm4107_vm1, %v4106_v15  ;;  %3603 = vmatpush3.bf16.msra.mxu1 %v3695_v34 }
0x1530   :  { %3604 = vmatprep.subr.bf16.mxu1 %v4106_v15  ;;  %v3075_v15 = vunpack.c.0.s8 %v3074_v44 }
0x1532   :  { %v3078_v48 = vsub.s32 %v3075_v15, %v3077_v41 }
0x1533   :  { %3605 = vmatpush3.bf16.msra.mxu1 %v3696_v35 }
0x15ee   :  { %v2998_v31 = vpop.f32.mrf.mxu1 }
0x15ef   :  { %v2999_v37 = vadd.f32 %v3222_v36, %v2998_v31 }
0x15f0   :  { %v3600_v39 = vpop.f32.mrf.mxu1 }
0x15f1   :  { %3789 = vtanh.f32 %v2999_v37 }
0x15f2   :  { %v3001_v32 = vpop.f32.mrf.mxu1 }
0x15f4   :  { %v3601_v40 = vpop.f32.mrf.mxu1 }
0x15fe   :  { %v3790_v43 = vpop.eup %3789 }
0x15ff   :  { %v3009_v45 = vpack.c.bf16 %v3790_v43, %v3790_v43 }
0x1601   :  { %3607 = vmatmul.mubr.msk.bf16.vlgmr.msra.gmra.mxu1 %vm241_vm0, %v3009_v45 }
0x16c1   :  { %v3066_v49 = vpop.f32.mrf.mxu1 }
0x16c2   :  { %v3067_v50 = vadd.f32 %v3226_v47, %v3066_v49 }
0x16c3   :  { %v3608_v51 = vpop.f32.mrf.mxu1 }
0x16c4   :  { %v3079_v52 = vrot.slane %v3067_v50, %v3078_v48 }
0x16c5   :  { %v3069_v53 = vpop.f32.mrf.mxu1 }
0x16c6   :  { %v3080_v1 = vcombine.high %v3079_v52, %v3079_v52  ;;  %3230 = vst.sshfl [vmem:[#allocation23] sm:$0x1 pattern:$0x73625140] %v3079_v52 }
0x16c7   :  { %v3609_v54 = vpop.f32.mrf.mxu1 }
0x16c8   :  { %3231 = vst.sshfl [vmem:[#allocation23 + $0x1] sm:$0x1 pattern:$0x73625140] %v3080_v1 }
0x16c9   :  { %4064 = shalt.err (!%p4061_p13)
}
0x16ca   :  { %3110 = dma.vmem_to_hbm [thread:$0]  %s3105_s0, 32, %s4901_s20, [#allocation4], %s4090_s24, %s4090_s24, %s4091_s2  }
0x16cb   :  { %4087 = dma.done.wait [#allocation4], 32  }
0x16cc   :  { %4088 = vsyncadd [#allocation4], 4294967264 }
0x16cd   :  { %3114 = vsyncpa [#allocation3], 1 }
0x16ce   :  { %3115 = vsyncpa [#allocation6], 1 }
0x16cf   :  { %3116 = vsyncpa [#allocation9], 1 }
0x16d0   :  { %3117 = vsyncpa [#allocation12], 1 }
0x16d1   :  { %3118 = vsyncpa [#allocation15], 1 }
0x16d2   :  { %3119 = vsyncpa [#allocation18], 1 }
0x16d3   :  { %3120 = vsyncpa [#allocation21], 1 }
0x16d4   :  { %3121 = vsyncpa [#allocation4], 1 }

</bundles_post_ra>
